<compile_context>
chip_gen: v6e
topology: v6e:2x2x1
jax: 0.10.0
libtpu: 0.0.40
codegen_flags: <defaults>
</compile_context>

<pallas_src>
import functools

import jax
import jax.numpy as jnp
import numpy as np
from jax.experimental import pallas as pl
from jax.experimental.pallas import tpu as pltpu


def _round_up(x, m):
    return ((x + m - 1) // m) * m


def _choose_m_tile(m, cap=1024):
    """Pick an M tile (multiple of 8, <= cap) and the padded M, preferring a
    grid of at least 2 programs so both v7x TensorCores get work."""
    m8 = _round_up(max(m, 8), 8)
    if m8 >= 2 * cap:
        tm = cap
    else:
        tm = max(8, _round_up((m8 + 1) // 2, 8))
    m_pad = _round_up(m8, tm)
    if m_pad // tm < 2:
        m_pad = 2 * tm          # cheap 2-program grid even for tiny M
    return tm, m_pad


# ---------------------------------------------------------------------------
# Kernel 1: fused (bf16 @ bf16 -> f32) matmul + bias + ReLU (conv layers 1-3,
# applied to im2col patch matrices; output channels stay narrow, review item 1)
# ---------------------------------------------------------------------------
def _matmul_bias_relu_kernel(x_ref, w_ref, b_ref, o_ref):
    acc = jnp.dot(x_ref[...], w_ref[...], preferred_element_type=jnp.float32)
    acc = jnp.maximum(acc + b_ref[...], 0.0)
    o_ref[...] = acc.astype(o_ref.dtype)


def conv_matmul(patches, w, b, *, out_dtype=jnp.bfloat16, tm_cap=1024):
    """(M,K)bf16 @ (K,Cout)bf16 + (1,Cout)f32, fused ReLU, M-tiled parallel grid."""
    m, k = patches.shape
    k2, n_out = w.shape
    assert k == k2 and b.shape == (1, n_out)
    tm, m_pad = _choose_m_tile(m, cap=tm_cap)
    if m_pad != m:
        patches = jnp.pad(patches, ((0, m_pad - m), (0, 0)))
    out = pl.pallas_call(
        _matmul_bias_relu_kernel,
        out_shape=jax.ShapeDtypeStruct((m_pad, n_out), out_dtype),
        grid=(m_pad // tm,),
        in_specs=[
            pl.BlockSpec((tm, k), lambda i: (i, 0)),        # lhs: M-tiled
            pl.BlockSpec((k, n_out), lambda i: (0, 0)),     # rhs: resident
            pl.BlockSpec((1, n_out), lambda i: (0, 0)),     # bias: resident
        ],
        out_specs=pl.BlockSpec((tm, n_out), lambda i: (i, 0)),
        compiler_params=pltpu.CompilerParams(
            dimension_semantics=("parallel",)),
    )(patches, w, b)
    return out[:m] if m_pad != m else out


# ---------------------------------------------------------------------------
# Kernel 2: fused tail = layers 4..6 (exact dense-ified tiny-spatial convs) +
# both latent heads; gridded over batch rows, all weights VMEM-resident.
# ---------------------------------------------------------------------------
def _tail_kernel(x_ref, w4_ref, b4_ref, w5_ref, b5_ref, w6_ref, b6_ref,
                 wh_ref, bh_ref, o_ref, *, lat_pad):
    def dense_relu(h, w_ref, b_ref):
        a = jnp.dot(h, w_ref[...], preferred_element_type=jnp.float32)
        return jnp.maximum(a + b_ref[...], 0.0).astype(jnp.bfloat16)

    h = dense_relu(x_ref[...], w4_ref, b4_ref)           # layer 4: 8x8 -> 4x4
    h = dense_relu(h, w5_ref, b5_ref)                    # layer 5: 4x4 -> 2x2
    h = dense_relu(h, w6_ref, b6_ref)                    # layer 6: 2x2 -> 1x1
    out = jnp.dot(h, wh_ref[...], preferred_element_type=jnp.float32)
    out = out + bh_ref[...]
    # mean head: Linear(bias=False)+ReLU; log_var head: Linear(+bias), no act.
    # lat_pad == 128, so these are static lane-boundary slices (no masking).
    o_ref[:, :lat_pad] = jnp.maximum(out[:, :lat_pad], 0.0)
    o_ref[:, lat_pad:] = out[:, lat_pad:]


def fused_tail(x, tail_w, tail_b, head_w, head_b):
    n, k = x.shape
    tn, n_pad = _choose_m_tile(n, cap=256)
    if n_pad != n:
        x = jnp.pad(x, ((0, n_pad - n), (0, 0)))
    n_out = head_w.shape[1]

    def resident(arr):  # whole-array block, constant index -> fetched once
        return pl.BlockSpec(arr.shape, lambda i: (0, 0))

    w4, w5, w6 = tail_w
    b4, b5, b6 = tail_b
    out = pl.pallas_call(
        functools.partial(_tail_kernel, lat_pad=n_out // 2),
        out_shape=jax.ShapeDtypeStruct((n_pad, n_out), jnp.float32),
        grid=(n_pad // tn,),
        in_specs=[
            pl.BlockSpec((tn, k), lambda i: (i, 0)),
            resident(w4), resident(b4),
            resident(w5), resident(b5),
            resident(w6), resident(b6),
            resident(head_w), resident(head_b),
        ],
        out_specs=pl.BlockSpec((tn, n_out), lambda i: (i, 0)),
        compiler_params=pltpu.CompilerParams(
            dimension_semantics=("parallel",)),
    )(x, w4, b4, w5, b5, w6, b6, head_w, head_b)
    return out[:n] if n_pad != n else out


# ---------------------------------------------------------------------------
# NHWC im2col for Conv2d(k=4, s=2, p=1); K ordered (kh, kw, C) to match the
# prepared weights.  Light XLA glue (see TODO at top of file).
# ---------------------------------------------------------------------------
def _im2col_nhwc(x, kh=4, kw=4, stride=2, pad=1):
    n, h, w, c = x.shape
    xp = jnp.pad(x, ((0, 0), (pad, pad), (pad, pad), (0, 0)))
    ho = (h + 2 * pad - kh) // stride + 1
    wo = (w + 2 * pad - kw) // stride + 1
    taps = []
    for i in range(kh):
        for j in range(kw):
            taps.append(xp[:, i:i + stride * (ho - 1) + 1:stride,
                              j:j + stride * (wo - 1) + 1:stride, :])
    patches = jnp.stack(taps, axis=3)                    # (N, Ho, Wo, kh*kw, C)
    return patches.reshape(n * ho * wo, kh * kw * c), n, ho, wo


# ---------------------------------------------------------------------------
# Parameters: synthetic init (PyTorch layouts) + one-time preparation.
# ---------------------------------------------------------------------------
def init_params(key, input_channels=1, ebc=4, latent=10):
    """Synthetic parameters in PyTorch layout (Conv2d weight: (Cout,Cin,4,4)),
    He-style scales so activations stay O(1) for a meaningful reference check."""
    c_out = [ebc, 2 * ebc, 4 * ebc, 8 * ebc, 16 * ebc, 32 * ebc]
    c_in = [input_channels] + c_out[:-1]
    keys = jax.random.split(key, 2 * 6 + 3)
    p = {}
    for li, (ci, co) in enumerate(zip(c_in, c_out)):
        s = (2.0 / (ci * 16)) ** 0.5
        p[f"l{li + 1}_w"] = s * jax.random.normal(keys[2 * li], (co, ci, 4, 4),
                                                  jnp.float32)
        p[f"l{li + 1}_b"] = 0.1 * jax.random.normal(keys[2 * li + 1], (co,),
                                                    jnp.float32)
    sh = (1.0 / c_out[-1]) ** 0.5
    p["mean_w"] = sh * jax.random.normal(keys[-3], (latent, c_out[-1]), jnp.float32)
    p["logvar_w"] = sh * jax.random.normal(keys[-2], (latent, c_out[-1]), jnp.float32)
    p["logvar_b"] = 0.1 * jax.random.normal(keys[-1], (latent,), jnp.float32)
    return p


def _dense_conv_matrix(w, h_in, cin_pad, cout_pad):
    """Exact dense matrix of Conv2d(k=4, s=2, p=1) acting on an (h_in, h_in)
    NHWC input flattened (iy, ix, ci) -> output flattened (oy, ox, co).
    Padded input/output channels map to zero rows / columns."""
    w = np.asarray(w, np.float32)
    cout, cin, kh, kw = w.shape
    h_out = h_in // 2
    wt = np.transpose(w, (2, 3, 1, 0))                   # (kh, kw, Cin, Cout)
    d = np.zeros((h_in, h_in, cin_pad, h_out, h_out, cout_pad), np.float32)
    for oy in range(h_out):
        for ox in range(h_out):
            for ky in range(kh):
                iy = 2 * oy + ky - 1
                if iy < 0 or iy >= h_in:
                    continue
                for kx in range(kw):
                    ix = 2 * ox + kx - 1
                    if ix < 0 or ix >= h_in:
                        continue
                    d[iy, ix, :cin, oy, ox, :cout] = wt[ky, kx]
    return d.reshape(h_in * h_in * cin_pad, h_out * h_out * cout_pad)


def prepare_params(p, input_channels=1, ebc=4, latent=10, lat_pad=128):
    """One-time prep: im2col-form bf16 weights for layers 1-3 (narrow channel
    pads only), exact dense matrices for the tiny-spatial layers 4-6, and both
    latent heads concatenated into one (C6, 2*lat_pad) matmul."""
    c_out = [ebc, 2 * ebc, 4 * ebc, 8 * ebc, 16 * ebc, 32 * ebc]
    c_in = [input_channels] + c_out[:-1]
    # Narrow pads (review item 1): layer outputs only to the bf16 sublane
    # quantum (8), never 128; layer-1 input channels stay unpadded.
    store_pad = [_round_up(c, 8) for c in c_out[:3]]     # layer 1..3 outputs
    cin_pad = [c_in[0], store_pad[0], store_pad[1]]      # layer 1..3 inputs

    conv = []
    for li in range(3):
        w = p[f"l{li + 1}_w"]                            # (Cout, Cin, 4, 4)
        wt = jnp.transpose(w, (2, 3, 1, 0))              # (4, 4, Cin, Cout)
        wt = jnp.pad(wt, ((0, 0), (0, 0),
                          (0, cin_pad[li] - c_in[li]),
                          (0, store_pad[li] - c_out[li])))
        wt = wt.reshape(16 * cin_pad[li], store_pad[li]).astype(jnp.bfloat16)
        b = jnp.pad(p[f"l{li + 1}_b"], (0, store_pad[li] - c_out[li]))
        conv.append((wt, b.reshape(1, store_pad[li]).astype(jnp.float32)))

    # Layers 4..6: exact densified conv matmuls (spatial 8x8 / 4x4 / 2x2).
    h_ins = [8, 4, 2]
    cins = [store_pad[2], c_out[3], c_out[4]]
    tail_w, tail_b = [], []
    for t, li in enumerate((3, 4, 5)):
        dm = _dense_conv_matrix(p[f"l{li + 1}_w"], h_ins[t], cins[t], c_out[li])
        ho = h_ins[t] // 2
        bias = np.tile(np.asarray(p[f"l{li + 1}_b"], np.float32), ho * ho)
        tail_w.append(jnp.asarray(dm, jnp.bfloat16))
        tail_b.append(jnp.asarray(bias.reshape(1, -1), jnp.float32))

    # Latent heads fused into one (C6, 2*lat_pad) matmul: mean half gets the
    # in-kernel ReLU, log_var half gets the bias.  lat_pad=128 keeps the final
    # store lane-dense and the ReLU split on a vreg lane boundary.
    wm = jnp.pad(p["mean_w"].T, ((0, 0), (0, lat_pad - latent)))
    wl = jnp.pad(p["logvar_w"].T, ((0, 0), (0, lat_pad - latent)))
    head_w = jnp.concatenate([wm, wl], axis=1).astype(jnp.bfloat16)
    head_b = jnp.concatenate([jnp.zeros((lat_pad,), jnp.float32),
                              jnp.pad(p["logvar_b"], (0, lat_pad - latent))])
    return {"conv": tuple(conv),
            "tail_w": tuple(tail_w), "tail_b": tuple(tail_b),
            "head_w": head_w,
            "head_b": head_b.reshape(1, 2 * lat_pad).astype(jnp.float32)}


# ---------------------------------------------------------------------------
# Encoder forward: matches VariationalEncoder.forward -> (mean, log_var)
# ---------------------------------------------------------------------------
def encoder_forward(prep, x_nchw, *, latent):
    h = jnp.transpose(x_nchw, (0, 2, 3, 1)).astype(jnp.bfloat16)  # NCHW->NHWC once
    for wt, b in prep["conv"]:                   # layers 1..3 (64 -> 32 -> 16 -> 8)
        patches, n, ho, wo = _im2col_nhwc(h)
        y = conv_matmul(patches, wt, b)          # (N*Ho*Wo, Cout_pad8) bf16
        h = y.reshape(n, ho, wo, wt.shape[1])    # NHWC; padded channels stay 0
    assert h.shape[1] == 8 and h.shape[2] == 8, \
        "expected 64x64 input -> 8x8 after three stride-2 convs"
    hflat = h.reshape(h.shape[0], 8 * 8 * h.shape[3])
    out = fused_tail(hflat, prep["tail_w"], prep["tail_b"],
                     prep["head_w"], prep["head_b"])
    lat_pad = prep["head_w"].shape[1] // 2
    mean = out[:, :latent]                       # Linear(no bias) + ReLU head
    log_var = out[:, lat_pad:lat_pad + latent]   # Linear(+bias), no activation
    return mean, log_var


# ---------------------------------------------------------------------------
# Plain-JAX f32 reference (numerical sanity check)
# ---------------------------------------------------------------------------
def encoder_reference(p, x):
    h = x
    for li in range(6):
        w, b = p[f"l{li + 1}_w"], p[f"l{li + 1}_b"]
        h = jax.lax.conv_general_dilated(
            h, w, window_strides=(2, 2), padding=((1, 1), (1, 1)),
            dimension_numbers=("NCHW", "OIHW", "NCHW"))
        h = jax.nn.relu(h + b[None, :, None, None])
    h = h.reshape(h.shape[0], -1)
    mean = jax.nn.relu(h @ p["mean_w"].T)
    log_var = h @ p["logvar_w"].T + p["logvar_b"]
    return mean, log_var


# ---------------------------------------------------------------------------
if __name__ == "__main__":
    C_IN, EBC, LATENT, N = 1, 4, 10, 2          # small demo; spatial must be 64x64

    k_param, k_x = jax.random.split(jax.random.PRNGKey(0))
    raw_params = init_params(k_param, input_channels=C_IN, ebc=EBC, latent=LATENT)
    prep = prepare_params(raw_params, input_channels=C_IN, ebc=EBC, latent=LATENT)
    x = jax.random.normal(k_x, (N, C_IN, 64, 64), jnp.float32)   # NCHW, like PyTorch

    fwd = jax.jit(functools.partial(encoder_forward, latent=LATENT))
    mean, log_var = fwd(prep, x)
    jax.block_until_ready((mean, log_var))
    assert mean.shape == (N, LATENT) and log_var.shape == (N, LATENT)

    # numerical sanity check vs. plain-JAX f32 reference (bf16 MXU tolerance)
    mean_ref, logvar_ref = encoder_reference(raw_params, x)
    np.testing.assert_allclose(np.asarray(mean), np.asarray(mean_ref),
                               rtol=0.2, atol=0.05)
    np.testing.assert_allclose(np.asarray(log_var), np.asarray(logvar_ref),
                               rtol=0.2, atol=0.05)

    print("KERNEL_OK")
</pallas_src>

<mosaic_0001>
module attributes {stable_mosaic.version = 11 : i64} {
  func.func @_matmul_bias_relu_kernel(%arg0: i32, %arg1: memref<1024x16xbf16, #tpu.memory_space<vmem>>, %arg2: memref<16x8xbf16, #tpu.memory_space<vmem>>, %arg3: memref<1x8xf32, #tpu.memory_space<vmem>>, %arg4: memref<1024x8xbf16, #tpu.memory_space<vmem>>) attributes {dimension_semantics = [#tpu.dimension_semantics<parallel>], iteration_bounds = array<i64: 2>, scalar_prefetch = 0 : i64, scratch_operands = 0 : i64, tpu.core_type = #tpu.core_type<tc>, window_params = [{transform_indices = @transform_0, window_bounds = array<i64: 1024, 16>}, {pipeline_mode = #tpu.pipeline_mode<synchronous>, transform_indices = @transform_1, window_bounds = array<i64: 16, 8>}, {pipeline_mode = #tpu.pipeline_mode<synchronous>, transform_indices = @transform_2, window_bounds = array<i64: 1, 8>}, {transform_indices = @transform_3, window_bounds = array<i64: 1024, 8>}]} {
    %c0 = arith.constant 0 : index
    %c0_0 = arith.constant 0 : index
    %0 = vector.load %arg1[%c0, %c0_0] : memref<1024x16xbf16, #tpu.memory_space<vmem>>, vector<1024x16xbf16>
    %c0_1 = arith.constant 0 : index
    %c0_2 = arith.constant 0 : index
    %1 = vector.load %arg2[%c0_1, %c0_2] : memref<16x8xbf16, #tpu.memory_space<vmem>>, vector<16x8xbf16>
    %cst = arith.constant dense<0.000000e+00> : vector<1024x8xf32>
    %2 = tpu.matmul %0, %1, %cst {dimension_numbers = #tpu.dot_dimension_numbers<[1], [0], [0], [1], [0, 0, 1, 1], [], []>} : vector<1024x16xbf16>, vector<16x8xbf16>, vector<1024x8xf32> -> vector<1024x8xf32>
    %c0_3 = arith.constant 0 : index
    %c0_4 = arith.constant 0 : index
    %3 = vector.load %arg3[%c0_3, %c0_4] : memref<1x8xf32, #tpu.memory_space<vmem>>, vector<1x8xf32>
    %4 = vector.broadcast %3 : vector<1x8xf32> to vector<1024x8xf32>
    %5 = arith.addf %2, %4 : vector<1024x8xf32>
    %cst_5 = arith.constant 0.000000e+00 : f32
    %6 = vector.broadcast %cst_5 : f32 to vector<1024x8xf32>
    %7 = arith.maximumf %5, %6 : vector<1024x8xf32>
    %8 = arith.truncf %7 : vector<1024x8xf32> to vector<1024x8xbf16>
    %c0_6 = arith.constant 0 : index
    %c0_7 = arith.constant 0 : index
    %9 = vector.load %arg4[%c0_6, %c0_7] : memref<1024x8xbf16, #tpu.memory_space<vmem>>, vector<1024x8xbf16>
    tpu.vector_store %arg4[%c0_6, %c0_7], %8 {strides = array<i32>} : memref<1024x8xbf16, #tpu.memory_space<vmem>>, vector<1024x8xbf16>,
    return
  }
  func.func @transform_0(%arg0: i32) -> (i32, i32) {
    %c0_i32 = arith.constant 0 : i32
    %c0_i32_0 = arith.constant 0 : i32
    return %arg0, %c0_i32 : i32, i32
  }
  func.func @transform_1(%arg0: i32) -> (i32, i32) {
    %c0_i32 = arith.constant 0 : i32
    %c0_i32_0 = arith.constant 0 : i32
    %c0_i32_1 = arith.constant 0 : i32
    return %c0_i32, %c0_i32_0 : i32, i32
  }
  func.func @transform_2(%arg0: i32) -> (i32, i32) {
    %c0_i32 = arith.constant 0 : i32
    %c0_i32_0 = arith.constant 0 : i32
    %c0_i32_1 = arith.constant 0 : i32
    return %c0_i32, %c0_i32_0 : i32, i32
  }
  func.func @transform_3(%arg0: i32) -> (i32, i32) {
    %c0_i32 = arith.constant 0 : i32
    %c0_i32_0 = arith.constant 0 : i32
    return %arg0, %c0_i32 : i32, i32
  }
}

module attributes {stable_mosaic.version = 11 : i64} {
  func.func @_matmul_bias_relu_kernel(%arg0: i32, %arg1: memref<256x128xbf16, #tpu.memory_space<vmem>>, %arg2: memref<128x8xbf16, #tpu.memory_space<vmem>>, %arg3: memref<1x8xf32, #tpu.memory_space<vmem>>, %arg4: memref<256x8xbf16, #tpu.memory_space<vmem>>) attributes {dimension_semantics = [#tpu.dimension_semantics<parallel>], iteration_bounds = array<i64: 2>, scalar_prefetch = 0 : i64, scratch_operands = 0 : i64, tpu.core_type = #tpu.core_type<tc>, window_params = [{transform_indices = @transform_0, window_bounds = array<i64: 256, 128>}, {pipeline_mode = #tpu.pipeline_mode<synchronous>, transform_indices = @transform_1, window_bounds = array<i64: 128, 8>}, {pipeline_mode = #tpu.pipeline_mode<synchronous>, transform_indices = @transform_2, window_bounds = array<i64: 1, 8>}, {transform_indices = @transform_3, window_bounds = array<i64: 256, 8>}]} {
    %c0 = arith.constant 0 : index
    %c0_0 = arith.constant 0 : index
    %0 = vector.load %arg1[%c0, %c0_0] : memref<256x128xbf16, #tpu.memory_space<vmem>>, vector<256x128xbf16>
    %c0_1 = arith.constant 0 : index
    %c0_2 = arith.constant 0 : index
    %1 = vector.load %arg2[%c0_1, %c0_2] : memref<128x8xbf16, #tpu.memory_space<vmem>>, vector<128x8xbf16>
    %cst = arith.constant dense<0.000000e+00> : vector<256x8xf32>
    %2 = tpu.matmul %0, %1, %cst {dimension_numbers = #tpu.dot_dimension_numbers<[1], [0], [0], [1], [0, 0, 1, 1], [], []>} : vector<256x128xbf16>, vector<128x8xbf16>, vector<256x8xf32> -> vector<256x8xf32>
    %c0_3 = arith.constant 0 : index
    %c0_4 = arith.constant 0 : index
    %3 = vector.load %arg3[%c0_3, %c0_4] : memref<1x8xf32, #tpu.memory_space<vmem>>, vector<1x8xf32>
    %4 = vector.broadcast %3 : vector<1x8xf32> to vector<256x8xf32>
    %5 = arith.addf %2, %4 : vector<256x8xf32>
    %cst_5 = arith.constant 0.000000e+00 : f32
    %6 = vector.broadcast %cst_5 : f32 to vector<256x8xf32>
    %7 = arith.maximumf %5, %6 : vector<256x8xf32>
    %8 = arith.truncf %7 : vector<256x8xf32> to vector<256x8xbf16>
    %c0_6 = arith.constant 0 : index
    %c0_7 = arith.constant 0 : index
    %9 = vector.load %arg4[%c0_6, %c0_7] : memref<256x8xbf16, #tpu.memory_space<vmem>>, vector<256x8xbf16>
    tpu.vector_store %arg4[%c0_6, %c0_7], %8 {strides = array<i32>} : memref<256x8xbf16, #tpu.memory_space<vmem>>, vector<256x8xbf16>,
    return
  }
  func.func @transform_0(%arg0: i32) -> (i32, i32) {
    %c0_i32 = arith.constant 0 : i32
    %c0_i32_0 = arith.constant 0 : i32
    return %arg0, %c0_i32 : i32, i32
  }
  func.func @transform_1(%arg0: i32) -> (i32, i32) {
    %c0_i32 = arith.constant 0 : i32
    %c0_i32_0 = arith.constant 0 : i32
    %c0_i32_1 = arith.constant 0 : i32
    return %c0_i32, %c0_i32_0 : i32, i32
  }
  func.func @transform_2(%arg0: i32) -> (i32, i32) {
    %c0_i32 = arith.constant 0 : i32
    %c0_i32_0 = arith.constant 0 : i32
    %c0_i32_1 = arith.constant 0 : i32
    return %c0_i32, %c0_i32_0 : i32, i32
  }
  func.func @transform_3(%arg0: i32) -> (i32, i32) {
    %c0_i32 = arith.constant 0 : i32
    %c0_i32_0 = arith.constant 0 : i32
    return %arg0, %c0_i32 : i32, i32
  }
}

module attributes {stable_mosaic.version = 11 : i64} {
  func.func @_matmul_bias_relu_kernel(%arg0: i32, %arg1: memref<64x128xbf16, #tpu.memory_space<vmem>>, %arg2: memref<128x16xbf16, #tpu.memory_space<vmem>>, %arg3: memref<1x16xf32, #tpu.memory_space<vmem>>, %arg4: memref<64x16xbf16, #tpu.memory_space<vmem>>) attributes {dimension_semantics = [#tpu.dimension_semantics<parallel>], iteration_bounds = array<i64: 2>, scalar_prefetch = 0 : i64, scratch_operands = 0 : i64, tpu.core_type = #tpu.core_type<tc>, window_params = [{transform_indices = @transform_0, window_bounds = array<i64: 64, 128>}, {pipeline_mode = #tpu.pipeline_mode<synchronous>, transform_indices = @transform_1, window_bounds = array<i64: 128, 16>}, {pipeline_mode = #tpu.pipeline_mode<synchronous>, transform_indices = @transform_2, window_bounds = array<i64: 1, 16>}, {transform_indices = @transform_3, window_bounds = array<i64: 64, 16>}]} {
    %c0 = arith.constant 0 : index
    %c0_0 = arith.constant 0 : index
    %0 = vector.load %arg1[%c0, %c0_0] : memref<64x128xbf16, #tpu.memory_space<vmem>>, vector<64x128xbf16>
    %c0_1 = arith.constant 0 : index
    %c0_2 = arith.constant 0 : index
    %1 = vector.load %arg2[%c0_1, %c0_2] : memref<128x16xbf16, #tpu.memory_space<vmem>>, vector<128x16xbf16>
    %cst = arith.constant dense<0.000000e+00> : vector<64x16xf32>
    %2 = tpu.matmul %0, %1, %cst {dimension_numbers = #tpu.dot_dimension_numbers<[1], [0], [0], [1], [0, 0, 1, 1], [], []>} : vector<64x128xbf16>, vector<128x16xbf16>, vector<64x16xf32> -> vector<64x16xf32>
    %c0_3 = arith.constant 0 : index
    %c0_4 = arith.constant 0 : index
    %3 = vector.load %arg3[%c0_3, %c0_4] : memref<1x16xf32, #tpu.memory_space<vmem>>, vector<1x16xf32>
    %4 = vector.broadcast %3 : vector<1x16xf32> to vector<64x16xf32>
    %5 = arith.addf %2, %4 : vector<64x16xf32>
    %cst_5 = arith.constant 0.000000e+00 : f32
    %6 = vector.broadcast %cst_5 : f32 to vector<64x16xf32>
    %7 = arith.maximumf %5, %6 : vector<64x16xf32>
    %8 = arith.truncf %7 : vector<64x16xf32> to vector<64x16xbf16>
    %c0_6 = arith.constant 0 : index
    %c0_7 = arith.constant 0 : index
    %9 = vector.load %arg4[%c0_6, %c0_7] : memref<64x16xbf16, #tpu.memory_space<vmem>>, vector<64x16xbf16>
    tpu.vector_store %arg4[%c0_6, %c0_7], %8 {strides = array<i32>} : memref<64x16xbf16, #tpu.memory_space<vmem>>, vector<64x16xbf16>,
    return
  }
  func.func @transform_0(%arg0: i32) -> (i32, i32) {
    %c0_i32 = arith.constant 0 : i32
    %c0_i32_0 = arith.constant 0 : i32
    return %arg0, %c0_i32 : i32, i32
  }
  func.func @transform_1(%arg0: i32) -> (i32, i32) {
    %c0_i32 = arith.constant 0 : i32
    %c0_i32_0 = arith.constant 0 : i32
    %c0_i32_1 = arith.constant 0 : i32
    return %c0_i32, %c0_i32_0 : i32, i32
  }
  func.func @transform_2(%arg0: i32) -> (i32, i32) {
    %c0_i32 = arith.constant 0 : i32
    %c0_i32_0 = arith.constant 0 : i32
    %c0_i32_1 = arith.constant 0 : i32
    return %c0_i32, %c0_i32_0 : i32, i32
  }
  func.func @transform_3(%arg0: i32) -> (i32, i32) {
    %c0_i32 = arith.constant 0 : i32
    %c0_i32_0 = arith.constant 0 : i32
    return %arg0, %c0_i32 : i32, i32
  }
}

module attributes {stable_mosaic.version = 11 : i64} {
  func.func @_tail_kernel(%arg0: i32, %arg1: memref<8x1024xbf16, #tpu.memory_space<vmem>>, %arg2: memref<1024x512xbf16, #tpu.memory_space<vmem>>, %arg3: memref<1x512xf32, #tpu.memory_space<vmem>>, %arg4: memref<512x256xbf16, #tpu.memory_space<vmem>>, %arg5: memref<1x256xf32, #tpu.memory_space<vmem>>, %arg6: memref<256x128xbf16, #tpu.memory_space<vmem>>, %arg7: memref<1x128xf32, #tpu.memory_space<vmem>>, %arg8: memref<128x256xbf16, #tpu.memory_space<vmem>>, %arg9: memref<1x256xf32, #tpu.memory_space<vmem>>, %arg10: memref<8x256xf32, #tpu.memory_space<vmem>>) attributes {dimension_semantics = [#tpu.dimension_semantics<parallel>], iteration_bounds = array<i64: 2>, scalar_prefetch = 0 : i64, scratch_operands = 0 : i64, tpu.core_type = #tpu.core_type<tc>, window_params = [{transform_indices = @transform_0, window_bounds = array<i64: 8, 1024>}, {pipeline_mode = #tpu.pipeline_mode<synchronous>, transform_indices = @transform_1, window_bounds = array<i64: 1024, 512>}, {pipeline_mode = #tpu.pipeline_mode<synchronous>, transform_indices = @transform_2, window_bounds = array<i64: 1, 512>}, {pipeline_mode = #tpu.pipeline_mode<synchronous>, transform_indices = @transform_3, window_bounds = array<i64: 512, 256>}, {pipeline_mode = #tpu.pipeline_mode<synchronous>, transform_indices = @transform_4, window_bounds = array<i64: 1, 256>}, {pipeline_mode = #tpu.pipeline_mode<synchronous>, transform_indices = @transform_5, window_bounds = array<i64: 256, 128>}, {pipeline_mode = #tpu.pipeline_mode<synchronous>, transform_indices = @transform_6, window_bounds = array<i64: 1, 128>}, {pipeline_mode = #tpu.pipeline_mode<synchronous>, transform_indices = @transform_7, window_bounds = array<i64: 128, 256>}, {pipeline_mode = #tpu.pipeline_mode<synchronous>, transform_indices = @transform_8, window_bounds = array<i64: 1, 256>}, {transform_indices = @transform_9, window_bounds = array<i64: 8, 256>}]} {
    %c0 = arith.constant 0 : index
    %c0_0 = arith.constant 0 : index
    %0 = vector.load %arg1[%c0, %c0_0] : memref<8x1024xbf16, #tpu.memory_space<vmem>>, vector<8x1024xbf16>
    %c0_1 = arith.constant 0 : index
    %c0_2 = arith.constant 0 : index
    %1 = vector.load %arg2[%c0_1, %c0_2] : memref<1024x512xbf16, #tpu.memory_space<vmem>>, vector<1024x512xbf16>
    %cst = arith.constant dense<0.000000e+00> : vector<8x512xf32>
    %2 = tpu.matmul %0, %1, %cst {dimension_numbers = #tpu.dot_dimension_numbers<[1], [0], [0], [1], [0, 0, 1, 1], [], []>} : vector<8x1024xbf16>, vector<1024x512xbf16>, vector<8x512xf32> -> vector<8x512xf32>
    %c0_3 = arith.constant 0 : index
    %c0_4 = arith.constant 0 : index
    %3 = vector.load %arg3[%c0_3, %c0_4] : memref<1x512xf32, #tpu.memory_space<vmem>>, vector<1x512xf32>
    %4 = vector.broadcast %3 : vector<1x512xf32> to vector<8x512xf32>
    %5 = arith.addf %2, %4 : vector<8x512xf32>
    %cst_5 = arith.constant 0.000000e+00 : f32
    %6 = vector.broadcast %cst_5 : f32 to vector<8x512xf32>
    %7 = arith.maximumf %5, %6 : vector<8x512xf32>
    %8 = arith.truncf %7 : vector<8x512xf32> to vector<8x512xbf16>
    %c0_6 = arith.constant 0 : index
    %c0_7 = arith.constant 0 : index
    %9 = vector.load %arg4[%c0_6, %c0_7] : memref<512x256xbf16, #tpu.memory_space<vmem>>, vector<512x256xbf16>
    %cst_8 = arith.constant dense<0.000000e+00> : vector<8x256xf32>
    %10 = tpu.matmul %8, %9, %cst_8 {dimension_numbers = #tpu.dot_dimension_numbers<[1], [0], [0], [1], [0, 0, 1, 1], [], []>} : vector<8x512xbf16>, vector<512x256xbf16>, vector<8x256xf32> -> vector<8x256xf32>
    %c0_9 = arith.constant 0 : index
    %c0_10 = arith.constant 0 : index
    %11 = vector.load %arg5[%c0_9, %c0_10] : memref<1x256xf32, #tpu.memory_space<vmem>>, vector<1x256xf32>
    %12 = vector.broadcast %11 : vector<1x256xf32> to vector<8x256xf32>
    %13 = arith.addf %10, %12 : vector<8x256xf32>
    %cst_11 = arith.constant 0.000000e+00 : f32
    %14 = vector.broadcast %cst_11 : f32 to vector<8x256xf32>
    %15 = arith.maximumf %13, %14 : vector<8x256xf32>
    %16 = arith.truncf %15 : vector<8x256xf32> to vector<8x256xbf16>
    %c0_12 = arith.constant 0 : index
    %c0_13 = arith.constant 0 : index
    %17 = vector.load %arg6[%c0_12, %c0_13] : memref<256x128xbf16, #tpu.memory_space<vmem>>, vector<256x128xbf16>
    %cst_14 = arith.constant dense<0.000000e+00> : vector<8x128xf32>
    %18 = tpu.matmul %16, %17, %cst_14 {dimension_numbers = #tpu.dot_dimension_numbers<[1], [0], [0], [1], [0, 0, 1, 1], [], []>} : vector<8x256xbf16>, vector<256x128xbf16>, vector<8x128xf32> -> vector<8x128xf32>
    %c0_15 = arith.constant 0 : index
    %c0_16 = arith.constant 0 : index
    %19 = vector.load %arg7[%c0_15, %c0_16] : memref<1x128xf32, #tpu.memory_space<vmem>>, vector<1x128xf32>
    %20 = vector.broadcast %19 : vector<1x128xf32> to vector<8x128xf32>
    %21 = arith.addf %18, %20 : vector<8x128xf32>
    %cst_17 = arith.constant 0.000000e+00 : f32
    %22 = vector.broadcast %cst_17 : f32 to vector<8x128xf32>
    %23 = arith.maximumf %21, %22 : vector<8x128xf32>
    %24 = arith.truncf %23 : vector<8x128xf32> to vector<8x128xbf16>
    %c0_18 = arith.constant 0 : index
    %c0_19 = arith.constant 0 : index
    %25 = vector.load %arg8[%c0_18, %c0_19] : memref<128x256xbf16, #tpu.memory_space<vmem>>, vector<128x256xbf16>
    %cst_20 = arith.constant dense<0.000000e+00> : vector<8x256xf32>
    %26 = tpu.matmul %24, %25, %cst_20 {dimension_numbers = #tpu.dot_dimension_numbers<[1], [0], [0], [1], [0, 0, 1, 1], [], []>} : vector<8x128xbf16>, vector<128x256xbf16>, vector<8x256xf32> -> vector<8x256xf32>
    %c0_21 = arith.constant 0 : index
    %c0_22 = arith.constant 0 : index
    %27 = vector.load %arg9[%c0_21, %c0_22] : memref<1x256xf32, #tpu.memory_space<vmem>>, vector<1x256xf32>
    %28 = vector.broadcast %27 : vector<1x256xf32> to vector<8x256xf32>
    %29 = arith.addf %26, %28 : vector<8x256xf32>
    %30 = vector.extract_strided_slice %29 {offsets = [0, 0], sizes = [8, 128], strides = [1, 1]} : vector<8x256xf32> to vector<8x128xf32>
    %cst_23 = arith.constant 0.000000e+00 : f32
    %31 = vector.broadcast %cst_23 : f32 to vector<8x128xf32>
    %32 = arith.maximumf %30, %31 : vector<8x128xf32>
    %c0_24 = arith.constant 0 : index
    %c0_25 = arith.constant 0 : index
    %33 = vector.load %arg10[%c0_24, %c0_25] : memref<8x256xf32, #tpu.memory_space<vmem>>, vector<8x128xf32>
    tpu.vector_store %arg10[%c0_24, %c0_25], %32 {strides = array<i32>} : memref<8x256xf32, #tpu.memory_space<vmem>>, vector<8x128xf32>,
    %34 = vector.extract_strided_slice %29 {offsets = [0, 128], sizes = [8, 128], strides = [1, 1]} : vector<8x256xf32> to vector<8x128xf32>
    %c0_26 = arith.constant 0 : index
    %c128 = arith.constant 128 : index
    %35 = vector.load %arg10[%c0_26, %c128] : memref<8x256xf32, #tpu.memory_space<vmem>>, vector<8x128xf32>
    tpu.vector_store %arg10[%c0_26, %c128], %34 {strides = array<i32>} : memref<8x256xf32, #tpu.memory_space<vmem>>, vector<8x128xf32>,
    return
  }
  func.func @transform_0(%arg0: i32) -> (i32, i32) {
    %c0_i32 = arith.constant 0 : i32
    %c0_i32_0 = arith.constant 0 : i32
    return %arg0, %c0_i32 : i32, i32
  }
  func.func @transform_1(%arg0: i32) -> (i32, i32) {
    %c0_i32 = arith.constant 0 : i32
    %c0_i32_0 = arith.constant 0 : i32
    %c0_i32_1 = arith.constant 0 : i32
    return %c0_i32, %c0_i32_0 : i32, i32
  }
  func.func @transform_2(%arg0: i32) -> (i32, i32) {
    %c0_i32 = arith.constant 0 : i32
    %c0_i32_0 = arith.constant 0 : i32
    %c0_i32_1 = arith.constant 0 : i32
    return %c0_i32, %c0_i32_0 : i32, i32
  }
  func.func @transform_3(%arg0: i32) -> (i32, i32) {
    %c0_i32 = arith.constant 0 : i32
    %c0_i32_0 = arith.constant 0 : i32
    %c0_i32_1 = arith.constant 0 : i32
    return %c0_i32, %c0_i32_0 : i32, i32
  }
  func.func @transform_4(%arg0: i32) -> (i32, i32) {
    %c0_i32 = arith.constant 0 : i32
    %c0_i32_0 = arith.constant 0 : i32
    %c0_i32_1 = arith.constant 0 : i32
    return %c0_i32, %c0_i32_0 : i32, i32
  }
  func.func @transform_5(%arg0: i32) -> (i32, i32) {
    %c0_i32 = arith.constant 0 : i32
    %c0_i32_0 = arith.constant 0 : i32
    %c0_i32_1 = arith.constant 0 : i32
    return %c0_i32, %c0_i32_0 : i32, i32
  }
  func.func @transform_6(%arg0: i32) -> (i32, i32) {
    %c0_i32 = arith.constant 0 : i32
    %c0_i32_0 = arith.constant 0 : i32
    %c0_i32_1 = arith.constant 0 : i32
    return %c0_i32, %c0_i32_0 : i32, i32
  }
  func.func @transform_7(%arg0: i32) -> (i32, i32) {
    %c0_i32 = arith.constant 0 : i32
    %c0_i32_0 = arith.constant 0 : i32
    %c0_i32_1 = arith.constant 0 : i32
    return %c0_i32, %c0_i32_0 : i32, i32
  }
  func.func @transform_8(%arg0: i32) -> (i32, i32) {
    %c0_i32 = arith.constant 0 : i32
    %c0_i32_0 = arith.constant 0 : i32
    %c0_i32_1 = arith.constant 0 : i32
    return %c0_i32, %c0_i32_0 : i32, i32
  }
  func.func @transform_9(%arg0: i32) -> (i32, i32) {
    %c0_i32 = arith.constant 0 : i32
    %c0_i32_0 = arith.constant 0 : i32
    return %arg0, %c0_i32 : i32, i32
  }
}

</mosaic_0001>

<bundles_post_ra>
// kernel: encoder_forward.4
= control target key start
LH: loop header
LB: loop body
LE: loop exit
PB: predicated region body
PF: predicated region fallthrough
CT: control target
= control target key end

     0   :  { %s2897_s12 = smov 0   ;;  %s3450_s0 = inlined_call_operand.vmem [shape: bf16[2048,16], index: 0, kind: input, shape index: {}]   ;;  %s3451_s1 = inlined_call_operand.vmem [shape: bf16[16,8], index: 1, kind: input, shape index: {}]   ;;  %s3452_s2 = inlined_call_operand.vmem [shape: f32[1,8], index: 2, kind: input, shape index: {}]   ;;  %s3453_s3 = inlined_call_operand.vmem [shape: bf16[2048,8], index: 3, kind: output, shape index: {}]  }
   0x1 LB: > { %s2201_s13 = sadd.s32 4294967295, %s2875_s12   ;;  %p2205_p0 = scmp.ge.s32.totalorder %s2875_s12, 1  ;;  %s2875_s12 = sphi %s2897_s12, %s13_s12  }
   0x2   : > { %p138_p1 = scmp.lt.s32.totalorder %s2875_s12, 3 }
   0x4   : > { %p139_p2 = pnand %p2205_p0, %p138_p1 }
   0x5   : > { %s2206_s16 = sshll.u32 (!%p139_p2), %s2201_s13, 7 }
   0x6   : > { %142 = sbr.rel (%p139_p2) target bundleno = 343 (0x157), region = 32  ;;  %p163_p3 = scmp.lt.s32.totalorder (!%p139_p2), %s2206_s16, 255 }
   0xb   : > { %v2803_v0 = vld [vmem:[%s3451_s1] sm:$0xff]   ;;  %s3455_s16 = smov (!%p163_p3, %s2206_s16), 255  ;;  %vm638_vm0 = vcmask 130048   ;;  %vm2016_vm1 = vcmask 60416  }
   0xc   : > { %2663 = vmatprep.subr.bf16.mxu0 %v2803_v0  ;;  %2793 = vmatprep.subr.bf16.mxu1 %v2803_v0  ;;  %s2207_s17 = sshll.u32 %s3455_s16, 2 }
   0xd   : > { %2664 = vmatpush3.bf16.msra.mxu0 %v2803_v0  ;;  %2794 = vmatpush3.bf16.msra.mxu1 %v2803_v0  ;;  %s2916_s20 = scalar_lea.vmem %s3450_s0, %s2207_s17  ;;  %s3059_s25 = scalar_lea.vmem %s3453_s3, %s2207_s17 }
   0xe   : > { %v2804_v1 = vld [vmem:[%s2916_s20] sm:$0xff]   ;;  %v2806_v3 = vld [vmem:[%s2916_s20 + $0x8] sm:$0xff]   ;;  %v2808_v5 = vld [vmem:[%s2916_s20 + $0x10] sm:$0xff]  }
   0xf   : > { %v2805_v2 = vld [vmem:[%s2916_s20 + $0x100] sm:$0xff]   ;;  %2665 = vmatprep.mubr.msk.bf16.mxu0 %vm638_vm0, %v2804_v1  ;;  %v2807_v4 = vld [vmem:[%s2916_s20 + $0x108] sm:$0xff]   ;;  %v2809_v6 = vld [vmem:[%s2916_s20 + $0x110] sm:$0xff]  }
  0x10   : > { %2729 = vmatprep.mubr.msk.bf16.mxu1 %vm638_vm0, %v2805_v2  ;;  %2666 = vmatmul.mubr.msk.bf16.vlgmr.msra.gmra.mxu0 %vm638_vm0, %v2806_v3  ;;  %v2810_v7 = vld [vmem:[%s2916_s20 + $0x18] sm:$0xff]   ;;  %v2812_v9 = vld [vmem:[%s2916_s20 + $0x20] sm:$0xff]   ;;  %v2814_v11 = vld [vmem:[%s2916_s20 + $0x28] sm:$0xff]  }
  0x11   : > { %2730 = vmatmul.mubr.msk.bf16.vlgmr.msra.gmra.mxu1 %vm638_vm0, %v2807_v4  ;;  %2669 = vmatprep.mubr.msk.bf16.mxu0 %vm638_vm0, %v2808_v5  ;;  %v2811_v8 = vld [vmem:[%s2916_s20 + $0x118] sm:$0xff]   ;;  %v2813_v10 = vld [vmem:[%s2916_s20 + $0x120] sm:$0xff]   ;;  %v2815_v12 = vld [vmem:[%s2916_s20 + $0x128] sm:$0xff]  }
  0x12   : > { %2733 = vmatprep.mubr.msk.bf16.mxu1 %vm638_vm0, %v2809_v6  ;;  %v2816_v13 = vld [vmem:[%s2916_s20 + $0x30] sm:$0xff]   ;;  %v2818_v15 = vld [vmem:[%s2916_s20 + $0x38] sm:$0xff]   ;;  %v2820_v17 = vld [vmem:[%s2916_s20 + $0x40] sm:$0xff]  }
  0x13   : > { %v2817_v14 = vld [vmem:[%s2916_s20 + $0x130] sm:$0xff]   ;;  %v2819_v16 = vld [vmem:[%s2916_s20 + $0x138] sm:$0xff]   ;;  %v2821_v18 = vld [vmem:[%s2916_s20 + $0x140] sm:$0xff]  }
  0x14   : > { %v2822_v19 = vld [vmem:[%s2916_s20 + $0x48] sm:$0xff]   ;;  %v2824_v21 = vld [vmem:[%s2916_s20 + $0x50] sm:$0xff]   ;;  %v2826_v23 = vld [vmem:[%s2916_s20 + $0x58] sm:$0xff]  }
  0x15   : > { %v2823_v20 = vld [vmem:[%s2916_s20 + $0x148] sm:$0xff]   ;;  %v2825_v22 = vld [vmem:[%s2916_s20 + $0x150] sm:$0xff]   ;;  %v2827_v24 = vld [vmem:[%s2916_s20 + $0x158] sm:$0xff]  }
  0x16   : > { %v2828_v25 = vld [vmem:[%s2916_s20 + $0x60] sm:$0xff]   ;;  %v2830_v27 = vld [vmem:[%s2916_s20 + $0x68] sm:$0xff]   ;;  %v2832_v29 = vld [vmem:[%s2916_s20 + $0x70] sm:$0xff]  }
  0x17   : > { %v2829_v26 = vld [vmem:[%s2916_s20 + $0x160] sm:$0xff]   ;;  %v2831_v28 = vld [vmem:[%s2916_s20 + $0x168] sm:$0xff]   ;;  %v2833_v30 = vld [vmem:[%s2916_s20 + $0x170] sm:$0xff]  }
  0x18   : > { %2670 = vmatmul.mubr.msk.bf16.gmra.mxu0 %vm638_vm0, %v2810_v7  ;;  %v2834_v31 = vld [vmem:[%s2916_s20 + $0x78] sm:$0xff]   ;;  %v2836_v33 = vld [vmem:[%s2916_s20 + $0x80] sm:$0xff]   ;;  %v2838_v35 = vld [vmem:[%s2916_s20 + $0x88] sm:$0xff]  }
  0x19   : > { %2734 = vmatmul.mubr.msk.bf16.gmra.mxu1 %vm638_vm0, %v2811_v8  ;;  %2673 = vmatprep.mubr.msk.bf16.mxu0 %vm638_vm0, %v2812_v9  ;;  %v2835_v32 = vld [vmem:[%s2916_s20 + $0x178] sm:$0xff]   ;;  %v2837_v34 = vld [vmem:[%s2916_s20 + $0x180] sm:$0xff]   ;;  %v2839_v36 = vld [vmem:[%s2916_s20 + $0x188] sm:$0xff]  }
  0x1a   : > { %2737 = vmatprep.mubr.msk.bf16.mxu1 %vm638_vm0, %v2813_v10  ;;  %v2840_v37 = vld [vmem:[%s2916_s20 + $0x90] sm:$0xff]   ;;  %v2842_v39 = vld [vmem:[%s2916_s20 + $0x98] sm:$0xff]   ;;  %v2844_v41 = vld [vmem:[%s2916_s20 + $0xa0] sm:$0xff]  }
  0x1b   : > { %v2841_v38 = vld [vmem:[%s2916_s20 + $0x190] sm:$0xff]   ;;  %v2843_v40 = vld [vmem:[%s2916_s20 + $0x198] sm:$0xff]   ;;  %v2845_v42 = vld [vmem:[%s2916_s20 + $0x1a0] sm:$0xff]  }
  0x1c   : > { %v2846_v43 = vld [vmem:[%s2916_s20 + $0xa8] sm:$0xff]   ;;  %v2848_v45 = vld [vmem:[%s2916_s20 + $0xb0] sm:$0xff]   ;;  %v2850_v47 = vld [vmem:[%s2916_s20 + $0xb8] sm:$0xff]  }
  0x1d   : > { %v2847_v44 = vld [vmem:[%s2916_s20 + $0x1a8] sm:$0xff]   ;;  %v2849_v46 = vld [vmem:[%s2916_s20 + $0x1b0] sm:$0xff]   ;;  %v2851_v48 = vld [vmem:[%s2916_s20 + $0x1b8] sm:$0xff]  }
  0x1e   : > { %v2852_v49 = vld [vmem:[%s2916_s20 + $0xc0] sm:$0xff]   ;;  %v2854_v51 = vld [vmem:[%s2916_s20 + $0xc8] sm:$0xff]   ;;  %v2856_v53 = vld [vmem:[%s2916_s20 + $0xd0] sm:$0xff]  }
  0x1f   : > { %v2853_v50 = vld [vmem:[%s2916_s20 + $0x1c0] sm:$0xff]   ;;  %v2855_v52 = vld [vmem:[%s2916_s20 + $0x1c8] sm:$0xff]   ;;  %v2857_v54 = vld [vmem:[%s2916_s20 + $0x1d0] sm:$0xff]  }
  0x20   : > { %2674 = vmatmul.mubr.msk.bf16.gmra.mxu0 %vm638_vm0, %v2814_v11  ;;  %v2858_v55 = vld [vmem:[%s2916_s20 + $0xd8] sm:$0xff]   ;;  %v2860_v57 = vld [vmem:[%s2916_s20 + $0xe0] sm:$0xff]   ;;  %v2862_v59 = vld [vmem:[%s2916_s20 + $0xe8] sm:$0xff]  }
  0x21   : > { %2738 = vmatmul.mubr.msk.bf16.gmra.mxu1 %vm638_vm0, %v2815_v12  ;;  %2677 = vmatprep.mubr.msk.bf16.mxu0 %vm638_vm0, %v2816_v13  ;;  %v2859_v56 = vld [vmem:[%s2916_s20 + $0x1d8] sm:$0xff]   ;;  %v2861_v58 = vld [vmem:[%s2916_s20 + $0x1e0] sm:$0xff]   ;;  %v2863_v60 = vld [vmem:[%s2916_s20 + $0x1e8] sm:$0xff]  }
  0x22   : > { %2741 = vmatprep.mubr.msk.bf16.mxu1 %vm638_vm0, %v2817_v14  ;;  %v2864_v61 = vld [vmem:[%s2916_s20 + $0xf0] sm:$0xff]   ;;  %v2866_v63 = vld [vmem:[%s2916_s20 + $0xf8] sm:$0xff]   ;;  %v3049_v1 = vld [vmem:[%s3452_s2] ss:$0 sm:$0xff] }
  0x23   : > { %v2865_v62 = vld [vmem:[%s2916_s20 + $0x1f0] sm:$0xff]   ;;  %v2867_v0 = vld [vmem:[%s2916_s20 + $0x1f8] sm:$0xff]  }
  0x28   : > { %2678 = vmatmul.mubr.msk.bf16.gmra.mxu0 %vm638_vm0, %v2818_v15 }
  0x29   : > { %2742 = vmatmul.mubr.msk.bf16.gmra.mxu1 %vm638_vm0, %v2819_v16  ;;  %2681 = vmatprep.mubr.msk.bf16.mxu0 %vm638_vm0, %v2820_v17 }
  0x2a   : > { %2745 = vmatprep.mubr.msk.bf16.mxu1 %vm638_vm0, %v2821_v18 }
  0x30   : > { %2682 = vmatmul.mubr.msk.bf16.gmra.mxu0 %vm638_vm0, %v2822_v19 }
  0x31   : > { %2746 = vmatmul.mubr.msk.bf16.gmra.mxu1 %vm638_vm0, %v2823_v20  ;;  %2685 = vmatprep.mubr.msk.bf16.mxu0 %vm638_vm0, %v2824_v21 }
  0x32   : > { %2749 = vmatprep.mubr.msk.bf16.mxu1 %vm638_vm0, %v2825_v22 }
  0x38   : > { %2686 = vmatmul.mubr.msk.bf16.gmra.mxu0 %vm638_vm0, %v2826_v23 }
  0x39   : > { %2750 = vmatmul.mubr.msk.bf16.gmra.mxu1 %vm638_vm0, %v2827_v24  ;;  %2689 = vmatprep.mubr.msk.bf16.mxu0 %vm638_vm0, %v2828_v25 }
  0x3a   : > { %2753 = vmatprep.mubr.msk.bf16.mxu1 %vm638_vm0, %v2829_v26 }
  0x40   : > { %2690 = vmatmul.mubr.msk.bf16.gmra.mxu0 %vm638_vm0, %v2830_v27 }
  0x41   : > { %2754 = vmatmul.mubr.msk.bf16.gmra.mxu1 %vm638_vm0, %v2831_v28  ;;  %2693 = vmatprep.mubr.msk.bf16.mxu0 %vm638_vm0, %v2832_v29 }
  0x42   : > { %2757 = vmatprep.mubr.msk.bf16.mxu1 %vm638_vm0, %v2833_v30 }
  0x48   : > { %2694 = vmatmul.mubr.msk.bf16.gmra.mxu0 %vm638_vm0, %v2834_v31 }
  0x49   : > { %2758 = vmatmul.mubr.msk.bf16.gmra.mxu1 %vm638_vm0, %v2835_v32  ;;  %2697 = vmatprep.mubr.msk.bf16.mxu0 %vm638_vm0, %v2836_v33 }
  0x4a   : > { %2761 = vmatprep.mubr.msk.bf16.mxu1 %vm638_vm0, %v2837_v34 }
  0x50   : > { %2698 = vmatmul.mubr.msk.bf16.gmra.mxu0 %vm638_vm0, %v2838_v35 }
  0x51   : > { %2762 = vmatmul.mubr.msk.bf16.gmra.mxu1 %vm638_vm0, %v2839_v36  ;;  %2701 = vmatprep.mubr.msk.bf16.mxu0 %vm638_vm0, %v2840_v37 }
  0x52   : > { %2765 = vmatprep.mubr.msk.bf16.mxu1 %vm638_vm0, %v2841_v38 }
  0x58   : > { %2702 = vmatmul.mubr.msk.bf16.gmra.mxu0 %vm638_vm0, %v2842_v39 }
  0x59   : > { %2766 = vmatmul.mubr.msk.bf16.gmra.mxu1 %vm638_vm0, %v2843_v40  ;;  %2705 = vmatprep.mubr.msk.bf16.mxu0 %vm638_vm0, %v2844_v41 }
  0x5a   : > { %2769 = vmatprep.mubr.msk.bf16.mxu1 %vm638_vm0, %v2845_v42 }
  0x60   : > { %2706 = vmatmul.mubr.msk.bf16.gmra.mxu0 %vm638_vm0, %v2846_v43 }
  0x61   : > { %2770 = vmatmul.mubr.msk.bf16.gmra.mxu1 %vm638_vm0, %v2847_v44  ;;  %2709 = vmatprep.mubr.msk.bf16.mxu0 %vm638_vm0, %v2848_v45 }
  0x62   : > { %2773 = vmatprep.mubr.msk.bf16.mxu1 %vm638_vm0, %v2849_v46 }
  0x68   : > { %2710 = vmatmul.mubr.msk.bf16.gmra.mxu0 %vm638_vm0, %v2850_v47 }
  0x69   : > { %2774 = vmatmul.mubr.msk.bf16.gmra.mxu1 %vm638_vm0, %v2851_v48  ;;  %2713 = vmatprep.mubr.msk.bf16.mxu0 %vm638_vm0, %v2852_v49 }
  0x6a   : > { %2777 = vmatprep.mubr.msk.bf16.mxu1 %vm638_vm0, %v2853_v50 }
  0x70   : > { %2714 = vmatmul.mubr.msk.bf16.gmra.mxu0 %vm638_vm0, %v2854_v51 }
  0x71   : > { %2778 = vmatmul.mubr.msk.bf16.gmra.mxu1 %vm638_vm0, %v2855_v52  ;;  %2717 = vmatprep.mubr.msk.bf16.mxu0 %vm638_vm0, %v2856_v53 }
  0x72   : > { %2781 = vmatprep.mubr.msk.bf16.mxu1 %vm638_vm0, %v2857_v54 }
  0x78   : > { %2718 = vmatmul.mubr.msk.bf16.gmra.mxu0 %vm638_vm0, %v2858_v55 }
  0x79   : > { %2782 = vmatmul.mubr.msk.bf16.gmra.mxu1 %vm638_vm0, %v2859_v56  ;;  %2721 = vmatprep.mubr.msk.bf16.mxu0 %vm638_vm0, %v2860_v57 }
  0x7a   : > { %2785 = vmatprep.mubr.msk.bf16.mxu1 %vm638_vm0, %v2861_v58 }
  0x80   : > { %2722 = vmatmul.mubr.msk.bf16.gmra.mxu0 %vm638_vm0, %v2862_v59 }
  0x81   : > { %2786 = vmatmul.mubr.msk.bf16.gmra.mxu1 %vm638_vm0, %v2863_v60  ;;  %2725 = vmatprep.mubr.msk.bf16.mxu0 %vm638_vm0, %v2864_v61 }
  0x82   : > { %2789 = vmatprep.mubr.msk.bf16.mxu1 %vm638_vm0, %v2865_v62 }
  0x88   : > { %2726 = vmatmul.mubr.msk.bf16.gmra.mxu0 %vm638_vm0, %v2866_v63 }
  0x89   : > { %2790 = vmatmul.mubr.msk.bf16.gmra.mxu1 %vm638_vm0, %v2867_v0 }
  0xd0   : > { %v2667_v2 = vpop.f32.mrf.mxu0 }
  0xd1   : > { %v874_v3 = vadd.f32 %v2667_v2, %v3049_v1  ;;  %v2731_v4 = vpop.f32.mrf.mxu1 }
  0xd2   : > { %v1130_v5 = vadd.f32 %v2731_v4, %v3049_v1  ;;  %v865_v6 = vpop.f32.mrf.mxu0 }
  0xd3   : > { %v1378_v7 = vmax.f32 %v874_v3, 0.0  ;;  %v866_v8 = vadd.f32 %v3049_v1, %v865_v6  ;;  %v1121_v9 = vpop.f32.mrf.mxu1 }
  0xd4   : > { %v1442_v10 = vmax.f32 %v1130_v5, 0.0  ;;  %v1122_v11 = vadd.f32 %v3049_v1, %v1121_v9  ;;  %v2668_v12 = vpop.f32.mrf.mxu0 }
  0xd5   : > { %v2472_v13 = vpack.c.bf16 %v1378_v7, %v1378_v7  ;;  %v1376_v14 = vmax.f32 %v866_v8, 0.0  ;;  %v877_v15 = vadd.f32 %v2668_v12, %v3049_v1  ;;  %v2732_v16 = vpop.f32.mrf.mxu1 }
  0xd6   : > { %v2536_v17 = vpack.c.bf16 %v1442_v10, %v1442_v10  ;;  %v1440_v18 = vmax.f32 %v1122_v11, 0.0  ;;  %v1133_v19 = vadd.f32 %v2732_v16, %v3049_v1  ;;  %v868_v20 = vpop.f32.mrf.mxu0 }
  0xd7   : > { %2019 = vst.msk [vmem:[%s3059_s25 + $0x8] sm:$0xf] %vm2016_vm1, %v2472_v13  ;;  %v2470_v21 = vpack.c.bf16 %v1376_v14, %v1376_v14  ;;  %v1379_v22 = vmax.f32 %v877_v15, 0.0  ;;  %v869_v23 = vadd.f32 %v3049_v1, %v868_v20  ;;  %v1124_v24 = vpop.f32.mrf.mxu1 }
  0xd8   : > { %2083 = vst.msk [vmem:[%s3059_s25 + $0x108] sm:$0xf] %vm2016_vm1, %v2536_v17  ;;  %v2534_v25 = vpack.c.bf16 %v1440_v18, %v1440_v18  ;;  %v1443_v26 = vmax.f32 %v1133_v19, 0.0  ;;  %v1125_v27 = vadd.f32 %v3049_v1, %v1124_v24  ;;  %v2671_v28 = vpop.f32.mrf.mxu0 }
  0xd9   : > { %2017 = vst.msk [vmem:[%s3059_s25] sm:$0xf] %vm2016_vm1, %v2470_v21  ;;  %v2473_v29 = vpack.c.bf16 %v1379_v22, %v1379_v22  ;;  %v1377_v30 = vmax.f32 %v869_v23, 0.0  ;;  %v890_v31 = vadd.f32 %v2671_v28, %v3049_v1  ;;  %v2735_v32 = vpop.f32.mrf.mxu1 }
  0xda   : > { %2081 = vst.msk [vmem:[%s3059_s25 + $0x100] sm:$0xf] %vm2016_vm1, %v2534_v25  ;;  %v2537_v33 = vpack.c.bf16 %v1443_v26, %v1443_v26  ;;  %v1441_v34 = vmax.f32 %v1125_v27, 0.0  ;;  %v1146_v35 = vadd.f32 %v2735_v32, %v3049_v1  ;;  %v881_v36 = vpop.f32.mrf.mxu0 }
  0xdb   : > { %2020 = vst.msk [vmem:[%s3059_s25 + $0xc] sm:$0xf] %vm2016_vm1, %v2473_v29  ;;  %v2471_v37 = vpack.c.bf16 %v1377_v30, %v1377_v30  ;;  %v1382_v38 = vmax.f32 %v890_v31, 0.0  ;;  %v882_v39 = vadd.f32 %v3049_v1, %v881_v36  ;;  %v1137_v40 = vpop.f32.mrf.mxu1 }
  0xdc   : > { %2084 = vst.msk [vmem:[%s3059_s25 + $0x10c] sm:$0xf] %vm2016_vm1, %v2537_v33  ;;  %v2535_v41 = vpack.c.bf16 %v1441_v34, %v1441_v34  ;;  %v1446_v42 = vmax.f32 %v1146_v35, 0.0  ;;  %v1138_v43 = vadd.f32 %v3049_v1, %v1137_v40  ;;  %v2672_v44 = vpop.f32.mrf.mxu0 }
  0xdd   : > { %2018 = vst.msk [vmem:[%s3059_s25 + $0x4] sm:$0xf] %vm2016_vm1, %v2471_v37  ;;  %v2476_v45 = vpack.c.bf16 %v1382_v38, %v1382_v38  ;;  %v1380_v46 = vmax.f32 %v882_v39, 0.0  ;;  %v893_v47 = vadd.f32 %v2672_v44, %v3049_v1  ;;  %v2736_v48 = vpop.f32.mrf.mxu1 }
  0xde   : > { %2082 = vst.msk [vmem:[%s3059_s25 + $0x104] sm:$0xf] %vm2016_vm1, %v2535_v41  ;;  %v2540_v49 = vpack.c.bf16 %v1446_v42, %v1446_v42  ;;  %v1444_v50 = vmax.f32 %v1138_v43, 0.0  ;;  %v1149_v51 = vadd.f32 %v2736_v48, %v3049_v1  ;;  %v884_v52 = vpop.f32.mrf.mxu0 }
  0xdf   : > { %2023 = vst.msk [vmem:[%s3059_s25 + $0x18] sm:$0xf] %vm2016_vm1, %v2476_v45  ;;  %v2474_v53 = vpack.c.bf16 %v1380_v46, %v1380_v46  ;;  %v1383_v54 = vmax.f32 %v893_v47, 0.0  ;;  %v885_v55 = vadd.f32 %v3049_v1, %v884_v52  ;;  %v1140_v56 = vpop.f32.mrf.mxu1 }
  0xe0   : > { %2087 = vst.msk [vmem:[%s3059_s25 + $0x118] sm:$0xf] %vm2016_vm1, %v2540_v49  ;;  %v2538_v57 = vpack.c.bf16 %v1444_v50, %v1444_v50  ;;  %v1447_v58 = vmax.f32 %v1149_v51, 0.0  ;;  %v1141_v59 = vadd.f32 %v3049_v1, %v1140_v56  ;;  %v2675_v60 = vpop.f32.mrf.mxu0 }
  0xe1   : > { %2021 = vst.msk [vmem:[%s3059_s25 + $0x10] sm:$0xf] %vm2016_vm1, %v2474_v53  ;;  %v2477_v61 = vpack.c.bf16 %v1383_v54, %v1383_v54  ;;  %v1381_v62 = vmax.f32 %v885_v55, 0.0  ;;  %v906_v63 = vadd.f32 %v2675_v60, %v3049_v1  ;;  %v2739_v0 = vpop.f32.mrf.mxu1 }
  0xe2   : > { %2085 = vst.msk [vmem:[%s3059_s25 + $0x110] sm:$0xf] %vm2016_vm1, %v2538_v57  ;;  %v2541_v2 = vpack.c.bf16 %v1447_v58, %v1447_v58  ;;  %v1445_v3 = vmax.f32 %v1141_v59, 0.0  ;;  %v1162_v4 = vadd.f32 %v2739_v0, %v3049_v1  ;;  %v897_v5 = vpop.f32.mrf.mxu0 }
  0xe3   : > { %2024 = vst.msk [vmem:[%s3059_s25 + $0x1c] sm:$0xf] %vm2016_vm1, %v2477_v61  ;;  %v2475_v6 = vpack.c.bf16 %v1381_v62, %v1381_v62  ;;  %v1386_v7 = vmax.f32 %v906_v63, 0.0  ;;  %v898_v8 = vadd.f32 %v3049_v1, %v897_v5  ;;  %v1153_v9 = vpop.f32.mrf.mxu1 }
  0xe4   : > { %2088 = vst.msk [vmem:[%s3059_s25 + $0x11c] sm:$0xf] %vm2016_vm1, %v2541_v2  ;;  %v2539_v10 = vpack.c.bf16 %v1445_v3, %v1445_v3  ;;  %v1450_v11 = vmax.f32 %v1162_v4, 0.0  ;;  %v1154_v12 = vadd.f32 %v3049_v1, %v1153_v9  ;;  %v2676_v13 = vpop.f32.mrf.mxu0 }
  0xe5   : > { %2022 = vst.msk [vmem:[%s3059_s25 + $0x14] sm:$0xf] %vm2016_vm1, %v2475_v6  ;;  %v2480_v14 = vpack.c.bf16 %v1386_v7, %v1386_v7  ;;  %v1384_v15 = vmax.f32 %v898_v8, 0.0  ;;  %v909_v16 = vadd.f32 %v2676_v13, %v3049_v1  ;;  %v2740_v17 = vpop.f32.mrf.mxu1 }
  0xe6   : > { %2086 = vst.msk [vmem:[%s3059_s25 + $0x114] sm:$0xf] %vm2016_vm1, %v2539_v10  ;;  %v2544_v18 = vpack.c.bf16 %v1450_v11, %v1450_v11  ;;  %v1448_v19 = vmax.f32 %v1154_v12, 0.0  ;;  %v1165_v20 = vadd.f32 %v2740_v17, %v3049_v1  ;;  %v900_v21 = vpop.f32.mrf.mxu0 }
  0xe7   : > { %2027 = vst.msk [vmem:[%s3059_s25 + $0x28] sm:$0xf] %vm2016_vm1, %v2480_v14  ;;  %v2478_v22 = vpack.c.bf16 %v1384_v15, %v1384_v15  ;;  %v1387_v23 = vmax.f32 %v909_v16, 0.0  ;;  %v901_v24 = vadd.f32 %v3049_v1, %v900_v21  ;;  %v1156_v25 = vpop.f32.mrf.mxu1 }
  0xe8   : > { %2091 = vst.msk [vmem:[%s3059_s25 + $0x128] sm:$0xf] %vm2016_vm1, %v2544_v18  ;;  %v2542_v26 = vpack.c.bf16 %v1448_v19, %v1448_v19  ;;  %v1451_v27 = vmax.f32 %v1165_v20, 0.0  ;;  %v1157_v28 = vadd.f32 %v3049_v1, %v1156_v25  ;;  %v2679_v29 = vpop.f32.mrf.mxu0 }
  0xe9   : > { %2025 = vst.msk [vmem:[%s3059_s25 + $0x20] sm:$0xf] %vm2016_vm1, %v2478_v22  ;;  %v2481_v30 = vpack.c.bf16 %v1387_v23, %v1387_v23  ;;  %v1385_v31 = vmax.f32 %v901_v24, 0.0  ;;  %v922_v32 = vadd.f32 %v2679_v29, %v3049_v1  ;;  %v2743_v33 = vpop.f32.mrf.mxu1 }
  0xea   : > { %2089 = vst.msk [vmem:[%s3059_s25 + $0x120] sm:$0xf] %vm2016_vm1, %v2542_v26  ;;  %v2545_v34 = vpack.c.bf16 %v1451_v27, %v1451_v27  ;;  %v1449_v35 = vmax.f32 %v1157_v28, 0.0  ;;  %v1178_v36 = vadd.f32 %v2743_v33, %v3049_v1  ;;  %v913_v37 = vpop.f32.mrf.mxu0 }
  0xeb   : > { %2028 = vst.msk [vmem:[%s3059_s25 + $0x2c] sm:$0xf] %vm2016_vm1, %v2481_v30  ;;  %v2479_v38 = vpack.c.bf16 %v1385_v31, %v1385_v31  ;;  %v1390_v39 = vmax.f32 %v922_v32, 0.0  ;;  %v914_v40 = vadd.f32 %v3049_v1, %v913_v37  ;;  %v1169_v41 = vpop.f32.mrf.mxu1 }
  0xec   : > { %2092 = vst.msk [vmem:[%s3059_s25 + $0x12c] sm:$0xf] %vm2016_vm1, %v2545_v34  ;;  %v2543_v42 = vpack.c.bf16 %v1449_v35, %v1449_v35  ;;  %v1454_v43 = vmax.f32 %v1178_v36, 0.0  ;;  %v1170_v44 = vadd.f32 %v3049_v1, %v1169_v41  ;;  %v2680_v45 = vpop.f32.mrf.mxu0 }
  0xed   : > { %2026 = vst.msk [vmem:[%s3059_s25 + $0x24] sm:$0xf] %vm2016_vm1, %v2479_v38  ;;  %v2484_v46 = vpack.c.bf16 %v1390_v39, %v1390_v39  ;;  %v1388_v47 = vmax.f32 %v914_v40, 0.0  ;;  %v925_v48 = vadd.f32 %v2680_v45, %v3049_v1  ;;  %v2744_v49 = vpop.f32.mrf.mxu1 }
  0xee   : > { %2090 = vst.msk [vmem:[%s3059_s25 + $0x124] sm:$0xf] %vm2016_vm1, %v2543_v42  ;;  %v2548_v50 = vpack.c.bf16 %v1454_v43, %v1454_v43  ;;  %v1452_v51 = vmax.f32 %v1170_v44, 0.0  ;;  %v1181_v52 = vadd.f32 %v2744_v49, %v3049_v1  ;;  %v916_v53 = vpop.f32.mrf.mxu0 }
  0xef   : > { %2031 = vst.msk [vmem:[%s3059_s25 + $0x38] sm:$0xf] %vm2016_vm1, %v2484_v46  ;;  %v2482_v54 = vpack.c.bf16 %v1388_v47, %v1388_v47  ;;  %v1391_v55 = vmax.f32 %v925_v48, 0.0  ;;  %v917_v56 = vadd.f32 %v3049_v1, %v916_v53  ;;  %v1172_v57 = vpop.f32.mrf.mxu1 }
  0xf0   : > { %2095 = vst.msk [vmem:[%s3059_s25 + $0x138] sm:$0xf] %vm2016_vm1, %v2548_v50  ;;  %v2546_v58 = vpack.c.bf16 %v1452_v51, %v1452_v51  ;;  %v1455_v59 = vmax.f32 %v1181_v52, 0.0  ;;  %v1173_v60 = vadd.f32 %v3049_v1, %v1172_v57  ;;  %v2683_v61 = vpop.f32.mrf.mxu0 }
  0xf1   : > { %2029 = vst.msk [vmem:[%s3059_s25 + $0x30] sm:$0xf] %vm2016_vm1, %v2482_v54  ;;  %v2485_v62 = vpack.c.bf16 %v1391_v55, %v1391_v55  ;;  %v1389_v63 = vmax.f32 %v917_v56, 0.0  ;;  %v938_v0 = vadd.f32 %v2683_v61, %v3049_v1  ;;  %v2747_v2 = vpop.f32.mrf.mxu1 }
  0xf2   : > { %2093 = vst.msk [vmem:[%s3059_s25 + $0x130] sm:$0xf] %vm2016_vm1, %v2546_v58  ;;  %v2549_v3 = vpack.c.bf16 %v1455_v59, %v1455_v59  ;;  %v1453_v4 = vmax.f32 %v1173_v60, 0.0  ;;  %v1194_v5 = vadd.f32 %v2747_v2, %v3049_v1  ;;  %v929_v6 = vpop.f32.mrf.mxu0 }
  0xf3   : > { %2032 = vst.msk [vmem:[%s3059_s25 + $0x3c] sm:$0xf] %vm2016_vm1, %v2485_v62  ;;  %v2483_v7 = vpack.c.bf16 %v1389_v63, %v1389_v63  ;;  %v1394_v8 = vmax.f32 %v938_v0, 0.0  ;;  %v930_v9 = vadd.f32 %v3049_v1, %v929_v6  ;;  %v1185_v10 = vpop.f32.mrf.mxu1 }
  0xf4   : > { %2096 = vst.msk [vmem:[%s3059_s25 + $0x13c] sm:$0xf] %vm2016_vm1, %v2549_v3  ;;  %v2547_v11 = vpack.c.bf16 %v1453_v4, %v1453_v4  ;;  %v1458_v12 = vmax.f32 %v1194_v5, 0.0  ;;  %v1186_v13 = vadd.f32 %v3049_v1, %v1185_v10  ;;  %v2684_v14 = vpop.f32.mrf.mxu0 }
  0xf5   : > { %2030 = vst.msk [vmem:[%s3059_s25 + $0x34] sm:$0xf] %vm2016_vm1, %v2483_v7  ;;  %v2488_v15 = vpack.c.bf16 %v1394_v8, %v1394_v8  ;;  %v1392_v16 = vmax.f32 %v930_v9, 0.0  ;;  %v941_v17 = vadd.f32 %v2684_v14, %v3049_v1  ;;  %v2748_v18 = vpop.f32.mrf.mxu1 }
  0xf6   : > { %2094 = vst.msk [vmem:[%s3059_s25 + $0x134] sm:$0xf] %vm2016_vm1, %v2547_v11  ;;  %v2552_v19 = vpack.c.bf16 %v1458_v12, %v1458_v12  ;;  %v1456_v20 = vmax.f32 %v1186_v13, 0.0  ;;  %v1197_v21 = vadd.f32 %v2748_v18, %v3049_v1  ;;  %v932_v22 = vpop.f32.mrf.mxu0 }
  0xf7   : > { %2035 = vst.msk [vmem:[%s3059_s25 + $0x48] sm:$0xf] %vm2016_vm1, %v2488_v15  ;;  %v2486_v23 = vpack.c.bf16 %v1392_v16, %v1392_v16  ;;  %v1395_v24 = vmax.f32 %v941_v17, 0.0  ;;  %v933_v25 = vadd.f32 %v3049_v1, %v932_v22  ;;  %v1188_v26 = vpop.f32.mrf.mxu1 }
  0xf8   : > { %2099 = vst.msk [vmem:[%s3059_s25 + $0x148] sm:$0xf] %vm2016_vm1, %v2552_v19  ;;  %v2550_v27 = vpack.c.bf16 %v1456_v20, %v1456_v20  ;;  %v1459_v28 = vmax.f32 %v1197_v21, 0.0  ;;  %v1189_v29 = vadd.f32 %v3049_v1, %v1188_v26  ;;  %v2687_v30 = vpop.f32.mrf.mxu0 }
  0xf9   : > { %2033 = vst.msk [vmem:[%s3059_s25 + $0x40] sm:$0xf] %vm2016_vm1, %v2486_v23  ;;  %v2489_v31 = vpack.c.bf16 %v1395_v24, %v1395_v24  ;;  %v1393_v32 = vmax.f32 %v933_v25, 0.0  ;;  %v954_v33 = vadd.f32 %v2687_v30, %v3049_v1  ;;  %v2751_v34 = vpop.f32.mrf.mxu1 }
  0xfa   : > { %2097 = vst.msk [vmem:[%s3059_s25 + $0x140] sm:$0xf] %vm2016_vm1, %v2550_v27  ;;  %v2553_v35 = vpack.c.bf16 %v1459_v28, %v1459_v28  ;;  %v1457_v36 = vmax.f32 %v1189_v29, 0.0  ;;  %v1210_v37 = vadd.f32 %v2751_v34, %v3049_v1  ;;  %v945_v38 = vpop.f32.mrf.mxu0 }
  0xfb   : > { %2036 = vst.msk [vmem:[%s3059_s25 + $0x4c] sm:$0xf] %vm2016_vm1, %v2489_v31  ;;  %v2487_v39 = vpack.c.bf16 %v1393_v32, %v1393_v32  ;;  %v1398_v40 = vmax.f32 %v954_v33, 0.0  ;;  %v946_v41 = vadd.f32 %v3049_v1, %v945_v38  ;;  %v1201_v42 = vpop.f32.mrf.mxu1 }
  0xfc   : > { %2100 = vst.msk [vmem:[%s3059_s25 + $0x14c] sm:$0xf] %vm2016_vm1, %v2553_v35  ;;  %v2551_v43 = vpack.c.bf16 %v1457_v36, %v1457_v36  ;;  %v1462_v44 = vmax.f32 %v1210_v37, 0.0  ;;  %v1202_v45 = vadd.f32 %v3049_v1, %v1201_v42  ;;  %v2688_v46 = vpop.f32.mrf.mxu0 }
  0xfd   : > { %2034 = vst.msk [vmem:[%s3059_s25 + $0x44] sm:$0xf] %vm2016_vm1, %v2487_v39  ;;  %v2492_v47 = vpack.c.bf16 %v1398_v40, %v1398_v40  ;;  %v1396_v48 = vmax.f32 %v946_v41, 0.0  ;;  %v957_v49 = vadd.f32 %v2688_v46, %v3049_v1  ;;  %v2752_v50 = vpop.f32.mrf.mxu1 }
  0xfe   : > { %2098 = vst.msk [vmem:[%s3059_s25 + $0x144] sm:$0xf] %vm2016_vm1, %v2551_v43  ;;  %v2556_v51 = vpack.c.bf16 %v1462_v44, %v1462_v44  ;;  %v1460_v52 = vmax.f32 %v1202_v45, 0.0  ;;  %v1213_v53 = vadd.f32 %v2752_v50, %v3049_v1  ;;  %v948_v54 = vpop.f32.mrf.mxu0 }
  0xff   : > { %2039 = vst.msk [vmem:[%s3059_s25 + $0x58] sm:$0xf] %vm2016_vm1, %v2492_v47  ;;  %v2490_v55 = vpack.c.bf16 %v1396_v48, %v1396_v48  ;;  %v1399_v56 = vmax.f32 %v957_v49, 0.0  ;;  %v949_v57 = vadd.f32 %v3049_v1, %v948_v54  ;;  %v1204_v58 = vpop.f32.mrf.mxu1 }
 0x100   : > { %2103 = vst.msk [vmem:[%s3059_s25 + $0x158] sm:$0xf] %vm2016_vm1, %v2556_v51  ;;  %v2554_v59 = vpack.c.bf16 %v1460_v52, %v1460_v52  ;;  %v1463_v60 = vmax.f32 %v1213_v53, 0.0  ;;  %v1205_v61 = vadd.f32 %v3049_v1, %v1204_v58  ;;  %v2691_v62 = vpop.f32.mrf.mxu0 }
 0x101   : > { %2037 = vst.msk [vmem:[%s3059_s25 + $0x50] sm:$0xf] %vm2016_vm1, %v2490_v55  ;;  %v2493_v63 = vpack.c.bf16 %v1399_v56, %v1399_v56  ;;  %v1397_v0 = vmax.f32 %v949_v57, 0.0  ;;  %v970_v2 = vadd.f32 %v2691_v62, %v3049_v1  ;;  %v2755_v3 = vpop.f32.mrf.mxu1 }
 0x102   : > { %2101 = vst.msk [vmem:[%s3059_s25 + $0x150] sm:$0xf] %vm2016_vm1, %v2554_v59  ;;  %v2557_v4 = vpack.c.bf16 %v1463_v60, %v1463_v60  ;;  %v1461_v5 = vmax.f32 %v1205_v61, 0.0  ;;  %v1226_v6 = vadd.f32 %v2755_v3, %v3049_v1  ;;  %v961_v7 = vpop.f32.mrf.mxu0 }
 0x103   : > { %2040 = vst.msk [vmem:[%s3059_s25 + $0x5c] sm:$0xf] %vm2016_vm1, %v2493_v63  ;;  %v2491_v8 = vpack.c.bf16 %v1397_v0, %v1397_v0  ;;  %v1402_v9 = vmax.f32 %v970_v2, 0.0  ;;  %v962_v10 = vadd.f32 %v3049_v1, %v961_v7  ;;  %v1217_v11 = vpop.f32.mrf.mxu1 }
 0x104   : > { %2104 = vst.msk [vmem:[%s3059_s25 + $0x15c] sm:$0xf] %vm2016_vm1, %v2557_v4  ;;  %v2555_v12 = vpack.c.bf16 %v1461_v5, %v1461_v5  ;;  %v1466_v13 = vmax.f32 %v1226_v6, 0.0  ;;  %v1218_v14 = vadd.f32 %v3049_v1, %v1217_v11  ;;  %v2692_v15 = vpop.f32.mrf.mxu0 }
 0x105   : > { %2038 = vst.msk [vmem:[%s3059_s25 + $0x54] sm:$0xf] %vm2016_vm1, %v2491_v8  ;;  %v2496_v16 = vpack.c.bf16 %v1402_v9, %v1402_v9  ;;  %v1400_v17 = vmax.f32 %v962_v10, 0.0  ;;  %v973_v18 = vadd.f32 %v2692_v15, %v3049_v1  ;;  %v2756_v19 = vpop.f32.mrf.mxu1 }
 0x106   : > { %2102 = vst.msk [vmem:[%s3059_s25 + $0x154] sm:$0xf] %vm2016_vm1, %v2555_v12  ;;  %v2560_v20 = vpack.c.bf16 %v1466_v13, %v1466_v13  ;;  %v1464_v21 = vmax.f32 %v1218_v14, 0.0  ;;  %v1229_v22 = vadd.f32 %v2756_v19, %v3049_v1  ;;  %v964_v23 = vpop.f32.mrf.mxu0 }
 0x107   : > { %2043 = vst.msk [vmem:[%s3059_s25 + $0x68] sm:$0xf] %vm2016_vm1, %v2496_v16  ;;  %v2494_v24 = vpack.c.bf16 %v1400_v17, %v1400_v17  ;;  %v1403_v25 = vmax.f32 %v973_v18, 0.0  ;;  %v965_v26 = vadd.f32 %v3049_v1, %v964_v23  ;;  %v1220_v27 = vpop.f32.mrf.mxu1 }
 0x108   : > { %2107 = vst.msk [vmem:[%s3059_s25 + $0x168] sm:$0xf] %vm2016_vm1, %v2560_v20  ;;  %v2558_v28 = vpack.c.bf16 %v1464_v21, %v1464_v21  ;;  %v1467_v29 = vmax.f32 %v1229_v22, 0.0  ;;  %v1221_v30 = vadd.f32 %v3049_v1, %v1220_v27  ;;  %v2695_v31 = vpop.f32.mrf.mxu0 }
 0x109   : > { %2041 = vst.msk [vmem:[%s3059_s25 + $0x60] sm:$0xf] %vm2016_vm1, %v2494_v24  ;;  %v2497_v32 = vpack.c.bf16 %v1403_v25, %v1403_v25  ;;  %v1401_v33 = vmax.f32 %v965_v26, 0.0  ;;  %v986_v34 = vadd.f32 %v2695_v31, %v3049_v1  ;;  %v2759_v35 = vpop.f32.mrf.mxu1 }
 0x10a   : > { %2105 = vst.msk [vmem:[%s3059_s25 + $0x160] sm:$0xf] %vm2016_vm1, %v2558_v28  ;;  %v2561_v36 = vpack.c.bf16 %v1467_v29, %v1467_v29  ;;  %v1465_v37 = vmax.f32 %v1221_v30, 0.0  ;;  %v1242_v38 = vadd.f32 %v2759_v35, %v3049_v1  ;;  %v977_v39 = vpop.f32.mrf.mxu0 }
 0x10b   : > { %2044 = vst.msk [vmem:[%s3059_s25 + $0x6c] sm:$0xf] %vm2016_vm1, %v2497_v32  ;;  %v2495_v40 = vpack.c.bf16 %v1401_v33, %v1401_v33  ;;  %v1406_v41 = vmax.f32 %v986_v34, 0.0  ;;  %v978_v42 = vadd.f32 %v3049_v1, %v977_v39  ;;  %v1233_v43 = vpop.f32.mrf.mxu1 }
 0x10c   : > { %2108 = vst.msk [vmem:[%s3059_s25 + $0x16c] sm:$0xf] %vm2016_vm1, %v2561_v36  ;;  %v2559_v44 = vpack.c.bf16 %v1465_v37, %v1465_v37  ;;  %v1470_v45 = vmax.f32 %v1242_v38, 0.0  ;;  %v1234_v46 = vadd.f32 %v3049_v1, %v1233_v43  ;;  %v2696_v47 = vpop.f32.mrf.mxu0 }
 0x10d   : > { %2042 = vst.msk [vmem:[%s3059_s25 + $0x64] sm:$0xf] %vm2016_vm1, %v2495_v40  ;;  %v2500_v48 = vpack.c.bf16 %v1406_v41, %v1406_v41  ;;  %v1404_v49 = vmax.f32 %v978_v42, 0.0  ;;  %v989_v50 = vadd.f32 %v2696_v47, %v3049_v1  ;;  %v2760_v51 = vpop.f32.mrf.mxu1 }
 0x10e   : > { %2106 = vst.msk [vmem:[%s3059_s25 + $0x164] sm:$0xf] %vm2016_vm1, %v2559_v44  ;;  %v2564_v52 = vpack.c.bf16 %v1470_v45, %v1470_v45  ;;  %v1468_v53 = vmax.f32 %v1234_v46, 0.0  ;;  %v1245_v54 = vadd.f32 %v2760_v51, %v3049_v1  ;;  %v980_v55 = vpop.f32.mrf.mxu0 }
 0x10f   : > { %2047 = vst.msk [vmem:[%s3059_s25 + $0x78] sm:$0xf] %vm2016_vm1, %v2500_v48  ;;  %v2498_v56 = vpack.c.bf16 %v1404_v49, %v1404_v49  ;;  %v1407_v57 = vmax.f32 %v989_v50, 0.0  ;;  %v981_v58 = vadd.f32 %v3049_v1, %v980_v55  ;;  %v1236_v59 = vpop.f32.mrf.mxu1 }
 0x110   : > { %2111 = vst.msk [vmem:[%s3059_s25 + $0x178] sm:$0xf] %vm2016_vm1, %v2564_v52  ;;  %v2562_v60 = vpack.c.bf16 %v1468_v53, %v1468_v53  ;;  %v1471_v61 = vmax.f32 %v1245_v54, 0.0  ;;  %v1237_v62 = vadd.f32 %v3049_v1, %v1236_v59  ;;  %v2699_v63 = vpop.f32.mrf.mxu0 }
 0x111   : > { %2045 = vst.msk [vmem:[%s3059_s25 + $0x70] sm:$0xf] %vm2016_vm1, %v2498_v56  ;;  %v2501_v0 = vpack.c.bf16 %v1407_v57, %v1407_v57  ;;  %v1405_v2 = vmax.f32 %v981_v58, 0.0  ;;  %v1002_v3 = vadd.f32 %v2699_v63, %v3049_v1  ;;  %v2763_v4 = vpop.f32.mrf.mxu1 }
 0x112   : > { %2109 = vst.msk [vmem:[%s3059_s25 + $0x170] sm:$0xf] %vm2016_vm1, %v2562_v60  ;;  %v2565_v5 = vpack.c.bf16 %v1471_v61, %v1471_v61  ;;  %v1469_v6 = vmax.f32 %v1237_v62, 0.0  ;;  %v1258_v7 = vadd.f32 %v2763_v4, %v3049_v1  ;;  %v993_v8 = vpop.f32.mrf.mxu0 }
 0x113   : > { %2048 = vst.msk [vmem:[%s3059_s25 + $0x7c] sm:$0xf] %vm2016_vm1, %v2501_v0  ;;  %v2499_v9 = vpack.c.bf16 %v1405_v2, %v1405_v2  ;;  %v1410_v10 = vmax.f32 %v1002_v3, 0.0  ;;  %v994_v11 = vadd.f32 %v3049_v1, %v993_v8  ;;  %v1249_v12 = vpop.f32.mrf.mxu1 }
 0x114   : > { %2112 = vst.msk [vmem:[%s3059_s25 + $0x17c] sm:$0xf] %vm2016_vm1, %v2565_v5  ;;  %v2563_v13 = vpack.c.bf16 %v1469_v6, %v1469_v6  ;;  %v1474_v14 = vmax.f32 %v1258_v7, 0.0  ;;  %v1250_v15 = vadd.f32 %v3049_v1, %v1249_v12  ;;  %v2700_v16 = vpop.f32.mrf.mxu0 }
 0x115   : > { %2046 = vst.msk [vmem:[%s3059_s25 + $0x74] sm:$0xf] %vm2016_vm1, %v2499_v9  ;;  %v2504_v17 = vpack.c.bf16 %v1410_v10, %v1410_v10  ;;  %v1408_v18 = vmax.f32 %v994_v11, 0.0  ;;  %v1005_v19 = vadd.f32 %v2700_v16, %v3049_v1  ;;  %v2764_v20 = vpop.f32.mrf.mxu1 }
 0x116   : > { %2110 = vst.msk [vmem:[%s3059_s25 + $0x174] sm:$0xf] %vm2016_vm1, %v2563_v13  ;;  %v2568_v21 = vpack.c.bf16 %v1474_v14, %v1474_v14  ;;  %v1472_v22 = vmax.f32 %v1250_v15, 0.0  ;;  %v1261_v23 = vadd.f32 %v2764_v20, %v3049_v1  ;;  %v996_v24 = vpop.f32.mrf.mxu0 }
 0x117   : > { %2051 = vst.msk [vmem:[%s3059_s25 + $0x88] sm:$0xf] %vm2016_vm1, %v2504_v17  ;;  %v2502_v25 = vpack.c.bf16 %v1408_v18, %v1408_v18  ;;  %v1411_v26 = vmax.f32 %v1005_v19, 0.0  ;;  %v997_v27 = vadd.f32 %v3049_v1, %v996_v24  ;;  %v1252_v28 = vpop.f32.mrf.mxu1 }
 0x118   : > { %2115 = vst.msk [vmem:[%s3059_s25 + $0x188] sm:$0xf] %vm2016_vm1, %v2568_v21  ;;  %v2566_v29 = vpack.c.bf16 %v1472_v22, %v1472_v22  ;;  %v1475_v30 = vmax.f32 %v1261_v23, 0.0  ;;  %v1253_v31 = vadd.f32 %v3049_v1, %v1252_v28  ;;  %v2703_v32 = vpop.f32.mrf.mxu0 }
 0x119   : > { %2049 = vst.msk [vmem:[%s3059_s25 + $0x80] sm:$0xf] %vm2016_vm1, %v2502_v25  ;;  %v2505_v33 = vpack.c.bf16 %v1411_v26, %v1411_v26  ;;  %v1409_v34 = vmax.f32 %v997_v27, 0.0  ;;  %v1018_v35 = vadd.f32 %v2703_v32, %v3049_v1  ;;  %v2767_v36 = vpop.f32.mrf.mxu1 }
 0x11a   : > { %2113 = vst.msk [vmem:[%s3059_s25 + $0x180] sm:$0xf] %vm2016_vm1, %v2566_v29  ;;  %v2569_v37 = vpack.c.bf16 %v1475_v30, %v1475_v30  ;;  %v1473_v38 = vmax.f32 %v1253_v31, 0.0  ;;  %v1274_v39 = vadd.f32 %v2767_v36, %v3049_v1  ;;  %v1009_v40 = vpop.f32.mrf.mxu0 }
 0x11b   : > { %2052 = vst.msk [vmem:[%s3059_s25 + $0x8c] sm:$0xf] %vm2016_vm1, %v2505_v33  ;;  %v2503_v41 = vpack.c.bf16 %v1409_v34, %v1409_v34  ;;  %v1414_v42 = vmax.f32 %v1018_v35, 0.0  ;;  %v1010_v43 = vadd.f32 %v3049_v1, %v1009_v40  ;;  %v1265_v44 = vpop.f32.mrf.mxu1 }
 0x11c   : > { %2116 = vst.msk [vmem:[%s3059_s25 + $0x18c] sm:$0xf] %vm2016_vm1, %v2569_v37  ;;  %v2567_v45 = vpack.c.bf16 %v1473_v38, %v1473_v38  ;;  %v1478_v46 = vmax.f32 %v1274_v39, 0.0  ;;  %v1266_v47 = vadd.f32 %v3049_v1, %v1265_v44  ;;  %v2704_v48 = vpop.f32.mrf.mxu0 }
 0x11d   : > { %2050 = vst.msk [vmem:[%s3059_s25 + $0x84] sm:$0xf] %vm2016_vm1, %v2503_v41  ;;  %v2508_v49 = vpack.c.bf16 %v1414_v42, %v1414_v42  ;;  %v1412_v50 = vmax.f32 %v1010_v43, 0.0  ;;  %v1021_v51 = vadd.f32 %v2704_v48, %v3049_v1  ;;  %v2768_v52 = vpop.f32.mrf.mxu1 }
 0x11e   : > { %2114 = vst.msk [vmem:[%s3059_s25 + $0x184] sm:$0xf] %vm2016_vm1, %v2567_v45  ;;  %v2572_v53 = vpack.c.bf16 %v1478_v46, %v1478_v46  ;;  %v1476_v54 = vmax.f32 %v1266_v47, 0.0  ;;  %v1277_v55 = vadd.f32 %v2768_v52, %v3049_v1  ;;  %v1012_v56 = vpop.f32.mrf.mxu0 }
 0x11f   : > { %2055 = vst.msk [vmem:[%s3059_s25 + $0x98] sm:$0xf] %vm2016_vm1, %v2508_v49  ;;  %v2506_v57 = vpack.c.bf16 %v1412_v50, %v1412_v50  ;;  %v1415_v58 = vmax.f32 %v1021_v51, 0.0  ;;  %v1013_v59 = vadd.f32 %v3049_v1, %v1012_v56  ;;  %v1268_v60 = vpop.f32.mrf.mxu1 }
 0x120   : > { %2119 = vst.msk [vmem:[%s3059_s25 + $0x198] sm:$0xf] %vm2016_vm1, %v2572_v53  ;;  %v2570_v61 = vpack.c.bf16 %v1476_v54, %v1476_v54  ;;  %v1479_v62 = vmax.f32 %v1277_v55, 0.0  ;;  %v1269_v63 = vadd.f32 %v3049_v1, %v1268_v60  ;;  %v2707_v0 = vpop.f32.mrf.mxu0 }
 0x121   : > { %2053 = vst.msk [vmem:[%s3059_s25 + $0x90] sm:$0xf] %vm2016_vm1, %v2506_v57  ;;  %v2509_v2 = vpack.c.bf16 %v1415_v58, %v1415_v58  ;;  %v1413_v3 = vmax.f32 %v1013_v59, 0.0  ;;  %v1034_v4 = vadd.f32 %v2707_v0, %v3049_v1  ;;  %v2771_v5 = vpop.f32.mrf.mxu1 }
 0x122   : > { %2117 = vst.msk [vmem:[%s3059_s25 + $0x190] sm:$0xf] %vm2016_vm1, %v2570_v61  ;;  %v2573_v6 = vpack.c.bf16 %v1479_v62, %v1479_v62  ;;  %v1477_v7 = vmax.f32 %v1269_v63, 0.0  ;;  %v1290_v8 = vadd.f32 %v2771_v5, %v3049_v1  ;;  %v1025_v9 = vpop.f32.mrf.mxu0 }
 0x123   : > { %2056 = vst.msk [vmem:[%s3059_s25 + $0x9c] sm:$0xf] %vm2016_vm1, %v2509_v2  ;;  %v2507_v10 = vpack.c.bf16 %v1413_v3, %v1413_v3  ;;  %v1418_v11 = vmax.f32 %v1034_v4, 0.0  ;;  %v1026_v12 = vadd.f32 %v3049_v1, %v1025_v9  ;;  %v1281_v13 = vpop.f32.mrf.mxu1 }
 0x124   : > { %2120 = vst.msk [vmem:[%s3059_s25 + $0x19c] sm:$0xf] %vm2016_vm1, %v2573_v6  ;;  %v2571_v14 = vpack.c.bf16 %v1477_v7, %v1477_v7  ;;  %v1482_v15 = vmax.f32 %v1290_v8, 0.0  ;;  %v1282_v16 = vadd.f32 %v3049_v1, %v1281_v13  ;;  %v2708_v17 = vpop.f32.mrf.mxu0 }
 0x125   : > { %2054 = vst.msk [vmem:[%s3059_s25 + $0x94] sm:$0xf] %vm2016_vm1, %v2507_v10  ;;  %v2512_v18 = vpack.c.bf16 %v1418_v11, %v1418_v11  ;;  %v1416_v19 = vmax.f32 %v1026_v12, 0.0  ;;  %v1037_v20 = vadd.f32 %v2708_v17, %v3049_v1  ;;  %v2772_v21 = vpop.f32.mrf.mxu1 }
 0x126   : > { %2118 = vst.msk [vmem:[%s3059_s25 + $0x194] sm:$0xf] %vm2016_vm1, %v2571_v14  ;;  %v2576_v22 = vpack.c.bf16 %v1482_v15, %v1482_v15  ;;  %v1480_v23 = vmax.f32 %v1282_v16, 0.0  ;;  %v1293_v24 = vadd.f32 %v2772_v21, %v3049_v1  ;;  %v1028_v25 = vpop.f32.mrf.mxu0 }
 0x127   : > { %2059 = vst.msk [vmem:[%s3059_s25 + $0xa8] sm:$0xf] %vm2016_vm1, %v2512_v18  ;;  %v2510_v26 = vpack.c.bf16 %v1416_v19, %v1416_v19  ;;  %v1419_v27 = vmax.f32 %v1037_v20, 0.0  ;;  %v1029_v28 = vadd.f32 %v3049_v1, %v1028_v25  ;;  %v1284_v29 = vpop.f32.mrf.mxu1 }
 0x128   : > { %2123 = vst.msk [vmem:[%s3059_s25 + $0x1a8] sm:$0xf] %vm2016_vm1, %v2576_v22  ;;  %v2574_v30 = vpack.c.bf16 %v1480_v23, %v1480_v23  ;;  %v1483_v31 = vmax.f32 %v1293_v24, 0.0  ;;  %v1285_v32 = vadd.f32 %v3049_v1, %v1284_v29  ;;  %v2711_v33 = vpop.f32.mrf.mxu0 }
 0x129   : > { %2057 = vst.msk [vmem:[%s3059_s25 + $0xa0] sm:$0xf] %vm2016_vm1, %v2510_v26  ;;  %v2513_v34 = vpack.c.bf16 %v1419_v27, %v1419_v27  ;;  %v1417_v35 = vmax.f32 %v1029_v28, 0.0  ;;  %v1050_v36 = vadd.f32 %v2711_v33, %v3049_v1  ;;  %v2775_v37 = vpop.f32.mrf.mxu1 }
 0x12a   : > { %2121 = vst.msk [vmem:[%s3059_s25 + $0x1a0] sm:$0xf] %vm2016_vm1, %v2574_v30  ;;  %v2577_v38 = vpack.c.bf16 %v1483_v31, %v1483_v31  ;;  %v1481_v39 = vmax.f32 %v1285_v32, 0.0  ;;  %v1306_v40 = vadd.f32 %v2775_v37, %v3049_v1  ;;  %v1041_v41 = vpop.f32.mrf.mxu0  ;;  %v3363_v37 = vld [vmem:[%s3452_s2] ss:$0 sm:$0xff] }
 0x12b   : > { %2060 = vst.msk [vmem:[%s3059_s25 + $0xac] sm:$0xf] %vm2016_vm1, %v2513_v34  ;;  %v2511_v42 = vpack.c.bf16 %v1417_v35, %v1417_v35  ;;  %v1422_v43 = vmax.f32 %v1050_v36, 0.0  ;;  %v1042_v44 = vadd.f32 %v3049_v1, %v1041_v41  ;;  %v1297_v45 = vpop.f32.mrf.mxu1 }
 0x12c   : > { %2124 = vst.msk [vmem:[%s3059_s25 + $0x1ac] sm:$0xf] %vm2016_vm1, %v2577_v38  ;;  %v2575_v46 = vpack.c.bf16 %v1481_v39, %v1481_v39  ;;  %v1486_v47 = vmax.f32 %v1306_v40, 0.0  ;;  %v1298_v48 = vadd.f32 %v3049_v1, %v1297_v45  ;;  %v2712_v49 = vpop.f32.mrf.mxu0 }
 0x12d   : > { %2058 = vst.msk [vmem:[%s3059_s25 + $0xa4] sm:$0xf] %vm2016_vm1, %v2511_v42  ;;  %v2516_v50 = vpack.c.bf16 %v1422_v43, %v1422_v43  ;;  %v1420_v51 = vmax.f32 %v1042_v44, 0.0  ;;  %v1053_v52 = vadd.f32 %v2712_v49, %v3049_v1  ;;  %v2776_v53 = vpop.f32.mrf.mxu1 }
 0x12e   : > { %2122 = vst.msk [vmem:[%s3059_s25 + $0x1a4] sm:$0xf] %vm2016_vm1, %v2575_v46  ;;  %v2580_v54 = vpack.c.bf16 %v1486_v47, %v1486_v47  ;;  %v1484_v55 = vmax.f32 %v1298_v48, 0.0  ;;  %v1309_v56 = vadd.f32 %v2776_v53, %v3049_v1  ;;  %v1044_v57 = vpop.f32.mrf.mxu0 }
 0x12f   : > { %2063 = vst.msk [vmem:[%s3059_s25 + $0xb8] sm:$0xf] %vm2016_vm1, %v2516_v50  ;;  %v2514_v58 = vpack.c.bf16 %v1420_v51, %v1420_v51  ;;  %v1423_v59 = vmax.f32 %v1053_v52, 0.0  ;;  %v1045_v60 = vadd.f32 %v3049_v1, %v1044_v57  ;;  %v1300_v61 = vpop.f32.mrf.mxu1 }
 0x130   : > { %2127 = vst.msk [vmem:[%s3059_s25 + $0x1b8] sm:$0xf] %vm2016_vm1, %v2580_v54  ;;  %v2578_v62 = vpack.c.bf16 %v1484_v55, %v1484_v55  ;;  %v1487_v63 = vmax.f32 %v1309_v56, 0.0  ;;  %v1301_v0 = vadd.f32 %v3049_v1, %v1300_v61  ;;  %v2715_v2 = vpop.f32.mrf.mxu0 }
 0x131   : > { %2061 = vst.msk [vmem:[%s3059_s25 + $0xb0] sm:$0xf] %vm2016_vm1, %v2514_v58  ;;  %v2517_v3 = vpack.c.bf16 %v1423_v59, %v1423_v59  ;;  %v1421_v4 = vmax.f32 %v1045_v60, 0.0  ;;  %v1066_v5 = vadd.f32 %v2715_v2, %v3049_v1  ;;  %v2779_v6 = vpop.f32.mrf.mxu1 }
 0x132   : > { %2125 = vst.msk [vmem:[%s3059_s25 + $0x1b0] sm:$0xf] %vm2016_vm1, %v2578_v62  ;;  %v2581_v7 = vpack.c.bf16 %v1487_v63, %v1487_v63  ;;  %v1485_v8 = vmax.f32 %v1301_v0, 0.0  ;;  %v1322_v9 = vadd.f32 %v2779_v6, %v3049_v1  ;;  %v1057_v10 = vpop.f32.mrf.mxu0 }
 0x133   : > { %2064 = vst.msk [vmem:[%s3059_s25 + $0xbc] sm:$0xf] %vm2016_vm1, %v2517_v3  ;;  %v2515_v11 = vpack.c.bf16 %v1421_v4, %v1421_v4  ;;  %v1426_v12 = vmax.f32 %v1066_v5, 0.0  ;;  %v1058_v13 = vadd.f32 %v3049_v1, %v1057_v10  ;;  %v1313_v14 = vpop.f32.mrf.mxu1 }
 0x134   : > { %2128 = vst.msk [vmem:[%s3059_s25 + $0x1bc] sm:$0xf] %vm2016_vm1, %v2581_v7  ;;  %v2579_v15 = vpack.c.bf16 %v1485_v8, %v1485_v8  ;;  %v1490_v16 = vmax.f32 %v1322_v9, 0.0  ;;  %v1314_v17 = vadd.f32 %v3049_v1, %v1313_v14  ;;  %v2716_v18 = vpop.f32.mrf.mxu0 }
 0x135   : > { %2062 = vst.msk [vmem:[%s3059_s25 + $0xb4] sm:$0xf] %vm2016_vm1, %v2515_v11  ;;  %v2520_v19 = vpack.c.bf16 %v1426_v12, %v1426_v12  ;;  %v1424_v20 = vmax.f32 %v1058_v13, 0.0  ;;  %v1069_v21 = vadd.f32 %v2716_v18, %v3049_v1  ;;  %v2780_v22 = vpop.f32.mrf.mxu1 }
 0x136   : > { %2126 = vst.msk [vmem:[%s3059_s25 + $0x1b4] sm:$0xf] %vm2016_vm1, %v2579_v15  ;;  %v2584_v23 = vpack.c.bf16 %v1490_v16, %v1490_v16  ;;  %v1488_v24 = vmax.f32 %v1314_v17, 0.0  ;;  %v1325_v25 = vadd.f32 %v2780_v22, %v3049_v1  ;;  %v1060_v26 = vpop.f32.mrf.mxu0 }
 0x137   : > { %2067 = vst.msk [vmem:[%s3059_s25 + $0xc8] sm:$0xf] %vm2016_vm1, %v2520_v19  ;;  %v2518_v27 = vpack.c.bf16 %v1424_v20, %v1424_v20  ;;  %v1427_v28 = vmax.f32 %v1069_v21, 0.0  ;;  %v1061_v29 = vadd.f32 %v3049_v1, %v1060_v26  ;;  %v1316_v30 = vpop.f32.mrf.mxu1 }
 0x138   : > { %2131 = vst.msk [vmem:[%s3059_s25 + $0x1c8] sm:$0xf] %vm2016_vm1, %v2584_v23  ;;  %v2582_v31 = vpack.c.bf16 %v1488_v24, %v1488_v24  ;;  %v1491_v32 = vmax.f32 %v1325_v25, 0.0  ;;  %v1317_v33 = vadd.f32 %v3049_v1, %v1316_v30  ;;  %v2719_v34 = vpop.f32.mrf.mxu0 }
 0x139   : > { %2065 = vst.msk [vmem:[%s3059_s25 + $0xc0] sm:$0xf] %vm2016_vm1, %v2518_v27  ;;  %v2521_v35 = vpack.c.bf16 %v1427_v28, %v1427_v28  ;;  %v1425_v36 = vmax.f32 %v1061_v29, 0.0  ;;  %v1082_v38 = vadd.f32 %v3363_v37, %v2719_v34  ;;  %v2783_v39 = vpop.f32.mrf.mxu1 }
 0x13a   : > { %2129 = vst.msk [vmem:[%s3059_s25 + $0x1c0] sm:$0xf] %vm2016_vm1, %v2582_v31  ;;  %v2585_v40 = vpack.c.bf16 %v1491_v32, %v1491_v32  ;;  %v1489_v41 = vmax.f32 %v1317_v33, 0.0  ;;  %v1338_v1 = vadd.f32 %v3363_v37, %v2783_v39  ;;  %v1073_v42 = vpop.f32.mrf.mxu0 }
 0x13b   : > { %2068 = vst.msk [vmem:[%s3059_s25 + $0xcc] sm:$0xf] %vm2016_vm1, %v2521_v35  ;;  %v2519_v43 = vpack.c.bf16 %v1425_v36, %v1425_v36  ;;  %v1430_v44 = vmax.f32 %v1082_v38, 0.0  ;;  %v1074_v45 = vadd.f32 %v3363_v37, %v1073_v42  ;;  %v1329_v46 = vpop.f32.mrf.mxu1 }
 0x13c   : > { %2132 = vst.msk [vmem:[%s3059_s25 + $0x1cc] sm:$0xf] %vm2016_vm1, %v2585_v40  ;;  %v2583_v47 = vpack.c.bf16 %v1489_v41, %v1489_v41  ;;  %v1494_v48 = vmax.f32 %v1338_v1, 0.0  ;;  %v1330_v49 = vadd.f32 %v3363_v37, %v1329_v46  ;;  %v2720_v50 = vpop.f32.mrf.mxu0 }
 0x13d   : > { %2066 = vst.msk [vmem:[%s3059_s25 + $0xc4] sm:$0xf] %vm2016_vm1, %v2519_v43  ;;  %v2524_v51 = vpack.c.bf16 %v1430_v44, %v1430_v44  ;;  %v1428_v52 = vmax.f32 %v1074_v45, 0.0  ;;  %v1085_v53 = vadd.f32 %v3363_v37, %v2720_v50  ;;  %v2784_v54 = vpop.f32.mrf.mxu1 }
 0x13e   : > { %2130 = vst.msk [vmem:[%s3059_s25 + $0x1c4] sm:$0xf] %vm2016_vm1, %v2583_v47  ;;  %v2588_v55 = vpack.c.bf16 %v1494_v48, %v1494_v48  ;;  %v1492_v56 = vmax.f32 %v1330_v49, 0.0  ;;  %v1341_v57 = vadd.f32 %v3363_v37, %v2784_v54  ;;  %v1076_v58 = vpop.f32.mrf.mxu0 }
 0x13f   : > { %2071 = vst.msk [vmem:[%s3059_s25 + $0xd8] sm:$0xf] %vm2016_vm1, %v2524_v51  ;;  %v2522_v59 = vpack.c.bf16 %v1428_v52, %v1428_v52  ;;  %v1431_v60 = vmax.f32 %v1085_v53, 0.0  ;;  %v1077_v61 = vadd.f32 %v3363_v37, %v1076_v58  ;;  %v1332_v62 = vpop.f32.mrf.mxu1 }
 0x140   : > { %2135 = vst.msk [vmem:[%s3059_s25 + $0x1d8] sm:$0xf] %vm2016_vm1, %v2588_v55  ;;  %v2586_v63 = vpack.c.bf16 %v1492_v56, %v1492_v56  ;;  %v1495_v0 = vmax.f32 %v1341_v57, 0.0  ;;  %v1333_v2 = vadd.f32 %v3363_v37, %v1332_v62  ;;  %v2723_v3 = vpop.f32.mrf.mxu0 }
 0x141   : > { %2069 = vst.msk [vmem:[%s3059_s25 + $0xd0] sm:$0xf] %vm2016_vm1, %v2522_v59  ;;  %v2525_v4 = vpack.c.bf16 %v1431_v60, %v1431_v60  ;;  %v1429_v5 = vmax.f32 %v1077_v61, 0.0  ;;  %v1098_v6 = vadd.f32 %v3363_v37, %v2723_v3  ;;  %v2787_v7 = vpop.f32.mrf.mxu1 }
 0x142   : > { %2133 = vst.msk [vmem:[%s3059_s25 + $0x1d0] sm:$0xf] %vm2016_vm1, %v2586_v63  ;;  %v2589_v8 = vpack.c.bf16 %v1495_v0, %v1495_v0  ;;  %v1493_v9 = vmax.f32 %v1333_v2, 0.0  ;;  %v1354_v10 = vadd.f32 %v3363_v37, %v2787_v7  ;;  %v1089_v11 = vpop.f32.mrf.mxu0 }
 0x143   : > { %2072 = vst.msk [vmem:[%s3059_s25 + $0xdc] sm:$0xf] %vm2016_vm1, %v2525_v4  ;;  %v2523_v12 = vpack.c.bf16 %v1429_v5, %v1429_v5  ;;  %v1434_v13 = vmax.f32 %v1098_v6, 0.0  ;;  %v1090_v14 = vadd.f32 %v3363_v37, %v1089_v11  ;;  %v1345_v15 = vpop.f32.mrf.mxu1 }
 0x144   : > { %2136 = vst.msk [vmem:[%s3059_s25 + $0x1dc] sm:$0xf] %vm2016_vm1, %v2589_v8  ;;  %v2587_v16 = vpack.c.bf16 %v1493_v9, %v1493_v9  ;;  %v1498_v17 = vmax.f32 %v1354_v10, 0.0  ;;  %v1346_v18 = vadd.f32 %v3363_v37, %v1345_v15  ;;  %v2724_v19 = vpop.f32.mrf.mxu0 }
 0x145   : > { %2070 = vst.msk [vmem:[%s3059_s25 + $0xd4] sm:$0xf] %vm2016_vm1, %v2523_v12  ;;  %v2528_v20 = vpack.c.bf16 %v1434_v13, %v1434_v13  ;;  %v1432_v21 = vmax.f32 %v1090_v14, 0.0  ;;  %v1101_v22 = vadd.f32 %v3363_v37, %v2724_v19  ;;  %v2788_v23 = vpop.f32.mrf.mxu1 }
 0x146   : > { %2134 = vst.msk [vmem:[%s3059_s25 + $0x1d4] sm:$0xf] %vm2016_vm1, %v2587_v16  ;;  %v2592_v24 = vpack.c.bf16 %v1498_v17, %v1498_v17  ;;  %v1496_v25 = vmax.f32 %v1346_v18, 0.0  ;;  %v1357_v26 = vadd.f32 %v3363_v37, %v2788_v23  ;;  %v1092_v27 = vpop.f32.mrf.mxu0 }
 0x147   : > { %2075 = vst.msk [vmem:[%s3059_s25 + $0xe8] sm:$0xf] %vm2016_vm1, %v2528_v20  ;;  %v2526_v28 = vpack.c.bf16 %v1432_v21, %v1432_v21  ;;  %v1435_v29 = vmax.f32 %v1101_v22, 0.0  ;;  %v1093_v30 = vadd.f32 %v3363_v37, %v1092_v27  ;;  %v1348_v31 = vpop.f32.mrf.mxu1 }
 0x148   : > { %2139 = vst.msk [vmem:[%s3059_s25 + $0x1e8] sm:$0xf] %vm2016_vm1, %v2592_v24  ;;  %v2590_v32 = vpack.c.bf16 %v1496_v25, %v1496_v25  ;;  %v1499_v33 = vmax.f32 %v1357_v26, 0.0  ;;  %v1349_v34 = vadd.f32 %v3363_v37, %v1348_v31  ;;  %v2727_v35 = vpop.f32.mrf.mxu0 }
 0x149   : > { %2073 = vst.msk [vmem:[%s3059_s25 + $0xe0] sm:$0xf] %vm2016_vm1, %v2526_v28  ;;  %v2529_v36 = vpack.c.bf16 %v1435_v29, %v1435_v29  ;;  %v1433_v38 = vmax.f32 %v1093_v30, 0.0  ;;  %v1114_v39 = vadd.f32 %v3363_v37, %v2727_v35  ;;  %v2791_v40 = vpop.f32.mrf.mxu1 }
 0x14a   : > { %2137 = vst.msk [vmem:[%s3059_s25 + $0x1e0] sm:$0xf] %vm2016_vm1, %v2590_v32  ;;  %v2593_v41 = vpack.c.bf16 %v1499_v33, %v1499_v33  ;;  %v1497_v1 = vmax.f32 %v1349_v34, 0.0  ;;  %v1370_v42 = vadd.f32 %v3363_v37, %v2791_v40  ;;  %v1105_v43 = vpop.f32.mrf.mxu0 }
 0x14b   : > { %2076 = vst.msk [vmem:[%s3059_s25 + $0xec] sm:$0xf] %vm2016_vm1, %v2529_v36  ;;  %v2527_v44 = vpack.c.bf16 %v1433_v38, %v1433_v38  ;;  %v1438_v45 = vmax.f32 %v1114_v39, 0.0  ;;  %v1106_v46 = vadd.f32 %v3363_v37, %v1105_v43  ;;  %v1361_v47 = vpop.f32.mrf.mxu1 }
 0x14c   : > { %2140 = vst.msk [vmem:[%s3059_s25 + $0x1ec] sm:$0xf] %vm2016_vm1, %v2593_v41  ;;  %v2591_v48 = vpack.c.bf16 %v1497_v1, %v1497_v1  ;;  %v1502_v49 = vmax.f32 %v1370_v42, 0.0  ;;  %v1362_v50 = vadd.f32 %v3363_v37, %v1361_v47  ;;  %v2728_v51 = vpop.f32.mrf.mxu0 }
 0x14d   : > { %2074 = vst.msk [vmem:[%s3059_s25 + $0xe4] sm:$0xf] %vm2016_vm1, %v2527_v44  ;;  %v2532_v52 = vpack.c.bf16 %v1438_v45, %v1438_v45  ;;  %v1436_v53 = vmax.f32 %v1106_v46, 0.0  ;;  %v1117_v54 = vadd.f32 %v3363_v37, %v2728_v51  ;;  %v2792_v55 = vpop.f32.mrf.mxu1 }
 0x14e   : > { %2138 = vst.msk [vmem:[%s3059_s25 + $0x1e4] sm:$0xf] %vm2016_vm1, %v2591_v48  ;;  %v2596_v56 = vpack.c.bf16 %v1502_v49, %v1502_v49  ;;  %v1500_v57 = vmax.f32 %v1362_v50, 0.0  ;;  %v1373_v58 = vadd.f32 %v3363_v37, %v2792_v55  ;;  %v1108_v59 = vpop.f32.mrf.mxu0 }
 0x14f   : > { %2079 = vst.msk [vmem:[%s3059_s25 + $0xf8] sm:$0xf] %vm2016_vm1, %v2532_v52  ;;  %v2530_v60 = vpack.c.bf16 %v1436_v53, %v1436_v53  ;;  %v1439_v61 = vmax.f32 %v1117_v54, 0.0  ;;  %v1109_v62 = vadd.f32 %v3363_v37, %v1108_v59  ;;  %v1364_v63 = vpop.f32.mrf.mxu1 }
 0x150   : > { %2143 = vst.msk [vmem:[%s3059_s25 + $0x1f8] sm:$0xf] %vm2016_vm1, %v2596_v56  ;;  %v2594_v0 = vpack.c.bf16 %v1500_v57, %v1500_v57  ;;  %v1503_v2 = vmax.f32 %v1373_v58, 0.0  ;;  %v1365_v3 = vadd.f32 %v3363_v37, %v1364_v63 }
 0x151   : > { %2077 = vst.msk [vmem:[%s3059_s25 + $0xf0] sm:$0xf] %vm2016_vm1, %v2530_v60  ;;  %v2533_v4 = vpack.c.bf16 %v1439_v61, %v1439_v61  ;;  %v1437_v5 = vmax.f32 %v1109_v62, 0.0 }
 0x152   : > { %2141 = vst.msk [vmem:[%s3059_s25 + $0x1f0] sm:$0xf] %vm2016_vm1, %v2594_v0  ;;  %v2597_v6 = vpack.c.bf16 %v1503_v2, %v1503_v2  ;;  %v1501_v7 = vmax.f32 %v1365_v3, 0.0 }
 0x153   : > { %2080 = vst.msk [vmem:[%s3059_s25 + $0xfc] sm:$0xf] %vm2016_vm1, %v2533_v4  ;;  %v2531_v8 = vpack.c.bf16 %v1437_v5, %v1437_v5 }
 0x154   : > { %2144 = vst.msk [vmem:[%s3059_s25 + $0x1fc] sm:$0xf] %vm2016_vm1, %v2597_v6  ;;  %v2595_v9 = vpack.c.bf16 %v1501_v7, %v1501_v7 }
 0x155   : > { %2078 = vst.msk [vmem:[%s3059_s25 + $0xf4] sm:$0xf] %vm2016_vm1, %v2531_v8 }
 0x156   : > { %2142 = vst.msk [vmem:[%s3059_s25 + $0x1f4] sm:$0xf] %vm2016_vm1, %v2595_v9 }
 0x157 PF: > { %s13_s12 = sadd.s32 1, %s2875_s12  }
 0x158   : > { %p10_p4 = scmp.ge.s32.totalorder %s13_s12, 4  }
 0x15a   :  { %12 = sbr.rel (!%p10_p4) target bundleno = 1 (0x1), region = 62 }

// kernel: encoder_forward.5
= control target key start
LH: loop header
LB: loop body
LE: loop exit
PB: predicated region body
PF: predicated region fallthrough
CT: control target
= control target key end

     0   :  { %s1032_s12 = smov 0   ;;  %s1201_s0 = inlined_call_operand.vmem [shape: bf16[512,128], index: 0, kind: input, shape index: {}]   ;;  %s1202_s1 = inlined_call_operand.vmem [shape: bf16[128,8], index: 1, kind: input, shape index: {}]   ;;  %s1203_s2 = inlined_call_operand.vmem [shape: f32[1,8], index: 2, kind: input, shape index: {}]   ;;  %s1204_s3 = inlined_call_operand.vmem [shape: bf16[512,8], index: 3, kind: output, shape index: {}]  }
   0x1 LB: > { %s784_s13 = sadd.s32 4294967295, %s1010_s12   ;;  %p788_p0 = scmp.ge.s32.totalorder %s1010_s12, 1  ;;  %s1010_s12 = sphi %s1032_s12, %s13_s12  }
   0x2   : > { %p138_p1 = scmp.lt.s32.totalorder %s1010_s12, 3 }
   0x4   : > { %p139_p2 = pnand %p788_p0, %p138_p1 }
   0x5   : > { %s789_s16 = sshll.u32 (!%p139_p2), %s784_s13, 5 }
   0x6   : > { %142 = sbr.rel (%p139_p2) target bundleno = 275 (0x113), region = 32  ;;  %p163_p3 = scmp.lt.s32.totalorder (!%p139_p2), %s789_s16, 63 }
   0xb   : > { %v980_v0 = vld [vmem:[%s1202_s1 + $0x38] sm:$0xff]   ;;  %v981_v1 = vld [vmem:[%s1202_s1 + $0x30] sm:$0xff]   ;;  %s1206_s16 = smov (!%p163_p3, %s789_s16), 63  ;;  %v982_v2 = vld [vmem:[%s1202_s1 + $0x28] sm:$0xff]   ;;  %vm695_vm0 = vcmask 60416  }
   0xc   : > { %908 = vmatprep.subr.bf16.mxu0 %v980_v0  ;;  %956 = vmatprep.subr.bf16.mxu1 %v980_v0  ;;  %s790_s21 = sshll.u32 %s1206_s16, 2  ;;  %v983_v3 = vld [vmem:[%s1202_s1 + $0x20] sm:$0xff]   ;;  %v984_v6 = vld [vmem:[%s1202_s1 + $0x18] sm:$0xff]   ;;  %v985_v7 = vld [vmem:[%s1202_s1 + $0x10] sm:$0xff]  }
   0xd   : > { %909 = vmatpush3.bf16.msra.mxu0 %v980_v0  ;;  %964 = vmatpush3.bf16.msra.mxu1 %v980_v0  ;;  %s1057_s24 = scalar_lea.vmem %s1201_s0, %s790_s21  ;;  %v986_v8 = vld [vmem:[%s1202_s1 + $0x8] sm:$0xff]   ;;  %v987_v9 = vld [vmem:[%s1202_s1] sm:$0xff]   ;;  %s1104_s13 = scalar_lea.vmem %s1204_s3, %s790_s21 }
   0xe   : > { %910 = vmatprep.subr.bf16.mxu0 %v981_v1  ;;  %957 = vmatprep.subr.bf16.mxu1 %v981_v1  ;;  %v988_v4 = vld [vmem:[%s1057_s24] sm:$0xff]   ;;  %v990_v10 = vld [vmem:[%s1057_s24 + $0x8] sm:$0xff]   ;;  %v992_v12 = vld [vmem:[%s1057_s24 + $0x10] sm:$0xff]  }
   0xf   : > { %v989_v5 = vld [vmem:[%s1057_s24 + $0x40] sm:$0xff]   ;;  %924 = vmatprep.mubr.bf16.mxu0 %v988_v4  ;;  %v991_v11 = vld [vmem:[%s1057_s24 + $0x48] sm:$0xff]   ;;  %v993_v13 = vld [vmem:[%s1057_s24 + $0x50] sm:$0xff]  }
  0x10   : > { %940 = vmatprep.mubr.bf16.mxu1 %v989_v5  ;;  %v994_v14 = vld [vmem:[%s1057_s24 + $0x18] sm:$0xff]   ;;  %v996_v16 = vld [vmem:[%s1057_s24 + $0x20] sm:$0xff]   ;;  %v998_v18 = vld [vmem:[%s1057_s24 + $0x28] sm:$0xff]  }
  0x11   : > { %911 = vmatpush3.bf16.msra.mxu0 %v981_v1  ;;  %965 = vmatpush3.bf16.msra.mxu1 %v981_v1  ;;  %v995_v15 = vld [vmem:[%s1057_s24 + $0x58] sm:$0xff]   ;;  %v997_v17 = vld [vmem:[%s1057_s24 + $0x60] sm:$0xff]   ;;  %v999_v19 = vld [vmem:[%s1057_s24 + $0x68] sm:$0xff]  }
  0x12   : > { %912 = vmatprep.subr.bf16.mxu0 %v982_v2  ;;  %958 = vmatprep.subr.bf16.mxu1 %v982_v2  ;;  %v1000_v20 = vld [vmem:[%s1057_s24 + $0x30] sm:$0xff]   ;;  %v1002_v22 = vld [vmem:[%s1057_s24 + $0x38] sm:$0xff]   ;;  %v1093_v24 = vld [vmem:[%s1203_s2] ss:$0 sm:$0xff] }
  0x13   : > { %v1001_v21 = vld [vmem:[%s1057_s24 + $0x70] sm:$0xff]   ;;  %v1003_v23 = vld [vmem:[%s1057_s24 + $0x78] sm:$0xff]  }
  0x15   : > { %913 = vmatpush3.bf16.msra.mxu0 %v982_v2  ;;  %966 = vmatpush3.bf16.msra.mxu1 %v982_v2 }
  0x16   : > { %914 = vmatprep.subr.bf16.mxu0 %v983_v3  ;;  %959 = vmatprep.subr.bf16.mxu1 %v983_v3 }
  0x19   : > { %915 = vmatpush3.bf16.msra.mxu0 %v983_v3  ;;  %967 = vmatpush3.bf16.msra.mxu1 %v983_v3 }
  0x1a   : > { %916 = vmatprep.subr.bf16.mxu0 %v984_v6  ;;  %960 = vmatprep.subr.bf16.mxu1 %v984_v6 }
  0x1d   : > { %917 = vmatpush3.bf16.msra.mxu0 %v984_v6  ;;  %968 = vmatpush3.bf16.msra.mxu1 %v984_v6 }
  0x1e   : > { %918 = vmatprep.subr.bf16.mxu0 %v985_v7  ;;  %961 = vmatprep.subr.bf16.mxu1 %v985_v7 }
  0x21   : > { %919 = vmatpush3.bf16.msra.mxu0 %v985_v7  ;;  %969 = vmatpush3.bf16.msra.mxu1 %v985_v7 }
  0x22   : > { %920 = vmatprep.subr.bf16.mxu0 %v986_v8  ;;  %962 = vmatprep.subr.bf16.mxu1 %v986_v8 }
  0x25   : > { %921 = vmatpush3.bf16.msra.mxu0 %v986_v8  ;;  %970 = vmatpush3.bf16.msra.mxu1 %v986_v8 }
  0x26   : > { %922 = vmatprep.subr.bf16.mxu0 %v987_v9  ;;  %963 = vmatprep.subr.bf16.mxu1 %v987_v9 }
  0x29   : > { %923 = vmatpush3.bf16.msra.mxu0 %v987_v9  ;;  %971 = vmatpush3.bf16.msra.mxu1 %v987_v9 }
  0x2c   : > { %925 = vmatmul.mubr.bf16.vlgmr.msra.gmra.mxu0 %v990_v10  ;;  %941 = vmatmul.mubr.bf16.vlgmr.msra.gmra.mxu1 %v991_v11 }
  0x2d   : > { %928 = vmatprep.mubr.bf16.mxu0 %v992_v12  ;;  %944 = vmatprep.mubr.bf16.mxu1 %v993_v13 }
  0x34   : > { %929 = vmatmul.mubr.bf16.gmra.mxu0 %v994_v14  ;;  %945 = vmatmul.mubr.bf16.gmra.mxu1 %v995_v15 }
  0x35   : > { %932 = vmatprep.mubr.bf16.mxu0 %v996_v16  ;;  %948 = vmatprep.mubr.bf16.mxu1 %v997_v17 }
  0x3c   : > { %933 = vmatmul.mubr.bf16.gmra.mxu0 %v998_v18  ;;  %949 = vmatmul.mubr.bf16.gmra.mxu1 %v999_v19 }
  0x3d   : > { %936 = vmatprep.mubr.bf16.mxu0 %v1000_v20  ;;  %952 = vmatprep.mubr.bf16.mxu1 %v1001_v21 }
  0x44   : > { %937 = vmatmul.mubr.bf16.gmra.mxu0 %v1002_v22  ;;  %953 = vmatmul.mubr.bf16.gmra.mxu1 %v1003_v23 }
  0xec   : > { %v926_v25 = vpop.f32.mrf.mxu0  ;;  %v942_v26 = vpop.f32.mrf.mxu1 }
  0xed   : > { %v417_v27 = vadd.f32 %v926_v25, %v1093_v24  ;;  %v481_v28 = vadd.f32 %v942_v26, %v1093_v24 }
  0xee   : > { %v408_v29 = vpop.f32.mrf.mxu0  ;;  %v472_v30 = vpop.f32.mrf.mxu1 }
  0xef   : > { %v537_v31 = vmax.f32 %v417_v27, 0.0  ;;  %v553_v32 = vmax.f32 %v481_v28, 0.0  ;;  %v409_v33 = vadd.f32 %v1093_v24, %v408_v29  ;;  %v473_v34 = vadd.f32 %v1093_v24, %v472_v30 }
  0xf0   : > { %v927_v35 = vpop.f32.mrf.mxu0  ;;  %v943_v36 = vpop.f32.mrf.mxu1 }
  0xf1   : > { %v854_v37 = vpack.c.bf16 %v537_v31, %v537_v31  ;;  %v870_v38 = vpack.c.bf16 %v553_v32, %v553_v32  ;;  %v535_v39 = vmax.f32 %v409_v33, 0.0  ;;  %v551_v40 = vmax.f32 %v473_v34, 0.0 }
  0xf2   : > { %v420_v41 = vadd.f32 %v927_v35, %v1093_v24  ;;  %v484_v42 = vadd.f32 %v943_v36, %v1093_v24  ;;  %v411_v43 = vpop.f32.mrf.mxu0  ;;  %v475_v44 = vpop.f32.mrf.mxu1 }
  0xf3   : > { %698 = vst.msk [vmem:[%s1104_s13 + $0x8] sm:$0xf] %vm695_vm0, %v854_v37  ;;  %714 = vst.msk [vmem:[%s1104_s13 + $0x48] sm:$0xf] %vm695_vm0, %v870_v38  ;;  %v852_v45 = vpack.c.bf16 %v535_v39, %v535_v39  ;;  %v868_v46 = vpack.c.bf16 %v551_v40, %v551_v40  ;;  %v412_v47 = vadd.f32 %v1093_v24, %v411_v43 }
  0xf4   : > { %v476_v48 = vadd.f32 %v1093_v24, %v475_v44  ;;  %v538_v49 = vmax.f32 %v420_v41, 0.0  ;;  %v554_v50 = vmax.f32 %v484_v42, 0.0  ;;  %v930_v51 = vpop.f32.mrf.mxu0  ;;  %v946_v52 = vpop.f32.mrf.mxu1 }
  0xf5   : > { %696 = vst.msk [vmem:[%s1104_s13] sm:$0xf] %vm695_vm0, %v852_v45  ;;  %712 = vst.msk [vmem:[%s1104_s13 + $0x40] sm:$0xf] %vm695_vm0, %v868_v46  ;;  %v536_v53 = vmax.f32 %v412_v47, 0.0  ;;  %v433_v55 = vadd.f32 %v930_v51, %v1093_v24  ;;  %v497_v56 = vadd.f32 %v946_v52, %v1093_v24 }
  0xf6   : > { %v552_v54 = vmax.f32 %v476_v48, 0.0  ;;  %v855_v57 = vpack.c.bf16 %v538_v49, %v538_v49  ;;  %v871_v58 = vpack.c.bf16 %v554_v50, %v554_v50  ;;  %v424_v59 = vpop.f32.mrf.mxu0  ;;  %v488_v60 = vpop.f32.mrf.mxu1 }
  0xf7   : > { %v853_v61 = vpack.c.bf16 %v536_v53, %v536_v53  ;;  %v541_v63 = vmax.f32 %v433_v55, 0.0  ;;  %v557_v0 = vmax.f32 %v497_v56, 0.0  ;;  %v425_v1 = vadd.f32 %v1093_v24, %v424_v59 }
  0xf8   : > { %v869_v62 = vpack.c.bf16 %v552_v54, %v552_v54  ;;  %699 = vst.msk [vmem:[%s1104_s13 + $0xc] sm:$0xf] %vm695_vm0, %v855_v57  ;;  %715 = vst.msk [vmem:[%s1104_s13 + $0x4c] sm:$0xf] %vm695_vm0, %v871_v58  ;;  %v489_v2 = vadd.f32 %v1093_v24, %v488_v60  ;;  %v931_v3 = vpop.f32.mrf.mxu0  ;;  %v947_v4 = vpop.f32.mrf.mxu1 }
  0xf9   : > { %697 = vst.msk [vmem:[%s1104_s13 + $0x4] sm:$0xf] %vm695_vm0, %v853_v61  ;;  %v858_v5 = vpack.c.bf16 %v541_v63, %v541_v63  ;;  %v874_v6 = vpack.c.bf16 %v557_v0, %v557_v0  ;;  %v436_v7 = vadd.f32 %v931_v3, %v1093_v24  ;;  %v500_v8 = vadd.f32 %v947_v4, %v1093_v24 }
  0xfa   : > { %713 = vst.msk [vmem:[%s1104_s13 + $0x44] sm:$0xf] %vm695_vm0, %v869_v62  ;;  %v539_v9 = vmax.f32 %v425_v1, 0.0  ;;  %v555_v10 = vmax.f32 %v489_v2, 0.0  ;;  %v427_v11 = vpop.f32.mrf.mxu0  ;;  %v491_v12 = vpop.f32.mrf.mxu1 }
  0xfb   : > { %702 = vst.msk [vmem:[%s1104_s13 + $0x18] sm:$0xf] %vm695_vm0, %v858_v5  ;;  %718 = vst.msk [vmem:[%s1104_s13 + $0x58] sm:$0xf] %vm695_vm0, %v874_v6  ;;  %v542_v13 = vmax.f32 %v436_v7, 0.0  ;;  %v558_v14 = vmax.f32 %v500_v8, 0.0  ;;  %v428_v15 = vadd.f32 %v1093_v24, %v427_v11  ;;  %v492_v16 = vadd.f32 %v1093_v24, %v491_v12 }
  0xfc   : > { %v856_v17 = vpack.c.bf16 %v539_v9, %v539_v9  ;;  %v872_v18 = vpack.c.bf16 %v555_v10, %v555_v10  ;;  %v934_v19 = vpop.f32.mrf.mxu0  ;;  %v950_v20 = vpop.f32.mrf.mxu1 }
  0xfd   : > { %v859_v21 = vpack.c.bf16 %v542_v13, %v542_v13  ;;  %v875_v22 = vpack.c.bf16 %v558_v14, %v558_v14  ;;  %v540_v23 = vmax.f32 %v428_v15, 0.0  ;;  %v556_v25 = vmax.f32 %v492_v16, 0.0 }
  0xfe   : > { %700 = vst.msk [vmem:[%s1104_s13 + $0x10] sm:$0xf] %vm695_vm0, %v856_v17  ;;  %716 = vst.msk [vmem:[%s1104_s13 + $0x50] sm:$0xf] %vm695_vm0, %v872_v18  ;;  %v449_v26 = vadd.f32 %v934_v19, %v1093_v24  ;;  %v513_v27 = vadd.f32 %v950_v20, %v1093_v24  ;;  %v440_v28 = vpop.f32.mrf.mxu0  ;;  %v504_v29 = vpop.f32.mrf.mxu1 }
  0xff   : > { %703 = vst.msk [vmem:[%s1104_s13 + $0x1c] sm:$0xf] %vm695_vm0, %v859_v21  ;;  %719 = vst.msk [vmem:[%s1104_s13 + $0x5c] sm:$0xf] %vm695_vm0, %v875_v22  ;;  %v857_v30 = vpack.c.bf16 %v540_v23, %v540_v23  ;;  %v873_v31 = vpack.c.bf16 %v556_v25, %v556_v25  ;;  %v441_v32 = vadd.f32 %v1093_v24, %v440_v28 }
 0x100   : > { %v505_v33 = vadd.f32 %v1093_v24, %v504_v29  ;;  %v545_v34 = vmax.f32 %v449_v26, 0.0  ;;  %v561_v35 = vmax.f32 %v513_v27, 0.0  ;;  %v935_v36 = vpop.f32.mrf.mxu0  ;;  %v951_v37 = vpop.f32.mrf.mxu1 }
 0x101   : > { %701 = vst.msk [vmem:[%s1104_s13 + $0x14] sm:$0xf] %vm695_vm0, %v857_v30  ;;  %717 = vst.msk [vmem:[%s1104_s13 + $0x54] sm:$0xf] %vm695_vm0, %v873_v31  ;;  %v543_v38 = vmax.f32 %v441_v32, 0.0  ;;  %v452_v40 = vadd.f32 %v935_v36, %v1093_v24  ;;  %v516_v41 = vadd.f32 %v951_v37, %v1093_v24 }
 0x102   : > { %v559_v39 = vmax.f32 %v505_v33, 0.0  ;;  %v862_v42 = vpack.c.bf16 %v545_v34, %v545_v34  ;;  %v878_v43 = vpack.c.bf16 %v561_v35, %v561_v35  ;;  %v443_v44 = vpop.f32.mrf.mxu0  ;;  %v507_v45 = vpop.f32.mrf.mxu1 }
 0x103   : > { %v860_v46 = vpack.c.bf16 %v543_v38, %v543_v38  ;;  %v546_v48 = vmax.f32 %v452_v40, 0.0  ;;  %v562_v49 = vmax.f32 %v516_v41, 0.0  ;;  %v444_v50 = vadd.f32 %v1093_v24, %v443_v44 }
 0x104   : > { %v876_v47 = vpack.c.bf16 %v559_v39, %v559_v39  ;;  %706 = vst.msk [vmem:[%s1104_s13 + $0x28] sm:$0xf] %vm695_vm0, %v862_v42  ;;  %722 = vst.msk [vmem:[%s1104_s13 + $0x68] sm:$0xf] %vm695_vm0, %v878_v43  ;;  %v508_v51 = vadd.f32 %v1093_v24, %v507_v45  ;;  %v938_v52 = vpop.f32.mrf.mxu0  ;;  %v954_v53 = vpop.f32.mrf.mxu1 }
 0x105   : > { %704 = vst.msk [vmem:[%s1104_s13 + $0x20] sm:$0xf] %vm695_vm0, %v860_v46  ;;  %v863_v54 = vpack.c.bf16 %v546_v48, %v546_v48  ;;  %v879_v55 = vpack.c.bf16 %v562_v49, %v562_v49  ;;  %v465_v56 = vadd.f32 %v938_v52, %v1093_v24  ;;  %v529_v57 = vadd.f32 %v954_v53, %v1093_v24 }
 0x106   : > { %720 = vst.msk [vmem:[%s1104_s13 + $0x60] sm:$0xf] %vm695_vm0, %v876_v47  ;;  %v544_v58 = vmax.f32 %v444_v50, 0.0  ;;  %v560_v59 = vmax.f32 %v508_v51, 0.0  ;;  %v456_v60 = vpop.f32.mrf.mxu0  ;;  %v520_v61 = vpop.f32.mrf.mxu1 }
 0x107   : > { %707 = vst.msk [vmem:[%s1104_s13 + $0x2c] sm:$0xf] %vm695_vm0, %v863_v54  ;;  %723 = vst.msk [vmem:[%s1104_s13 + $0x6c] sm:$0xf] %vm695_vm0, %v879_v55  ;;  %v549_v62 = vmax.f32 %v465_v56, 0.0  ;;  %v565_v63 = vmax.f32 %v529_v57, 0.0  ;;  %v457_v0 = vadd.f32 %v1093_v24, %v456_v60  ;;  %v521_v1 = vadd.f32 %v1093_v24, %v520_v61 }
 0x108   : > { %v861_v2 = vpack.c.bf16 %v544_v58, %v544_v58  ;;  %v877_v3 = vpack.c.bf16 %v560_v59, %v560_v59  ;;  %v939_v4 = vpop.f32.mrf.mxu0  ;;  %v955_v5 = vpop.f32.mrf.mxu1 }
 0x109   : > { %v866_v6 = vpack.c.bf16 %v549_v62, %v549_v62  ;;  %v882_v7 = vpack.c.bf16 %v565_v63, %v565_v63  ;;  %v547_v8 = vmax.f32 %v457_v0, 0.0  ;;  %v563_v9 = vmax.f32 %v521_v1, 0.0 }
 0x10a   : > { %705 = vst.msk [vmem:[%s1104_s13 + $0x24] sm:$0xf] %vm695_vm0, %v861_v2  ;;  %721 = vst.msk [vmem:[%s1104_s13 + $0x64] sm:$0xf] %vm695_vm0, %v877_v3  ;;  %v468_v10 = vadd.f32 %v939_v4, %v1093_v24  ;;  %v532_v11 = vadd.f32 %v955_v5, %v1093_v24  ;;  %v459_v12 = vpop.f32.mrf.mxu0  ;;  %v523_v13 = vpop.f32.mrf.mxu1 }
 0x10b   : > { %710 = vst.msk [vmem:[%s1104_s13 + $0x38] sm:$0xf] %vm695_vm0, %v866_v6  ;;  %726 = vst.msk [vmem:[%s1104_s13 + $0x78] sm:$0xf] %vm695_vm0, %v882_v7  ;;  %v864_v14 = vpack.c.bf16 %v547_v8, %v547_v8  ;;  %v880_v15 = vpack.c.bf16 %v563_v9, %v563_v9  ;;  %v460_v16 = vadd.f32 %v1093_v24, %v459_v12 }
 0x10c   : > { %v524_v17 = vadd.f32 %v1093_v24, %v523_v13  ;;  %v550_v18 = vmax.f32 %v468_v10, 0.0  ;;  %v566_v19 = vmax.f32 %v532_v11, 0.0 }
 0x10d   : > { %708 = vst.msk [vmem:[%s1104_s13 + $0x30] sm:$0xf] %vm695_vm0, %v864_v14  ;;  %724 = vst.msk [vmem:[%s1104_s13 + $0x70] sm:$0xf] %vm695_vm0, %v880_v15  ;;  %v548_v20 = vmax.f32 %v460_v16, 0.0 }
 0x10e   : > { %v564_v21 = vmax.f32 %v524_v17, 0.0  ;;  %v867_v22 = vpack.c.bf16 %v550_v18, %v550_v18  ;;  %v883_v23 = vpack.c.bf16 %v566_v19, %v566_v19 }
 0x10f   : > { %v865_v25 = vpack.c.bf16 %v548_v20, %v548_v20 }
 0x110   : > { %v881_v26 = vpack.c.bf16 %v564_v21, %v564_v21  ;;  %711 = vst.msk [vmem:[%s1104_s13 + $0x3c] sm:$0xf] %vm695_vm0, %v867_v22  ;;  %727 = vst.msk [vmem:[%s1104_s13 + $0x7c] sm:$0xf] %vm695_vm0, %v883_v23 }
 0x111   : > { %709 = vst.msk [vmem:[%s1104_s13 + $0x34] sm:$0xf] %vm695_vm0, %v865_v25 }
 0x112   : > { %725 = vst.msk [vmem:[%s1104_s13 + $0x74] sm:$0xf] %vm695_vm0, %v881_v26 }
 0x113 PF: > { %s13_s12 = sadd.s32 1, %s1010_s12  }
 0x114   : > { %p10_p4 = scmp.ge.s32.totalorder %s13_s12, 4  }
 0x116   :  { %12 = sbr.rel (!%p10_p4) target bundleno = 1 (0x1), region = 62 }

// kernel: encoder_forward.6
= control target key start
LH: loop header
LB: loop body
LE: loop exit
PB: predicated region body
PF: predicated region fallthrough
CT: control target
= control target key end

     0   :  { %s588_s12 = smov 0   ;;  %s663_s0 = inlined_call_operand.vmem [shape: bf16[128,128], index: 0, kind: input, shape index: {}]   ;;  %s664_s1 = inlined_call_operand.vmem [shape: bf16[128,16], index: 1, kind: input, shape index: {}]   ;;  %s665_s2 = inlined_call_operand.vmem [shape: f32[1,16], index: 2, kind: input, shape index: {}]   ;;  %s666_s3 = inlined_call_operand.vmem [shape: bf16[128,16], index: 3, kind: output, shape index: {}]  }
   0x1 LB: > { %s448_s13 = sadd.s32 4294967295, %s566_s12   ;;  %p452_p0 = scmp.ge.s32.totalorder %s566_s12, 1  ;;  %s566_s12 = sphi %s588_s12, %s13_s12  }
   0x2   : > { %p138_p1 = scmp.lt.s32.totalorder %s566_s12, 3 }
   0x4   : > { %p139_p2 = pnand %p452_p0, %p138_p1 }
   0x5   : > { %s453_s16 = sshll.u32 (!%p139_p2), %s448_s13, 3 }
   0x6   : > { %142 = sbr.rel (%p139_p2) target bundleno = 251 (0xfb), region = 32  ;;  %p163_p3 = scmp.lt.s32.totalorder (!%p139_p2), %s453_s16, 15 }
   0xb   : > { %v548_v0 = vld [vmem:[%s664_s1 + $0x38] sm:$0xff]   ;;  %v549_v1 = vld [vmem:[%s664_s1 + $0x30] sm:$0xff]   ;;  %s668_s16 = smov (!%p163_p3, %s453_s16), 15  ;;  %v550_v2 = vld [vmem:[%s664_s1 + $0x28] sm:$0xff]   ;;  %vm383_vm0 = vcmask 125952  }
   0xc   : > { %500 = vmatprep.subr.bf16.mxu0 %v548_v0  ;;  %524 = vmatprep.subr.bf16.mxu1 %v548_v0  ;;  %s454_s21 = sshll.u32 %s668_s16, 2  ;;  %v551_v3 = vld [vmem:[%s664_s1 + $0x20] sm:$0xff]   ;;  %v552_v6 = vld [vmem:[%s664_s1 + $0x18] sm:$0xff]   ;;  %v553_v7 = vld [vmem:[%s664_s1 + $0x10] sm:$0xff]  }
   0xd   : > { %501 = vmatpush3.bf16.msra.mxu0 %v548_v0  ;;  %532 = vmatpush3.bf16.msra.mxu1 %v548_v0  ;;  %s613_s24 = scalar_lea.vmem %s663_s0, %s454_s21  ;;  %v554_v8 = vld [vmem:[%s664_s1 + $0x8] sm:$0xff]   ;;  %v555_v9 = vld [vmem:[%s664_s1] sm:$0xff]   ;;  %s642_s13 = scalar_lea.vmem %s666_s3, %s454_s21 }
   0xe   : > { %502 = vmatprep.subr.bf16.mxu0 %v549_v1  ;;  %525 = vmatprep.subr.bf16.mxu1 %v549_v1  ;;  %v556_v4 = vld [vmem:[%s613_s24] sm:$0xff]   ;;  %v557_v5 = vld [vmem:[%s613_s24 + $0x10] sm:$0xff]   ;;  %v558_v10 = vld [vmem:[%s613_s24 + $0x8] sm:$0xff]  }
   0xf   : > { %516 = vmatprep.mubr.bf16.mxu0 %v556_v4  ;;  %520 = vmatprep.mubr.bf16.mxu1 %v557_v5  ;;  %v559_v11 = vld [vmem:[%s613_s24 + $0x18] sm:$0xff]   ;;  %v457_v12 = vld [vmem:[%s665_s2] ss:$0 sm:$0xff] }
  0x11   : > { %503 = vmatpush3.bf16.msra.mxu0 %v549_v1  ;;  %533 = vmatpush3.bf16.msra.mxu1 %v549_v1 }
  0x12   : > { %504 = vmatprep.subr.bf16.mxu0 %v550_v2  ;;  %526 = vmatprep.subr.bf16.mxu1 %v550_v2 }
  0x15   : > { %505 = vmatpush3.bf16.msra.mxu0 %v550_v2  ;;  %534 = vmatpush3.bf16.msra.mxu1 %v550_v2 }
  0x16   : > { %506 = vmatprep.subr.bf16.mxu0 %v551_v3  ;;  %527 = vmatprep.subr.bf16.mxu1 %v551_v3 }
  0x19   : > { %507 = vmatpush3.bf16.msra.mxu0 %v551_v3  ;;  %535 = vmatpush3.bf16.msra.mxu1 %v551_v3 }
  0x1a   : > { %508 = vmatprep.subr.bf16.mxu0 %v552_v6  ;;  %528 = vmatprep.subr.bf16.mxu1 %v552_v6 }
  0x1d   : > { %509 = vmatpush3.bf16.msra.mxu0 %v552_v6  ;;  %536 = vmatpush3.bf16.msra.mxu1 %v552_v6 }
  0x1e   : > { %510 = vmatprep.subr.bf16.mxu0 %v553_v7  ;;  %529 = vmatprep.subr.bf16.mxu1 %v553_v7 }
  0x21   : > { %511 = vmatpush3.bf16.msra.mxu0 %v553_v7  ;;  %537 = vmatpush3.bf16.msra.mxu1 %v553_v7 }
  0x22   : > { %512 = vmatprep.subr.bf16.mxu0 %v554_v8  ;;  %530 = vmatprep.subr.bf16.mxu1 %v554_v8 }
  0x25   : > { %513 = vmatpush3.bf16.msra.mxu0 %v554_v8  ;;  %538 = vmatpush3.bf16.msra.mxu1 %v554_v8 }
  0x26   : > { %514 = vmatprep.subr.bf16.mxu0 %v555_v9  ;;  %531 = vmatprep.subr.bf16.mxu1 %v555_v9 }
  0x29   : > { %515 = vmatpush3.bf16.msra.mxu0 %v555_v9  ;;  %539 = vmatpush3.bf16.msra.mxu1 %v555_v9 }
  0x2c   : > { %517 = vmatmul.mubr.bf16.vlgmr.msra.gmra.mxu0 %v558_v10  ;;  %521 = vmatmul.mubr.bf16.vlgmr.msra.gmra.mxu1 %v559_v11 }
  0xec   : > { %v518_v13 = vpop.f32.mrf.mxu0  ;;  %v522_v14 = vpop.f32.mrf.mxu1 }
  0xed   : > { %v321_v15 = vadd.f32 %v518_v13, %v457_v12  ;;  %v337_v16 = vadd.f32 %v522_v14, %v457_v12 }
  0xee   : > { %v312_v17 = vpop.f32.mrf.mxu0  ;;  %v328_v18 = vpop.f32.mrf.mxu1 }
  0xef   : > { %v345_v19 = vmax.f32 %v321_v15, 0.0  ;;  %v349_v20 = vmax.f32 %v337_v16, 0.0  ;;  %v313_v21 = vadd.f32 %v457_v12, %v312_v17  ;;  %v329_v22 = vadd.f32 %v457_v12, %v328_v18 }
  0xf0   : > { %v519_v23 = vpop.f32.mrf.mxu0  ;;  %v523_v24 = vpop.f32.mrf.mxu1 }
  0xf1   : > { %v482_v25 = vpack.c.bf16 %v345_v19, %v345_v19  ;;  %v486_v26 = vpack.c.bf16 %v349_v20, %v349_v20  ;;  %v343_v27 = vmax.f32 %v313_v21, 0.0  ;;  %v347_v28 = vmax.f32 %v329_v22, 0.0 }
  0xf2   : > { %v324_v29 = vadd.f32 %v519_v23, %v457_v12  ;;  %v340_v30 = vadd.f32 %v523_v24, %v457_v12  ;;  %v315_v31 = vpop.f32.mrf.mxu0  ;;  %v331_v32 = vpop.f32.mrf.mxu1 }
  0xf3   : > { %386 = vst.msk [vmem:[%s642_s13 + $0x8] sm:$0xf] %vm383_vm0, %v482_v25  ;;  %390 = vst.msk [vmem:[%s642_s13 + $0x18] sm:$0xf] %vm383_vm0, %v486_v26  ;;  %v480_v33 = vpack.c.bf16 %v343_v27, %v343_v27  ;;  %v484_v34 = vpack.c.bf16 %v347_v28, %v347_v28  ;;  %v316_v35 = vadd.f32 %v457_v12, %v315_v31 }
  0xf4   : > { %v332_v36 = vadd.f32 %v457_v12, %v331_v32  ;;  %v346_v37 = vmax.f32 %v324_v29, 0.0  ;;  %v350_v38 = vmax.f32 %v340_v30, 0.0 }
  0xf5   : > { %384 = vst.msk [vmem:[%s642_s13] sm:$0xf] %vm383_vm0, %v480_v33  ;;  %388 = vst.msk [vmem:[%s642_s13 + $0x10] sm:$0xf] %vm383_vm0, %v484_v34  ;;  %v344_v39 = vmax.f32 %v316_v35, 0.0 }
  0xf6   : > { %v348_v40 = vmax.f32 %v332_v36, 0.0  ;;  %v483_v41 = vpack.c.bf16 %v346_v37, %v346_v37  ;;  %v487_v42 = vpack.c.bf16 %v350_v38, %v350_v38 }
  0xf7   : > { %v481_v43 = vpack.c.bf16 %v344_v39, %v344_v39 }
  0xf8   : > { %v485_v44 = vpack.c.bf16 %v348_v40, %v348_v40  ;;  %387 = vst.msk [vmem:[%s642_s13 + $0xc] sm:$0xf] %vm383_vm0, %v483_v41  ;;  %391 = vst.msk [vmem:[%s642_s13 + $0x1c] sm:$0xf] %vm383_vm0, %v487_v42 }
  0xf9   : > { %385 = vst.msk [vmem:[%s642_s13 + $0x4] sm:$0xf] %vm383_vm0, %v481_v43 }
  0xfa   : > { %389 = vst.msk [vmem:[%s642_s13 + $0x14] sm:$0xf] %vm383_vm0, %v485_v44 }
  0xfb PF: > { %s13_s12 = sadd.s32 1, %s566_s12  }
  0xfc   : > { %p10_p4 = scmp.ge.s32.totalorder %s13_s12, 4  }
  0xfe   :  { %12 = sbr.rel (!%p10_p4) target bundleno = 1 (0x1), region = 62 }

// kernel: encoder_forward.7
= control target key start
LH: loop header
LB: loop body
LE: loop exit
PB: predicated region body
PF: predicated region fallthrough
CT: control target
= control target key end

     0   :  { %s4118_s30 = smov 0   ;;  %s5295_s0 = inlined_call_operand.vmem [shape: bf16[16,1024], index: 0, kind: input, shape index: {}]   ;;  %s5296_s1 = inlined_call_operand.vmem [shape: bf16[1024,512], index: 1, kind: input, shape index: {}]   ;;  %s5297_s2 = inlined_call_operand.vmem [shape: f32[1,512], index: 2, kind: input, shape index: {}]   ;;  %s5298_s3 = inlined_call_operand.vmem [shape: bf16[512,256], index: 3, kind: input, shape index: {}]   ;;  %s5299_s4 = inlined_call_operand.vmem [shape: f32[1,256], index: 4, kind: input, shape index: {}]   ;;  %s5300_s5 = inlined_call_operand.vmem [shape: bf16[256,128], index: 5, kind: input, shape index: {}]   ;;  %s5301_s6 = inlined_call_operand.vmem [shape: f32[1,128], index: 6, kind: input, shape index: {}]   ;;  %s5302_s7 = inlined_call_operand.vmem [shape: bf16[128,256], index: 7, kind: input, shape index: {}]   ;;  %s5303_s8 = inlined_call_operand.vmem [shape: f32[1,256], index: 8, kind: input, shape index: {}]   ;;  %s5304_s9 = inlined_call_operand.vmem [shape: f32[16,256], index: 9, kind: output, shape index: {}]  }
   0x1 LB: > { %s3126_s10 = sadd.s32 4294967295, %s4065_s30   ;;  %p3130_p0 = scmp.ge.s32.totalorder %s4065_s30, 1  ;;  %s4065_s30 = sphi %s4118_s30, %s19_s30  }
   0x2   : > { %p287_p1 = scmp.lt.s32.totalorder %s4065_s30, 3 }
   0x4   : > { %p288_p2 = pnand %p3130_p0, %p287_p1 }
   0x5   : > { %p323_p3 = scmp.lt.s32.totalorder (!%p288_p2), %s3126_s10, 1 }
   0x6   : > { %291 = sbr.rel (%p288_p2) target bundleno = 1076 (0x434), region = 56 }
   0xb   : > { %v3531_v0 = vld [vmem:[%s5296_s1 + $0xe4] ss:$16 sps:$4 sm:$0xff]   ;;  %v3535_v2 = vld [vmem:[%s5296_s1 + $0xe0] ss:$16 sps:$4 sm:$0xff]   ;;  %s5306_s10 = smov (!%p323_p3, %s3126_s10), 1 }
   0xc   : > { %v3533_v1 = vld [vmem:[%s5296_s1 + $0x2e4] ss:$16 sps:$4 sm:$0xff]   ;;  %1924 = vmatprep.subr.bf16.mxu0 %v3531_v0  ;;  %v3536_v3 = vld [vmem:[%s5296_s1 + $0x2e0] ss:$16 sps:$4 sm:$0xff]   ;;  %s3498_s17 = sshll.u32 %s5306_s10, 5  ;;  %s3499_s29 = sshll.u32 %s5306_s10, 4 }
   0xd   : > { %1965 = vmatprep.subr.bf16.mxu1 %v3533_v1  ;;  %v3537_v4 = vld [vmem:[%s5296_s1 + $0xc4] ss:$16 sps:$4 sm:$0xff]   ;;  %1925 = vmatpush1.bf16.msra.mxu0 %v3535_v2  ;;  %v3541_v6 = vld [vmem:[%s5296_s1 + $0xc0] ss:$16 sps:$4 sm:$0xff]   ;;  %s4268_s26 = scalar_lea.vmem %s5295_s0, %s3498_s17  ;;  %s332_s13 = scalar_lea.vmem %s5304_s9, %s3499_s29 }
   0xe   : > { %1966 = vmatpush1.bf16.msra.mxu1 %v3536_v3  ;;  %v3539_v5 = vld [vmem:[%s5296_s1 + $0x2c4] ss:$16 sps:$4 sm:$0xff]   ;;  %1926 = vmatprep.subr.bf16.mxu0 %v3537_v4  ;;  %v3542_v7 = vld [vmem:[%s5296_s1 + $0x2c0] ss:$16 sps:$4 sm:$0xff]   ;;  %v335_v48 = vld [vmem:[%s4268_s26 + $0x8] sm:$0xff] }
   0xf   : > { %1967 = vmatprep.subr.bf16.mxu1 %v3539_v5  ;;  %v3543_v8 = vld [vmem:[%s5296_s1 + $0xa4] ss:$16 sps:$4 sm:$0xff]   ;;  %v3547_v10 = vld [vmem:[%s5296_s1 + $0xa0] ss:$16 sps:$4 sm:$0xff]   ;;  %v4286_v51 = vcombine.high %v335_v48, %v335_v48 }
  0x10   : > { %v3545_v9 = vld [vmem:[%s5296_s1 + $0x2a4] ss:$16 sps:$4 sm:$0xff]   ;;  %v3548_v11 = vld [vmem:[%s5296_s1 + $0x2a0] ss:$16 sps:$4 sm:$0xff]  }
  0x11   : > { %1927 = vmatpush1.bf16.msra.mxu0 %v3541_v6  ;;  %v3549_v12 = vld [vmem:[%s5296_s1 + $0x84] ss:$16 sps:$4 sm:$0xff]   ;;  %v3553_v14 = vld [vmem:[%s5296_s1 + $0x80] ss:$16 sps:$4 sm:$0xff]   ;;  %1997 = vmatprep.mubr.bf16.mxu1 %v4286_v51 }
  0x12   : > { %1968 = vmatpush1.bf16.msra.mxu1 %v3542_v7  ;;  %1928 = vmatprep.subr.bf16.mxu0 %v3543_v8  ;;  %v3551_v13 = vld [vmem:[%s5296_s1 + $0x284] ss:$16 sps:$4 sm:$0xff]   ;;  %v3554_v15 = vld [vmem:[%s5296_s1 + $0x280] ss:$16 sps:$4 sm:$0xff]   ;;  %v4346_v7 = vcombine.low %v335_v48, %v335_v48 }
  0x13   : > { %1969 = vmatprep.subr.bf16.mxu1 %v3545_v9  ;;  %v3555_v16 = vld [vmem:[%s5296_s1 + $0x64] ss:$16 sps:$4 sm:$0xff]   ;;  %v3559_v18 = vld [vmem:[%s5296_s1 + $0x60] ss:$16 sps:$4 sm:$0xff]  }
  0x14   : > { %v3557_v17 = vld [vmem:[%s5296_s1 + $0x264] ss:$16 sps:$4 sm:$0xff]   ;;  %v3560_v19 = vld [vmem:[%s5296_s1 + $0x260] ss:$16 sps:$4 sm:$0xff]  }
  0x15   : > { %1929 = vmatpush1.bf16.msra.mxu0 %v3547_v10  ;;  %v3561_v20 = vld [vmem:[%s5296_s1 + $0x44] ss:$16 sps:$4 sm:$0xff]   ;;  %v3565_v22 = vld [vmem:[%s5296_s1 + $0x40] ss:$16 sps:$4 sm:$0xff]  }
  0x16   : > { %1970 = vmatpush1.bf16.msra.mxu1 %v3548_v11  ;;  %1930 = vmatprep.subr.bf16.mxu0 %v3549_v12  ;;  %v3563_v21 = vld [vmem:[%s5296_s1 + $0x244] ss:$16 sps:$4 sm:$0xff]   ;;  %v3566_v23 = vld [vmem:[%s5296_s1 + $0x240] ss:$16 sps:$4 sm:$0xff]  }
  0x17   : > { %1971 = vmatprep.subr.bf16.mxu1 %v3551_v13  ;;  %v3567_v24 = vld [vmem:[%s5296_s1 + $0x24] ss:$16 sps:$4 sm:$0xff]   ;;  %v3571_v26 = vld [vmem:[%s5296_s1 + $0x20] ss:$16 sps:$4 sm:$0xff]  }
  0x18   : > { %v3569_v25 = vld [vmem:[%s5296_s1 + $0x224] ss:$16 sps:$4 sm:$0xff]   ;;  %v3572_v27 = vld [vmem:[%s5296_s1 + $0x220] ss:$16 sps:$4 sm:$0xff]  }
  0x19   : > { %1931 = vmatpush1.bf16.msra.mxu0 %v3553_v14  ;;  %v3573_v28 = vld [vmem:[%s5296_s1 + $0x4] ss:$16 sps:$4 sm:$0xff]   ;;  %v3577_v30 = vld [vmem:[%s5296_s1] ss:$16 sps:$4 sm:$0xff]  }
  0x1a   : > { %1972 = vmatpush1.bf16.msra.mxu1 %v3554_v15  ;;  %1932 = vmatprep.subr.bf16.mxu0 %v3555_v16  ;;  %v3575_v29 = vld [vmem:[%s5296_s1 + $0x204] ss:$16 sps:$4 sm:$0xff]   ;;  %v3578_v31 = vld [vmem:[%s5296_s1 + $0x200] ss:$16 sps:$4 sm:$0xff]  }
  0x1b   : > { %1973 = vmatprep.subr.bf16.mxu1 %v3557_v17  ;;  %v3579_v32 = vld [vmem:[%s5296_s1 + $0x1e4] ss:$16 sps:$4 sm:$0xff]   ;;  %v3583_v34 = vld [vmem:[%s5296_s1 + $0x1e0] ss:$16 sps:$4 sm:$0xff]  }
  0x1c   : > { %v3581_v33 = vld [vmem:[%s5296_s1 + $0x3e4] ss:$16 sps:$4 sm:$0xff]   ;;  %v3584_v35 = vld [vmem:[%s5296_s1 + $0x3e0] ss:$16 sps:$4 sm:$0xff]  }
  0x1d   : > { %1933 = vmatpush1.bf16.msra.mxu0 %v3559_v18  ;;  %v3585_v36 = vld [vmem:[%s5296_s1 + $0x1c4] ss:$16 sps:$4 sm:$0xff]   ;;  %v3589_v38 = vld [vmem:[%s5296_s1 + $0x1c0] ss:$16 sps:$4 sm:$0xff]  }
  0x1e   : > { %1974 = vmatpush1.bf16.msra.mxu1 %v3560_v19  ;;  %1934 = vmatprep.subr.bf16.mxu0 %v3561_v20  ;;  %v3587_v37 = vld [vmem:[%s5296_s1 + $0x3c4] ss:$16 sps:$4 sm:$0xff]   ;;  %v3590_v39 = vld [vmem:[%s5296_s1 + $0x3c0] ss:$16 sps:$4 sm:$0xff]  }
  0x1f   : > { %1975 = vmatprep.subr.bf16.mxu1 %v3563_v21  ;;  %v3591_v40 = vld [vmem:[%s5296_s1 + $0x1a4] ss:$16 sps:$4 sm:$0xff]   ;;  %v3595_v42 = vld [vmem:[%s5296_s1 + $0x1a0] ss:$16 sps:$4 sm:$0xff]  }
  0x20   : > { %v3593_v41 = vld [vmem:[%s5296_s1 + $0x3a4] ss:$16 sps:$4 sm:$0xff]   ;;  %v3596_v43 = vld [vmem:[%s5296_s1 + $0x3a0] ss:$16 sps:$4 sm:$0xff]  }
  0x21   : > { %1935 = vmatpush1.bf16.msra.mxu0 %v3565_v22  ;;  %v3597_v44 = vld [vmem:[%s5296_s1 + $0x184] ss:$16 sps:$4 sm:$0xff]   ;;  %v3601_v49 = vld [vmem:[%s5296_s1 + $0x180] ss:$16 sps:$4 sm:$0xff]  }
  0x22   : > { %1976 = vmatpush1.bf16.msra.mxu1 %v3566_v23  ;;  %1936 = vmatprep.subr.bf16.mxu0 %v3567_v24  ;;  %v3599_v45 = vld [vmem:[%s5296_s1 + $0x384] ss:$16 sps:$4 sm:$0xff]   ;;  %v3602_v50 = vld [vmem:[%s5296_s1 + $0x380] ss:$16 sps:$4 sm:$0xff]  }
  0x23   : > { %1977 = vmatprep.subr.bf16.mxu1 %v3569_v25  ;;  %v334_v46 = vld [vmem:[%s4268_s26] sm:$0xff] }
  0x24   : > { %v4277_v47 = vcombine.high %v334_v46, %v334_v46  ;;  %v3603_v52 = vld [vmem:[%s5296_s1 + $0x164] ss:$16 sps:$4 sm:$0xff]   ;;  %v3607_v54 = vld [vmem:[%s5296_s1 + $0x160] ss:$16 sps:$4 sm:$0xff]   ;;  %v4344_v6 = vcombine.low %v334_v46, %v334_v46 }
  0x25   : > { %1937 = vmatpush1.bf16.msra.mxu0 %v3571_v26  ;;  %v3605_v53 = vld [vmem:[%s5296_s1 + $0x364] ss:$16 sps:$4 sm:$0xff]   ;;  %v3608_v55 = vld [vmem:[%s5296_s1 + $0x360] ss:$16 sps:$4 sm:$0xff]  }
  0x26   : > { %1978 = vmatpush1.bf16.msra.mxu1 %v3572_v27  ;;  %1938 = vmatprep.subr.bf16.mxu0 %v3573_v28  ;;  %v3609_v56 = vld [vmem:[%s5296_s1 + $0x144] ss:$16 sps:$4 sm:$0xff]   ;;  %v3613_v58 = vld [vmem:[%s5296_s1 + $0x140] ss:$16 sps:$4 sm:$0xff]  }
  0x27   : > { %1979 = vmatprep.subr.bf16.mxu1 %v3575_v29  ;;  %1956 = vmatprep.mubr.bf16.mxu0 %v4277_v47  ;;  %v3611_v57 = vld [vmem:[%s5296_s1 + $0x344] ss:$16 sps:$4 sm:$0xff]   ;;  %v3614_v59 = vld [vmem:[%s5296_s1 + $0x340] ss:$16 sps:$4 sm:$0xff]  }
  0x28   : > { %v3615_v60 = vld [vmem:[%s5296_s1 + $0x124] ss:$16 sps:$4 sm:$0xff]   ;;  %v3619_v62 = vld [vmem:[%s5296_s1 + $0x120] ss:$16 sps:$4 sm:$0xff]  }
  0x29   : > { %1939 = vmatpush1.bf16.msra.mxu0 %v3577_v30  ;;  %v3617_v61 = vld [vmem:[%s5296_s1 + $0x324] ss:$16 sps:$4 sm:$0xff]   ;;  %v3620_v63 = vld [vmem:[%s5296_s1 + $0x320] ss:$16 sps:$4 sm:$0xff]  }
  0x2a   : > { %1980 = vmatpush1.bf16.msra.mxu1 %v3578_v31  ;;  %1940 = vmatprep.subr.bf16.mxu0 %v3579_v32  ;;  %v3621_v0 = vld [vmem:[%s5296_s1 + $0x104] ss:$16 sps:$4 sm:$0xff]   ;;  %v3625_v2 = vld [vmem:[%s5296_s1 + $0x100] ss:$16 sps:$4 sm:$0xff]  }
  0x2b   : > { %1981 = vmatprep.subr.bf16.mxu1 %v3581_v33  ;;  %v3623_v1 = vld [vmem:[%s5296_s1 + $0x304] ss:$16 sps:$4 sm:$0xff]   ;;  %v3626_v3 = vld [vmem:[%s5296_s1 + $0x300] ss:$16 sps:$4 sm:$0xff]   ;;  %v4426_v33 = vld [vmem:[%s4268_s26 + $0x18] sm:$0xff] }
  0x2c   : > { %v3633_v4 = vld [vmem:[%s5296_s1 + $0x4e4] ss:$16 sps:$4 sm:$0xff]   ;;  %v3631_v8 = vld [vmem:[%s5296_s1 + $0x4e0] ss:$16 sps:$4 sm:$0xff]  }
  0x2d   : > { %1941 = vmatpush2.bf16.msra.mxu0 %v3583_v34  ;;  %v3636_v5 = vld [vmem:[%s5296_s1 + $0x6e4] ss:$16 sps:$4 sm:$0xff]   ;;  %v3634_v9 = vld [vmem:[%s5296_s1 + $0x6e0] ss:$16 sps:$4 sm:$0xff]  }
  0x2e   : > { %1982 = vmatpush2.bf16.msra.mxu1 %v3584_v35  ;;  %1942 = vmatprep.subr.bf16.mxu0 %v3585_v36  ;;  %v3639_v10 = vld [vmem:[%s5296_s1 + $0x4c4] ss:$16 sps:$4 sm:$0xff]   ;;  %v3637_v12 = vld [vmem:[%s5296_s1 + $0x4c0] ss:$16 sps:$4 sm:$0xff]  }
  0x2f   : > { %1983 = vmatprep.subr.bf16.mxu1 %v3587_v37  ;;  %v3642_v11 = vld [vmem:[%s5296_s1 + $0x6c4] ss:$16 sps:$4 sm:$0xff]   ;;  %v3640_v13 = vld [vmem:[%s5296_s1 + $0x6c0] ss:$16 sps:$4 sm:$0xff]   ;;  %v4440_v37 = vcombine.high %v4426_v33, %v4426_v33 }
  0x30   : > { %v3645_v14 = vld [vmem:[%s5296_s1 + $0x4a4] ss:$16 sps:$4 sm:$0xff]   ;;  %v3643_v16 = vld [vmem:[%s5296_s1 + $0x4a0] ss:$16 sps:$4 sm:$0xff]  }
  0x31   : > { %1943 = vmatpush2.bf16.msra.mxu0 %v3589_v38  ;;  %v3648_v15 = vld [vmem:[%s5296_s1 + $0x6a4] ss:$16 sps:$4 sm:$0xff]   ;;  %v3646_v17 = vld [vmem:[%s5296_s1 + $0x6a0] ss:$16 sps:$4 sm:$0xff]  }
  0x32   : > { %1984 = vmatpush2.bf16.msra.mxu1 %v3590_v39  ;;  %1944 = vmatprep.subr.bf16.mxu0 %v3591_v40  ;;  %v3651_v18 = vld [vmem:[%s5296_s1 + $0x484] ss:$16 sps:$4 sm:$0xff]   ;;  %v3649_v20 = vld [vmem:[%s5296_s1 + $0x480] ss:$16 sps:$4 sm:$0xff]  }
  0x33   : > { %1985 = vmatprep.subr.bf16.mxu1 %v3593_v41  ;;  %v3654_v19 = vld [vmem:[%s5296_s1 + $0x684] ss:$16 sps:$4 sm:$0xff]   ;;  %v3652_v21 = vld [vmem:[%s5296_s1 + $0x680] ss:$16 sps:$4 sm:$0xff]  }
  0x34   : > { %v3657_v22 = vld [vmem:[%s5296_s1 + $0x464] ss:$16 sps:$4 sm:$0xff]   ;;  %v3655_v24 = vld [vmem:[%s5296_s1 + $0x460] ss:$16 sps:$4 sm:$0xff]  }
  0x35   : > { %1945 = vmatpush2.bf16.msra.mxu0 %v3595_v42  ;;  %v3660_v23 = vld [vmem:[%s5296_s1 + $0x664] ss:$16 sps:$4 sm:$0xff]   ;;  %v3658_v25 = vld [vmem:[%s5296_s1 + $0x660] ss:$16 sps:$4 sm:$0xff]  }
  0x36   : > { %1986 = vmatpush2.bf16.msra.mxu1 %v3596_v43  ;;  %1946 = vmatprep.subr.bf16.mxu0 %v3597_v44  ;;  %v3663_v26 = vld [vmem:[%s5296_s1 + $0x444] ss:$16 sps:$4 sm:$0xff]   ;;  %v3661_v28 = vld [vmem:[%s5296_s1 + $0x440] ss:$16 sps:$4 sm:$0xff]  }
  0x37   : > { %1987 = vmatprep.subr.bf16.mxu1 %v3599_v45  ;;  %v3666_v27 = vld [vmem:[%s5296_s1 + $0x644] ss:$16 sps:$4 sm:$0xff]   ;;  %v3664_v29 = vld [vmem:[%s5296_s1 + $0x640] ss:$16 sps:$4 sm:$0xff]  }
  0x38   : > { %v3669_v30 = vld [vmem:[%s5296_s1 + $0x424] ss:$16 sps:$4 sm:$0xff]   ;;  %v3667_v34 = vld [vmem:[%s5296_s1 + $0x420] ss:$16 sps:$4 sm:$0xff]  }
  0x39   : > { %1947 = vmatpush2.bf16.msra.mxu0 %v3601_v49  ;;  %v3672_v31 = vld [vmem:[%s5296_s1 + $0x624] ss:$16 sps:$4 sm:$0xff]   ;;  %v3670_v35 = vld [vmem:[%s5296_s1 + $0x620] ss:$16 sps:$4 sm:$0xff]  }
  0x3a   : > { %1988 = vmatpush2.bf16.msra.mxu1 %v3602_v50  ;;  %1948 = vmatprep.subr.bf16.mxu0 %v3603_v52  ;;  %v4423_v32 = vld [vmem:[%s4268_s26 + $0x10] sm:$0xff] }
  0x3b   : > { %1989 = vmatprep.subr.bf16.mxu1 %v3605_v53  ;;  %v4436_v36 = vcombine.high %v4423_v32, %v4423_v32  ;;  %v3675_v38 = vld [vmem:[%s5296_s1 + $0x404] ss:$16 sps:$4 sm:$0xff]   ;;  %v3673_v40 = vld [vmem:[%s5296_s1 + $0x400] ss:$16 sps:$4 sm:$0xff]  }
  0x3c   : > { %v3678_v39 = vld [vmem:[%s5296_s1 + $0x604] ss:$16 sps:$4 sm:$0xff]   ;;  %v3676_v41 = vld [vmem:[%s5296_s1 + $0x600] ss:$16 sps:$4 sm:$0xff]  }
  0x3d   : > { %1949 = vmatpush2.bf16.msra.mxu0 %v3607_v54  ;;  %v3681_v42 = vld [vmem:[%s5296_s1 + $0x5e4] ss:$16 sps:$4 sm:$0xff]   ;;  %v3679_v44 = vld [vmem:[%s5296_s1 + $0x5e0] ss:$16 sps:$4 sm:$0xff]  }
  0x3e   : > { %1990 = vmatpush2.bf16.msra.mxu1 %v3608_v55  ;;  %1950 = vmatprep.subr.bf16.mxu0 %v3609_v56  ;;  %v3684_v43 = vld [vmem:[%s5296_s1 + $0x7e4] ss:$16 sps:$4 sm:$0xff]   ;;  %v3682_v45 = vld [vmem:[%s5296_s1 + $0x7e0] ss:$16 sps:$4 sm:$0xff]  }
  0x3f   : > { %1991 = vmatprep.subr.bf16.mxu1 %v3611_v57  ;;  %v3687_v46 = vld [vmem:[%s5296_s1 + $0x5c4] ss:$16 sps:$4 sm:$0xff]   ;;  %v3685_v49 = vld [vmem:[%s5296_s1 + $0x5c0] ss:$16 sps:$4 sm:$0xff]  }
  0x40   : > { %v3690_v48 = vld [vmem:[%s5296_s1 + $0x7c4] ss:$16 sps:$4 sm:$0xff]   ;;  %v3688_v50 = vld [vmem:[%s5296_s1 + $0x7c0] ss:$16 sps:$4 sm:$0xff]  }
  0x41   : > { %1951 = vmatpush2.bf16.msra.mxu0 %v3613_v58  ;;  %v3693_v52 = vld [vmem:[%s5296_s1 + $0x5a4] ss:$16 sps:$4 sm:$0xff]   ;;  %v3691_v54 = vld [vmem:[%s5296_s1 + $0x5a0] ss:$16 sps:$4 sm:$0xff]  }
  0x42   : > { %1992 = vmatpush2.bf16.msra.mxu1 %v3614_v59  ;;  %1952 = vmatprep.subr.bf16.mxu0 %v3615_v60  ;;  %v3696_v53 = vld [vmem:[%s5296_s1 + $0x7a4] ss:$16 sps:$4 sm:$0xff]   ;;  %v3694_v55 = vld [vmem:[%s5296_s1 + $0x7a0] ss:$16 sps:$4 sm:$0xff]  }
  0x43   : > { %1993 = vmatprep.subr.bf16.mxu1 %v3617_v61  ;;  %v3699_v56 = vld [vmem:[%s5296_s1 + $0x584] ss:$16 sps:$4 sm:$0xff]   ;;  %v3697_v58 = vld [vmem:[%s5296_s1 + $0x580] ss:$16 sps:$4 sm:$0xff]  }
  0x44   : > { %v3702_v57 = vld [vmem:[%s5296_s1 + $0x784] ss:$16 sps:$4 sm:$0xff]   ;;  %v3700_v59 = vld [vmem:[%s5296_s1 + $0x780] ss:$16 sps:$4 sm:$0xff]  }
  0x45   : > { %1953 = vmatpush2.bf16.msra.mxu0 %v3619_v62  ;;  %v3705_v60 = vld [vmem:[%s5296_s1 + $0x564] ss:$16 sps:$4 sm:$0xff]   ;;  %v3703_v62 = vld [vmem:[%s5296_s1 + $0x560] ss:$16 sps:$4 sm:$0xff]  }
  0x46   : > { %1994 = vmatpush2.bf16.msra.mxu1 %v3620_v63  ;;  %1954 = vmatprep.subr.bf16.mxu0 %v3621_v0  ;;  %v3708_v61 = vld [vmem:[%s5296_s1 + $0x764] ss:$16 sps:$4 sm:$0xff]   ;;  %v3706_v63 = vld [vmem:[%s5296_s1 + $0x760] ss:$16 sps:$4 sm:$0xff]  }
  0x47   : > { %1995 = vmatprep.subr.bf16.mxu1 %v3623_v1  ;;  %v3711_v0 = vld [vmem:[%s5296_s1 + $0x544] ss:$16 sps:$4 sm:$0xff]  }
  0x48   : > { %v3714_v1 = vld [vmem:[%s5296_s1 + $0x744] ss:$16 sps:$4 sm:$0xff]  }
  0x49   : > { %1955 = vmatpush2.bf16.msra.mxu0 %v3625_v2  ;;  %v3709_v2 = vld [vmem:[%s5296_s1 + $0x540] ss:$16 sps:$4 sm:$0xff]  }
  0x4a   : > { %1996 = vmatpush2.bf16.msra.mxu1 %v3626_v3  ;;  %2006 = vmatprep.subr.bf16.mxu0 %v3633_v4  ;;  %v3712_v3 = vld [vmem:[%s5296_s1 + $0x740] ss:$16 sps:$4 sm:$0xff]   ;;  %v3717_v4 = vld [vmem:[%s5296_s1 + $0x524] ss:$16 sps:$4 sm:$0xff]  }
  0x4b   : > { %2047 = vmatprep.subr.bf16.mxu1 %v3636_v5  ;;  %v3720_v5 = vld [vmem:[%s5296_s1 + $0x724] ss:$16 sps:$4 sm:$0xff]  }
  0x4c   : > { %1957 = vmatmul.mubr.bf16.vlgmr.msra.gmra.mxu0 %v4344_v6 }
  0x4d   : > { %1998 = vmatmul.mubr.bf16.vlgmr.msra.gmra.mxu1 %v4346_v7  ;;  %2007 = vmatpush1.bf16.msra.mxu0 %v3631_v8  ;;  %v3715_v8 = vld [vmem:[%s5296_s1 + $0x520] ss:$16 sps:$4 sm:$0xff]  }
  0x4e   : > { %2048 = vmatpush1.bf16.msra.mxu1 %v3634_v9  ;;  %2008 = vmatprep.subr.bf16.mxu0 %v3639_v10  ;;  %v3718_v9 = vld [vmem:[%s5296_s1 + $0x720] ss:$16 sps:$4 sm:$0xff]   ;;  %v3723_v10 = vld [vmem:[%s5296_s1 + $0x504] ss:$16 sps:$4 sm:$0xff]  }
  0x4f   : > { %2049 = vmatprep.subr.bf16.mxu1 %v3642_v11  ;;  %2038 = vmatprep.mubr.bf16.mxu0 %v4436_v36  ;;  %v3726_v11 = vld [vmem:[%s5296_s1 + $0x704] ss:$16 sps:$4 sm:$0xff]  }
  0x50   : > { %2079 = vmatprep.mubr.bf16.mxu1 %v4440_v37 }
  0x51   : > { %2009 = vmatpush1.bf16.msra.mxu0 %v3637_v12  ;;  %v3721_v12 = vld [vmem:[%s5296_s1 + $0x500] ss:$16 sps:$4 sm:$0xff]  }
  0x52   : > { %2050 = vmatpush1.bf16.msra.mxu1 %v3640_v13  ;;  %2010 = vmatprep.subr.bf16.mxu0 %v3645_v14  ;;  %v3724_v13 = vld [vmem:[%s5296_s1 + $0x700] ss:$16 sps:$4 sm:$0xff]   ;;  %v3733_v14 = vld [vmem:[%s5296_s1 + $0xec] ss:$16 sps:$4 sm:$0xff]  }
  0x53   : > { %2051 = vmatprep.subr.bf16.mxu1 %v3648_v15  ;;  %v3736_v15 = vld [vmem:[%s5296_s1 + $0x2ec] ss:$16 sps:$4 sm:$0xff]  }
  0x55   : > { %2011 = vmatpush1.bf16.msra.mxu0 %v3643_v16  ;;  %v4560_v16 = vcombine.low %v4423_v32, %v4423_v32  ;;  %v3755_v32 = vld [vmem:[%s5296_s1 + $0x68] ss:$16 sps:$4 sm:$0xff]  }
  0x56   : > { %2052 = vmatpush1.bf16.msra.mxu1 %v3646_v17  ;;  %2012 = vmatprep.subr.bf16.mxu0 %v3651_v18  ;;  %v4564_v17 = vcombine.low %v4426_v33, %v4426_v33  ;;  %v3731_v18 = vld [vmem:[%s5296_s1 + $0xe8] ss:$16 sps:$4 sm:$0xff]  }
  0x57   : > { %2053 = vmatprep.subr.bf16.mxu1 %v3654_v19  ;;  %v3734_v19 = vld [vmem:[%s5296_s1 + $0x2e8] ss:$16 sps:$4 sm:$0xff]  }
  0x58   : > { %v3758_v33 = vld [vmem:[%s5296_s1 + $0x268] ss:$16 sps:$4 sm:$0xff]  }
  0x59   : > { %2013 = vmatpush1.bf16.msra.mxu0 %v3649_v20  ;;  %v3739_v20 = vld [vmem:[%s5296_s1 + $0xcc] ss:$16 sps:$4 sm:$0xff]  }
  0x5a   : > { %2054 = vmatpush1.bf16.msra.mxu1 %v3652_v21  ;;  %2014 = vmatprep.subr.bf16.mxu0 %v3657_v22  ;;  %v3742_v21 = vld [vmem:[%s5296_s1 + $0x2cc] ss:$16 sps:$4 sm:$0xff]   ;;  %v3737_v22 = vld [vmem:[%s5296_s1 + $0xc8] ss:$16 sps:$4 sm:$0xff]  }
  0x5b   : > { %2055 = vmatprep.subr.bf16.mxu1 %v3660_v23  ;;  %v3740_v23 = vld [vmem:[%s5296_s1 + $0x2c8] ss:$16 sps:$4 sm:$0xff]  }
  0x5d   : > { %2015 = vmatpush1.bf16.msra.mxu0 %v3655_v24  ;;  %v3745_v24 = vld [vmem:[%s5296_s1 + $0xac] ss:$16 sps:$4 sm:$0xff]  }
  0x5e   : > { %2056 = vmatpush1.bf16.msra.mxu1 %v3658_v25  ;;  %2016 = vmatprep.subr.bf16.mxu0 %v3663_v26  ;;  %v3748_v25 = vld [vmem:[%s5296_s1 + $0x2ac] ss:$16 sps:$4 sm:$0xff]   ;;  %v3743_v26 = vld [vmem:[%s5296_s1 + $0xa8] ss:$16 sps:$4 sm:$0xff]  }
  0x5f   : > { %2057 = vmatprep.subr.bf16.mxu1 %v3666_v27  ;;  %v3746_v27 = vld [vmem:[%s5296_s1 + $0x2a8] ss:$16 sps:$4 sm:$0xff]  }
  0x61   : > { %2017 = vmatpush1.bf16.msra.mxu0 %v3661_v28  ;;  %v3751_v28 = vld [vmem:[%s5296_s1 + $0x8c] ss:$16 sps:$4 sm:$0xff]  }
  0x62   : > { %2058 = vmatpush1.bf16.msra.mxu1 %v3664_v29  ;;  %2018 = vmatprep.subr.bf16.mxu0 %v3669_v30  ;;  %v3752_v29 = vld [vmem:[%s5296_s1 + $0x288] ss:$16 sps:$4 sm:$0xff]   ;;  %v3757_v30 = vld [vmem:[%s5296_s1 + $0x6c] ss:$16 sps:$4 sm:$0xff]  }
  0x63   : > { %2059 = vmatprep.subr.bf16.mxu1 %v3672_v31  ;;  %v3760_v31 = vld [vmem:[%s5296_s1 + $0x26c] ss:$16 sps:$4 sm:$0xff]  }
  0x65   : > { %2019 = vmatpush1.bf16.msra.mxu0 %v3667_v34  ;;  %v3763_v34 = vld [vmem:[%s5296_s1 + $0x4c] ss:$16 sps:$4 sm:$0xff]  }
  0x66   : > { %2060 = vmatpush1.bf16.msra.mxu1 %v3670_v35  ;;  %2020 = vmatprep.subr.bf16.mxu0 %v3675_v38  ;;  %v3766_v35 = vld [vmem:[%s5296_s1 + $0x24c] ss:$16 sps:$4 sm:$0xff]   ;;  %v3761_v38 = vld [vmem:[%s5296_s1 + $0x48] ss:$16 sps:$4 sm:$0xff]  }
  0x67   : > { %2061 = vmatprep.subr.bf16.mxu1 %v3678_v39  ;;  %v3764_v39 = vld [vmem:[%s5296_s1 + $0x248] ss:$16 sps:$4 sm:$0xff]  }
  0x69   : > { %2021 = vmatpush1.bf16.msra.mxu0 %v3673_v40  ;;  %v3769_v40 = vld [vmem:[%s5296_s1 + $0x2c] ss:$16 sps:$4 sm:$0xff]  }
  0x6a   : > { %2062 = vmatpush1.bf16.msra.mxu1 %v3676_v41  ;;  %2022 = vmatprep.subr.bf16.mxu0 %v3681_v42  ;;  %v3772_v41 = vld [vmem:[%s5296_s1 + $0x22c] ss:$16 sps:$4 sm:$0xff]   ;;  %v3767_v42 = vld [vmem:[%s5296_s1 + $0x28] ss:$16 sps:$4 sm:$0xff]  }
  0x6b   : > { %2063 = vmatprep.subr.bf16.mxu1 %v3684_v43  ;;  %v3770_v43 = vld [vmem:[%s5296_s1 + $0x228] ss:$16 sps:$4 sm:$0xff]  }
  0x6d   : > { %2023 = vmatpush2.bf16.msra.mxu0 %v3679_v44  ;;  %v3775_v44 = vld [vmem:[%s5296_s1 + $0xc] ss:$16 sps:$4 sm:$0xff]  }
  0x6e   : > { %2064 = vmatpush2.bf16.msra.mxu1 %v3682_v45  ;;  %2024 = vmatprep.subr.bf16.mxu0 %v3687_v46  ;;  %v3778_v45 = vld [vmem:[%s5296_s1 + $0x20c] ss:$16 sps:$4 sm:$0xff]   ;;  %v3773_v46 = vld [vmem:[%s5296_s1 + $0x8] ss:$16 sps:$4 sm:$0xff]  }
  0x6f   : > { %2065 = vmatprep.subr.bf16.mxu1 %v3690_v48  ;;  %v3776_v48 = vld [vmem:[%s5296_s1 + $0x208] ss:$16 sps:$4 sm:$0xff]  }
  0x71   : > { %2025 = vmatpush2.bf16.msra.mxu0 %v3685_v49  ;;  %v3781_v49 = vld [vmem:[%s5296_s1 + $0x1ec] ss:$16 sps:$4 sm:$0xff]  }
  0x72   : > { %2066 = vmatpush2.bf16.msra.mxu1 %v3688_v50  ;;  %2026 = vmatprep.subr.bf16.mxu0 %v3693_v52  ;;  %v3784_v50 = vld [vmem:[%s5296_s1 + $0x3ec] ss:$16 sps:$4 sm:$0xff]   ;;  %v3779_v52 = vld [vmem:[%s5296_s1 + $0x1e8] ss:$16 sps:$4 sm:$0xff]  }
  0x73   : > { %2067 = vmatprep.subr.bf16.mxu1 %v3696_v53  ;;  %v3782_v53 = vld [vmem:[%s5296_s1 + $0x3e8] ss:$16 sps:$4 sm:$0xff]  }
  0x75   : > { %2027 = vmatpush2.bf16.msra.mxu0 %v3691_v54  ;;  %v3787_v54 = vld [vmem:[%s5296_s1 + $0x1cc] ss:$16 sps:$4 sm:$0xff]  }
  0x76   : > { %2068 = vmatpush2.bf16.msra.mxu1 %v3694_v55  ;;  %2028 = vmatprep.subr.bf16.mxu0 %v3699_v56  ;;  %v3790_v55 = vld [vmem:[%s5296_s1 + $0x3cc] ss:$16 sps:$4 sm:$0xff]   ;;  %v3785_v56 = vld [vmem:[%s5296_s1 + $0x1c8] ss:$16 sps:$4 sm:$0xff]  }
  0x77   : > { %2069 = vmatprep.subr.bf16.mxu1 %v3702_v57  ;;  %v3788_v57 = vld [vmem:[%s5296_s1 + $0x3c8] ss:$16 sps:$4 sm:$0xff]  }
  0x79   : > { %2029 = vmatpush2.bf16.msra.mxu0 %v3697_v58  ;;  %v3793_v58 = vld [vmem:[%s5296_s1 + $0x1ac] ss:$16 sps:$4 sm:$0xff]  }
  0x7a   : > { %2070 = vmatpush2.bf16.msra.mxu1 %v3700_v59  ;;  %2030 = vmatprep.subr.bf16.mxu0 %v3705_v60  ;;  %v3796_v59 = vld [vmem:[%s5296_s1 + $0x3ac] ss:$16 sps:$4 sm:$0xff]   ;;  %v3791_v60 = vld [vmem:[%s5296_s1 + $0x1a8] ss:$16 sps:$4 sm:$0xff]  }
  0x7b   : > { %2071 = vmatprep.subr.bf16.mxu1 %v3708_v61  ;;  %v3794_v61 = vld [vmem:[%s5296_s1 + $0x3a8] ss:$16 sps:$4 sm:$0xff]  }
  0x7d   : > { %2031 = vmatpush2.bf16.msra.mxu0 %v3703_v62  ;;  %v3799_v62 = vld [vmem:[%s5296_s1 + $0x18c] ss:$16 sps:$4 sm:$0xff]  }
  0x7e   : > { %2072 = vmatpush2.bf16.msra.mxu1 %v3706_v63  ;;  %2032 = vmatprep.subr.bf16.mxu0 %v3711_v0  ;;  %v3802_v63 = vld [vmem:[%s5296_s1 + $0x38c] ss:$16 sps:$4 sm:$0xff]   ;;  %v3797_v0 = vld [vmem:[%s5296_s1 + $0x188] ss:$16 sps:$4 sm:$0xff]  }
  0x7f   : > { %2073 = vmatprep.subr.bf16.mxu1 %v3714_v1  ;;  %v3800_v1 = vld [vmem:[%s5296_s1 + $0x388] ss:$16 sps:$4 sm:$0xff]  }
  0x81   : > { %2033 = vmatpush2.bf16.msra.mxu0 %v3709_v2  ;;  %v3805_v2 = vld [vmem:[%s5296_s1 + $0x16c] ss:$16 sps:$4 sm:$0xff]  }
  0x82   : > { %2074 = vmatpush2.bf16.msra.mxu1 %v3712_v3  ;;  %2034 = vmatprep.subr.bf16.mxu0 %v3717_v4  ;;  %v3808_v3 = vld [vmem:[%s5296_s1 + $0x36c] ss:$16 sps:$4 sm:$0xff]   ;;  %v3803_v4 = vld [vmem:[%s5296_s1 + $0x168] ss:$16 sps:$4 sm:$0xff]  }
  0x83   : > { %2075 = vmatprep.subr.bf16.mxu1 %v3720_v5  ;;  %v3806_v5 = vld [vmem:[%s5296_s1 + $0x368] ss:$16 sps:$4 sm:$0xff]  }
  0x85   : > { %2035 = vmatpush2.bf16.msra.mxu0 %v3715_v8  ;;  %v3811_v8 = vld [vmem:[%s5296_s1 + $0x14c] ss:$16 sps:$4 sm:$0xff]  }
  0x86   : > { %2076 = vmatpush2.bf16.msra.mxu1 %v3718_v9  ;;  %2036 = vmatprep.subr.bf16.mxu0 %v3723_v10  ;;  %v3814_v9 = vld [vmem:[%s5296_s1 + $0x34c] ss:$16 sps:$4 sm:$0xff]   ;;  %v3809_v10 = vld [vmem:[%s5296_s1 + $0x148] ss:$16 sps:$4 sm:$0xff]  }
  0x87   : > { %2077 = vmatprep.subr.bf16.mxu1 %v3726_v11  ;;  %v3812_v11 = vld [vmem:[%s5296_s1 + $0x348] ss:$16 sps:$4 sm:$0xff]  }
  0x89   : > { %2037 = vmatpush2.bf16.msra.mxu0 %v3721_v12  ;;  %v3817_v12 = vld [vmem:[%s5296_s1 + $0x12c] ss:$16 sps:$4 sm:$0xff]  }
  0x8a   : > { %2078 = vmatpush2.bf16.msra.mxu1 %v3724_v13  ;;  %2088 = vmatprep.subr.bf16.mxu0 %v3733_v14  ;;  %v3820_v13 = vld [vmem:[%s5296_s1 + $0x32c] ss:$16 sps:$4 sm:$0xff]   ;;  %v3815_v14 = vld [vmem:[%s5296_s1 + $0x128] ss:$16 sps:$4 sm:$0xff]  }
  0x8b   : > { %2129 = vmatprep.subr.bf16.mxu1 %v3736_v15  ;;  %v3818_v15 = vld [vmem:[%s5296_s1 + $0x328] ss:$16 sps:$4 sm:$0xff]  }
  0x8c   : > { %2039 = vmatmul.mubr.bf16.vlgmr.msra.gmra.mxu0 %v4560_v16 }
  0x8d   : > { %2080 = vmatmul.mubr.bf16.vlgmr.msra.gmra.mxu1 %v4564_v17  ;;  %2089 = vmatpush1.bf16.msra.mxu0 %v3731_v18  ;;  %v3823_v18 = vld [vmem:[%s5296_s1 + $0x10c] ss:$16 sps:$4 sm:$0xff]  }
  0x8e   : > { %2130 = vmatpush1.bf16.msra.mxu1 %v3734_v19  ;;  %2090 = vmatprep.subr.bf16.mxu0 %v3739_v20  ;;  %v3826_v19 = vld [vmem:[%s5296_s1 + $0x30c] ss:$16 sps:$4 sm:$0xff]   ;;  %v3821_v20 = vld [vmem:[%s5296_s1 + $0x108] ss:$16 sps:$4 sm:$0xff]  }
  0x8f   : > { %2131 = vmatprep.subr.bf16.mxu1 %v3742_v21  ;;  %2120 = vmatprep.mubr.bf16.mxu0 %v4277_v47  ;;  %v3754_v47 = vld [vmem:[%s5296_s1 + $0x28c] ss:$16 sps:$4 sm:$0xff]   ;;  %v3824_v21 = vld [vmem:[%s5296_s1 + $0x308] ss:$16 sps:$4 sm:$0xff]  }
  0x90   : > { %2161 = vmatprep.mubr.bf16.mxu1 %v4286_v51  ;;  %v3749_v51 = vld [vmem:[%s5296_s1 + $0x88] ss:$16 sps:$4 sm:$0xff]  }
  0x91   : > { %2091 = vmatpush1.bf16.msra.mxu0 %v3737_v22  ;;  %v3829_v22 = vld [vmem:[%s5296_s1 + $0x4ec] ss:$16 sps:$4 sm:$0xff]  }
  0x92   : > { %2132 = vmatpush1.bf16.msra.mxu1 %v3740_v23  ;;  %2092 = vmatprep.subr.bf16.mxu0 %v3745_v24  ;;  %v3832_v23 = vld [vmem:[%s5296_s1 + $0x6ec] ss:$16 sps:$4 sm:$0xff]   ;;  %v3827_v24 = vld [vmem:[%s5296_s1 + $0x4e8] ss:$16 sps:$4 sm:$0xff]  }
  0x93   : > { %2133 = vmatprep.subr.bf16.mxu1 %v3748_v25  ;;  %v3830_v25 = vld [vmem:[%s5296_s1 + $0x6e8] ss:$16 sps:$4 sm:$0xff]  }
  0x95   : > { %2093 = vmatpush1.bf16.msra.mxu0 %v3743_v26  ;;  %v3835_v26 = vld [vmem:[%s5296_s1 + $0x4cc] ss:$16 sps:$4 sm:$0xff]  }
  0x96   : > { %2134 = vmatpush1.bf16.msra.mxu1 %v3746_v27  ;;  %2094 = vmatprep.subr.bf16.mxu0 %v3751_v28  ;;  %v3838_v27 = vld [vmem:[%s5296_s1 + $0x6cc] ss:$16 sps:$4 sm:$0xff]   ;;  %v3833_v28 = vld [vmem:[%s5296_s1 + $0x4c8] ss:$16 sps:$4 sm:$0xff]  }
  0x97   : > { %2135 = vmatprep.subr.bf16.mxu1 %v3754_v47  ;;  %v3836_v47 = vld [vmem:[%s5296_s1 + $0x6c8] ss:$16 sps:$4 sm:$0xff]  }
  0x99   : > { %2095 = vmatpush1.bf16.msra.mxu0 %v3749_v51  ;;  %v3841_v51 = vld [vmem:[%s5296_s1 + $0x4ac] ss:$16 sps:$4 sm:$0xff]  }
  0x9a   : > { %2136 = vmatpush1.bf16.msra.mxu1 %v3752_v29  ;;  %2096 = vmatprep.subr.bf16.mxu0 %v3757_v30  ;;  %v3844_v29 = vld [vmem:[%s5296_s1 + $0x6ac] ss:$16 sps:$4 sm:$0xff]   ;;  %v3839_v30 = vld [vmem:[%s5296_s1 + $0x4a8] ss:$16 sps:$4 sm:$0xff]  }
  0x9b   : > { %2137 = vmatprep.subr.bf16.mxu1 %v3760_v31  ;;  %v3850_v31 = vld [vmem:[%s5296_s1 + $0x68c] ss:$16 sps:$4 sm:$0xff]  }
  0x9d   : > { %2097 = vmatpush1.bf16.msra.mxu0 %v3755_v32  ;;  %v3845_v32 = vld [vmem:[%s5296_s1 + $0x488] ss:$16 sps:$4 sm:$0xff]  }
  0x9e   : > { %2138 = vmatpush1.bf16.msra.mxu1 %v3758_v33  ;;  %2098 = vmatprep.subr.bf16.mxu0 %v3763_v34  ;;  %v3856_v33 = vld [vmem:[%s5296_s1 + $0x66c] ss:$16 sps:$4 sm:$0xff]   ;;  %v3851_v34 = vld [vmem:[%s5296_s1 + $0x468] ss:$16 sps:$4 sm:$0xff]  }
  0x9f   : > { %2139 = vmatprep.subr.bf16.mxu1 %v3766_v35  ;;  %v3854_v35 = vld [vmem:[%s5296_s1 + $0x668] ss:$16 sps:$4 sm:$0xff]  }
  0xa1   : > { %2099 = vmatpush1.bf16.msra.mxu0 %v3761_v38  ;;  %v3859_v38 = vld [vmem:[%s5296_s1 + $0x44c] ss:$16 sps:$4 sm:$0xff]  }
  0xa2   : > { %2140 = vmatpush1.bf16.msra.mxu1 %v3764_v39  ;;  %2100 = vmatprep.subr.bf16.mxu0 %v3769_v40  ;;  %v3862_v39 = vld [vmem:[%s5296_s1 + $0x64c] ss:$16 sps:$4 sm:$0xff]   ;;  %v3857_v40 = vld [vmem:[%s5296_s1 + $0x448] ss:$16 sps:$4 sm:$0xff]  }
  0xa3   : > { %2141 = vmatprep.subr.bf16.mxu1 %v3772_v41  ;;  %v3860_v41 = vld [vmem:[%s5296_s1 + $0x648] ss:$16 sps:$4 sm:$0xff]  }
  0xa5   : > { %2101 = vmatpush1.bf16.msra.mxu0 %v3767_v42  ;;  %v3865_v42 = vld [vmem:[%s5296_s1 + $0x42c] ss:$16 sps:$4 sm:$0xff]  }
  0xa6   : > { %2142 = vmatpush1.bf16.msra.mxu1 %v3770_v43  ;;  %2102 = vmatprep.subr.bf16.mxu0 %v3775_v44  ;;  %v3868_v43 = vld [vmem:[%s5296_s1 + $0x62c] ss:$16 sps:$4 sm:$0xff]   ;;  %v3863_v44 = vld [vmem:[%s5296_s1 + $0x428] ss:$16 sps:$4 sm:$0xff]  }
  0xa7   : > { %2143 = vmatprep.subr.bf16.mxu1 %v3778_v45  ;;  %v3866_v45 = vld [vmem:[%s5296_s1 + $0x628] ss:$16 sps:$4 sm:$0xff]  }
  0xa9   : > { %2103 = vmatpush1.bf16.msra.mxu0 %v3773_v46  ;;  %v3871_v46 = vld [vmem:[%s5296_s1 + $0x40c] ss:$16 sps:$4 sm:$0xff]  }
  0xaa   : > { %2144 = vmatpush1.bf16.msra.mxu1 %v3776_v48  ;;  %2104 = vmatprep.subr.bf16.mxu0 %v3781_v49  ;;  %v3874_v48 = vld [vmem:[%s5296_s1 + $0x60c] ss:$16 sps:$4 sm:$0xff]   ;;  %v3869_v49 = vld [vmem:[%s5296_s1 + $0x408] ss:$16 sps:$4 sm:$0xff]  }
  0xab   : > { %2145 = vmatprep.subr.bf16.mxu1 %v3784_v50  ;;  %v3872_v50 = vld [vmem:[%s5296_s1 + $0x608] ss:$16 sps:$4 sm:$0xff]  }
  0xad   : > { %2105 = vmatpush2.bf16.msra.mxu0 %v3779_v52  ;;  %v3877_v52 = vld [vmem:[%s5296_s1 + $0x5ec] ss:$16 sps:$4 sm:$0xff]  }
  0xae   : > { %2146 = vmatpush2.bf16.msra.mxu1 %v3782_v53  ;;  %2106 = vmatprep.subr.bf16.mxu0 %v3787_v54  ;;  %v3880_v53 = vld [vmem:[%s5296_s1 + $0x7ec] ss:$16 sps:$4 sm:$0xff]   ;;  %v3875_v54 = vld [vmem:[%s5296_s1 + $0x5e8] ss:$16 sps:$4 sm:$0xff]  }
  0xaf   : > { %2147 = vmatprep.subr.bf16.mxu1 %v3790_v55  ;;  %v3878_v55 = vld [vmem:[%s5296_s1 + $0x7e8] ss:$16 sps:$4 sm:$0xff]  }
  0xb1   : > { %2107 = vmatpush2.bf16.msra.mxu0 %v3785_v56  ;;  %v3883_v56 = vld [vmem:[%s5296_s1 + $0x5cc] ss:$16 sps:$4 sm:$0xff]  }
  0xb2   : > { %2148 = vmatpush2.bf16.msra.mxu1 %v3788_v57  ;;  %2108 = vmatprep.subr.bf16.mxu0 %v3793_v58  ;;  %v3886_v57 = vld [vmem:[%s5296_s1 + $0x7cc] ss:$16 sps:$4 sm:$0xff]   ;;  %v3881_v58 = vld [vmem:[%s5296_s1 + $0x5c8] ss:$16 sps:$4 sm:$0xff]  }
  0xb3   : > { %2149 = vmatprep.subr.bf16.mxu1 %v3796_v59  ;;  %v3884_v59 = vld [vmem:[%s5296_s1 + $0x7c8] ss:$16 sps:$4 sm:$0xff]  }
  0xb5   : > { %2109 = vmatpush2.bf16.msra.mxu0 %v3791_v60  ;;  %v3889_v60 = vld [vmem:[%s5296_s1 + $0x5ac] ss:$16 sps:$4 sm:$0xff]  }
  0xb6   : > { %2150 = vmatpush2.bf16.msra.mxu1 %v3794_v61  ;;  %2110 = vmatprep.subr.bf16.mxu0 %v3799_v62  ;;  %v3892_v61 = vld [vmem:[%s5296_s1 + $0x7ac] ss:$16 sps:$4 sm:$0xff]   ;;  %v3887_v62 = vld [vmem:[%s5296_s1 + $0x5a8] ss:$16 sps:$4 sm:$0xff]  }
  0xb7   : > { %2151 = vmatprep.subr.bf16.mxu1 %v3802_v63  ;;  %v3890_v63 = vld [vmem:[%s5296_s1 + $0x7a8] ss:$16 sps:$4 sm:$0xff]  }
  0xb9   : > { %2111 = vmatpush2.bf16.msra.mxu0 %v3797_v0  ;;  %v3895_v0 = vld [vmem:[%s5296_s1 + $0x58c] ss:$16 sps:$4 sm:$0xff]  }
  0xba   : > { %2152 = vmatpush2.bf16.msra.mxu1 %v3800_v1  ;;  %2112 = vmatprep.subr.bf16.mxu0 %v3805_v2  ;;  %v3898_v1 = vld [vmem:[%s5296_s1 + $0x78c] ss:$16 sps:$4 sm:$0xff]   ;;  %v3893_v2 = vld [vmem:[%s5296_s1 + $0x588] ss:$16 sps:$4 sm:$0xff]  }
  0xbb   : > { %2153 = vmatprep.subr.bf16.mxu1 %v3808_v3  ;;  %v3896_v3 = vld [vmem:[%s5296_s1 + $0x788] ss:$16 sps:$4 sm:$0xff]  }
  0xbd   : > { %2113 = vmatpush2.bf16.msra.mxu0 %v3803_v4  ;;  %v3901_v4 = vld [vmem:[%s5296_s1 + $0x56c] ss:$16 sps:$4 sm:$0xff]  }
  0xbe   : > { %2154 = vmatpush2.bf16.msra.mxu1 %v3806_v5  ;;  %2114 = vmatprep.subr.bf16.mxu0 %v3811_v8  ;;  %v3904_v5 = vld [vmem:[%s5296_s1 + $0x76c] ss:$16 sps:$4 sm:$0xff]   ;;  %v3899_v8 = vld [vmem:[%s5296_s1 + $0x568] ss:$16 sps:$4 sm:$0xff]  }
  0xbf   : > { %2155 = vmatprep.subr.bf16.mxu1 %v3814_v9  ;;  %v3902_v9 = vld [vmem:[%s5296_s1 + $0x768] ss:$16 sps:$4 sm:$0xff]  }
  0xc1   : > { %2115 = vmatpush2.bf16.msra.mxu0 %v3809_v10  ;;  %v3907_v10 = vld [vmem:[%s5296_s1 + $0x54c] ss:$16 sps:$4 sm:$0xff]  }
  0xc2   : > { %2156 = vmatpush2.bf16.msra.mxu1 %v3812_v11  ;;  %2116 = vmatprep.subr.bf16.mxu0 %v3817_v12  ;;  %v3910_v11 = vld [vmem:[%s5296_s1 + $0x74c] ss:$16 sps:$4 sm:$0xff]   ;;  %v3905_v12 = vld [vmem:[%s5296_s1 + $0x548] ss:$16 sps:$4 sm:$0xff]  }
  0xc3   : > { %2157 = vmatprep.subr.bf16.mxu1 %v3820_v13  ;;  %v3908_v13 = vld [vmem:[%s5296_s1 + $0x748] ss:$16 sps:$4 sm:$0xff]  }
  0xc5   : > { %2117 = vmatpush2.bf16.msra.mxu0 %v3815_v14  ;;  %v3913_v14 = vld [vmem:[%s5296_s1 + $0x52c] ss:$16 sps:$4 sm:$0xff]  }
  0xc6   : > { %2158 = vmatpush2.bf16.msra.mxu1 %v3818_v15  ;;  %2118 = vmatprep.subr.bf16.mxu0 %v3823_v18  ;;  %v3916_v15 = vld [vmem:[%s5296_s1 + $0x72c] ss:$16 sps:$4 sm:$0xff]   ;;  %v3911_v18 = vld [vmem:[%s5296_s1 + $0x528] ss:$16 sps:$4 sm:$0xff]  }
  0xc7   : > { %2159 = vmatprep.subr.bf16.mxu1 %v3826_v19  ;;  %v3914_v19 = vld [vmem:[%s5296_s1 + $0x728] ss:$16 sps:$4 sm:$0xff]  }
  0xc9   : > { %2119 = vmatpush2.bf16.msra.mxu0 %v3821_v20  ;;  %v3919_v20 = vld [vmem:[%s5296_s1 + $0x50c] ss:$16 sps:$4 sm:$0xff]  }
  0xca   : > { %2160 = vmatpush2.bf16.msra.mxu1 %v3824_v21  ;;  %2170 = vmatprep.subr.bf16.mxu0 %v3829_v22  ;;  %v3922_v21 = vld [vmem:[%s5296_s1 + $0x70c] ss:$16 sps:$4 sm:$0xff]   ;;  %v3917_v22 = vld [vmem:[%s5296_s1 + $0x508] ss:$16 sps:$4 sm:$0xff]  }
  0xcb   : > { %2211 = vmatprep.subr.bf16.mxu1 %v3832_v23  ;;  %v3920_v23 = vld [vmem:[%s5296_s1 + $0x708] ss:$16 sps:$4 sm:$0xff]  }
  0xcc   : > { %2121 = vmatmul.mubr.bf16.vlgmr.msra.gmra.mxu0 %v4344_v6  ;;  %v3842_v6 = vld [vmem:[%s5296_s1 + $0x6a8] ss:$16 sps:$4 sm:$0xff]  }
  0xcd   : > { %2162 = vmatmul.mubr.bf16.vlgmr.msra.gmra.mxu1 %v4346_v7  ;;  %2171 = vmatpush1.bf16.msra.mxu0 %v3827_v24  ;;  %v3847_v7 = vld [vmem:[%s5296_s1 + $0x48c] ss:$16 sps:$4 sm:$0xff]  }
  0xce   : > { %2212 = vmatpush1.bf16.msra.mxu1 %v3830_v25  ;;  %2172 = vmatprep.subr.bf16.mxu0 %v3835_v26  ;;  %v3925_v24 = vld [vmem:[%s5298_s3 + $0x74] ss:$8 sps:$4 sm:$0xff]   ;;  %v3923_v25 = vld [vmem:[%s5298_s3 + $0x70] ss:$8 sps:$4 sm:$0xff]   ;;  %v3928_v26 = vld [vmem:[%s5298_s3 + $0x64] ss:$8 sps:$4 sm:$0xff]  }
  0xcf   : > { %2213 = vmatprep.subr.bf16.mxu1 %v3838_v27  ;;  %2202 = vmatprep.mubr.bf16.mxu0 %v4436_v36  ;;  %v3848_v36 = vld [vmem:[%s5296_s1 + $0x688] ss:$16 sps:$4 sm:$0xff]  }
  0xd0   : > { %2243 = vmatprep.mubr.bf16.mxu1 %v4440_v37  ;;  %v3853_v37 = vld [vmem:[%s5296_s1 + $0x46c] ss:$16 sps:$4 sm:$0xff]  }
  0xd1   : > { %2173 = vmatpush1.bf16.msra.mxu0 %v3833_v28 }
  0xd2   : > { %2214 = vmatpush1.bf16.msra.mxu1 %v3836_v47  ;;  %2174 = vmatprep.subr.bf16.mxu0 %v3841_v51  ;;  %v3926_v47 = vld [vmem:[%s5298_s3 + $0x60] ss:$8 sps:$4 sm:$0xff]  }
  0xd3   : > { %2215 = vmatprep.subr.bf16.mxu1 %v3844_v29 }
  0xd5   : > { %2175 = vmatpush1.bf16.msra.mxu0 %v3839_v30  ;;  %v3931_v30 = vld [vmem:[%s5298_s3 + $0x54] ss:$8 sps:$4 sm:$0xff]  }
  0xd6   : > { %2216 = vmatpush1.bf16.msra.mxu1 %v3842_v6  ;;  %2176 = vmatprep.subr.bf16.mxu0 %v3847_v7 }
  0xd7   : > { %2217 = vmatprep.subr.bf16.mxu1 %v3850_v31 }
  0xd9   : > { %2177 = vmatpush1.bf16.msra.mxu0 %v3845_v32  ;;  %v3934_v32 = vld [vmem:[%s5298_s3 + $0x44] ss:$8 sps:$4 sm:$0xff]  }
  0xda   : > { %2218 = vmatpush1.bf16.msra.mxu1 %v3848_v36  ;;  %2178 = vmatprep.subr.bf16.mxu0 %v3853_v37  ;;  %v3971_v36 = vld [vmem:[%s5298_s3 + $0x170] ss:$8 sps:$4 sm:$0xff]   ;;  %v3973_v37 = vld [vmem:[%s5298_s3 + $0x174] ss:$8 sps:$4 sm:$0xff]  }
  0xdb   : > { %2219 = vmatprep.subr.bf16.mxu1 %v3856_v33  ;;  %v3976_v33 = vld [vmem:[%s5298_s3 + $0x164] ss:$8 sps:$4 sm:$0xff]  }
  0xdd   : > { %2179 = vmatpush1.bf16.msra.mxu0 %v3851_v34  ;;  %v3932_v34 = vld [vmem:[%s5298_s3 + $0x40] ss:$8 sps:$4 sm:$0xff]  }
  0xde   : > { %2220 = vmatpush1.bf16.msra.mxu1 %v3854_v35  ;;  %2180 = vmatprep.subr.bf16.mxu0 %v3859_v38  ;;  %v3974_v35 = vld [vmem:[%s5298_s3 + $0x160] ss:$8 sps:$4 sm:$0xff]   ;;  %v3937_v38 = vld [vmem:[%s5298_s3 + $0x34] ss:$8 sps:$4 sm:$0xff]  }
  0xdf   : > { %2221 = vmatprep.subr.bf16.mxu1 %v3862_v39  ;;  %v3979_v39 = vld [vmem:[%s5298_s3 + $0x154] ss:$8 sps:$4 sm:$0xff]  }
  0xe1   : > { %2181 = vmatpush1.bf16.msra.mxu0 %v3857_v40  ;;  %v3935_v40 = vld [vmem:[%s5298_s3 + $0x30] ss:$8 sps:$4 sm:$0xff]  }
  0xe2   : > { %2222 = vmatpush1.bf16.msra.mxu1 %v3860_v41  ;;  %2182 = vmatprep.subr.bf16.mxu0 %v3865_v42  ;;  %v3977_v41 = vld [vmem:[%s5298_s3 + $0x150] ss:$8 sps:$4 sm:$0xff]   ;;  %v3940_v42 = vld [vmem:[%s5298_s3 + $0x24] ss:$8 sps:$4 sm:$0xff]  }
  0xe3   : > { %2223 = vmatprep.subr.bf16.mxu1 %v3868_v43  ;;  %v3982_v43 = vld [vmem:[%s5298_s3 + $0x144] ss:$8 sps:$4 sm:$0xff]  }
  0xe5   : > { %2183 = vmatpush1.bf16.msra.mxu0 %v3863_v44  ;;  %v3938_v44 = vld [vmem:[%s5298_s3 + $0x20] ss:$8 sps:$4 sm:$0xff]  }
  0xe6   : > { %2224 = vmatpush1.bf16.msra.mxu1 %v3866_v45  ;;  %2184 = vmatprep.subr.bf16.mxu0 %v3871_v46  ;;  %v3980_v45 = vld [vmem:[%s5298_s3 + $0x140] ss:$8 sps:$4 sm:$0xff]   ;;  %v3943_v46 = vld [vmem:[%s5298_s3 + $0x14] ss:$8 sps:$4 sm:$0xff]  }
  0xe7   : > { %2225 = vmatprep.subr.bf16.mxu1 %v3874_v48  ;;  %v3985_v48 = vld [vmem:[%s5298_s3 + $0x134] ss:$8 sps:$4 sm:$0xff]  }
  0xe9   : > { %2185 = vmatpush1.bf16.msra.mxu0 %v3869_v49  ;;  %v3941_v49 = vld [vmem:[%s5298_s3 + $0x10] ss:$8 sps:$4 sm:$0xff]  }
  0xea   : > { %2226 = vmatpush1.bf16.msra.mxu1 %v3872_v50  ;;  %2186 = vmatprep.subr.bf16.mxu0 %v3877_v52  ;;  %v3983_v50 = vld [vmem:[%s5298_s3 + $0x130] ss:$8 sps:$4 sm:$0xff]   ;;  %v3946_v52 = vld [vmem:[%s5298_s3 + $0x4] ss:$8 sps:$4 sm:$0xff]  }
  0xeb   : > { %2227 = vmatprep.subr.bf16.mxu1 %v3880_v53  ;;  %v3988_v53 = vld [vmem:[%s5298_s3 + $0x124] ss:$8 sps:$4 sm:$0xff]  }
  0xed   : > { %2187 = vmatpush2.bf16.msra.mxu0 %v3875_v54  ;;  %v3944_v54 = vld [vmem:[%s5298_s3] ss:$8 sps:$4 sm:$0xff]  }
  0xee   : > { %2228 = vmatpush2.bf16.msra.mxu1 %v3878_v55  ;;  %2188 = vmatprep.subr.bf16.mxu0 %v3883_v56  ;;  %v3986_v55 = vld [vmem:[%s5298_s3 + $0x120] ss:$8 sps:$4 sm:$0xff]   ;;  %v3949_v56 = vld [vmem:[%s5298_s3 + $0xf4] ss:$8 sps:$4 sm:$0xff]  }
  0xef   : > { %2229 = vmatprep.subr.bf16.mxu1 %v3886_v57  ;;  %v3991_v57 = vld [vmem:[%s5298_s3 + $0x114] ss:$8 sps:$4 sm:$0xff]  }
  0xf1   : > { %2189 = vmatpush2.bf16.msra.mxu0 %v3881_v58  ;;  %v3947_v58 = vld [vmem:[%s5298_s3 + $0xf0] ss:$8 sps:$4 sm:$0xff]  }
  0xf2   : > { %2230 = vmatpush2.bf16.msra.mxu1 %v3884_v59  ;;  %2190 = vmatprep.subr.bf16.mxu0 %v3889_v60  ;;  %v3989_v59 = vld [vmem:[%s5298_s3 + $0x110] ss:$8 sps:$4 sm:$0xff]   ;;  %v3952_v60 = vld [vmem:[%s5298_s3 + $0xe4] ss:$8 sps:$4 sm:$0xff]  }
  0xf3   : > { %2231 = vmatprep.subr.bf16.mxu1 %v3892_v61  ;;  %v3994_v61 = vld [vmem:[%s5298_s3 + $0x104] ss:$8 sps:$4 sm:$0xff]  }
  0xf5   : > { %2191 = vmatpush2.bf16.msra.mxu0 %v3887_v62  ;;  %v3950_v62 = vld [vmem:[%s5298_s3 + $0xe0] ss:$8 sps:$4 sm:$0xff]  }
  0xf6   : > { %2232 = vmatpush2.bf16.msra.mxu1 %v3890_v63  ;;  %2192 = vmatprep.subr.bf16.mxu0 %v3895_v0  ;;  %v3992_v63 = vld [vmem:[%s5298_s3 + $0x100] ss:$8 sps:$4 sm:$0xff]   ;;  %v3955_v0 = vld [vmem:[%s5298_s3 + $0xd4] ss:$8 sps:$4 sm:$0xff]  }
  0xf7   : > { %2233 = vmatprep.subr.bf16.mxu1 %v3898_v1  ;;  %v3997_v1 = vld [vmem:[%s5298_s3 + $0x1f4] ss:$8 sps:$4 sm:$0xff]  }
  0xf9   : > { %2193 = vmatpush2.bf16.msra.mxu0 %v3893_v2  ;;  %v3953_v2 = vld [vmem:[%s5298_s3 + $0xd0] ss:$8 sps:$4 sm:$0xff]  }
  0xfa   : > { %2234 = vmatpush2.bf16.msra.mxu1 %v3896_v3  ;;  %2194 = vmatprep.subr.bf16.mxu0 %v3901_v4  ;;  %v3995_v3 = vld [vmem:[%s5298_s3 + $0x1f0] ss:$8 sps:$4 sm:$0xff]   ;;  %v3958_v4 = vld [vmem:[%s5298_s3 + $0xc4] ss:$8 sps:$4 sm:$0xff]  }
  0xfb   : > { %2235 = vmatprep.subr.bf16.mxu1 %v3904_v5  ;;  %v4000_v5 = vld [vmem:[%s5298_s3 + $0x1e4] ss:$8 sps:$4 sm:$0xff]  }
  0xfd   : > { %2195 = vmatpush2.bf16.msra.mxu0 %v3899_v8  ;;  %v3956_v8 = vld [vmem:[%s5298_s3 + $0xc0] ss:$8 sps:$4 sm:$0xff]  }
  0xfe   : > { %2236 = vmatpush2.bf16.msra.mxu1 %v3902_v9  ;;  %2196 = vmatprep.subr.bf16.mxu0 %v3907_v10  ;;  %v3998_v9 = vld [vmem:[%s5298_s3 + $0x1e0] ss:$8 sps:$4 sm:$0xff]   ;;  %v3961_v10 = vld [vmem:[%s5298_s3 + $0xb4] ss:$8 sps:$4 sm:$0xff]  }
  0xff   : > { %2237 = vmatprep.subr.bf16.mxu1 %v3910_v11  ;;  %v4003_v11 = vld [vmem:[%s5298_s3 + $0x1d4] ss:$8 sps:$4 sm:$0xff]  }
 0x101   : > { %2197 = vmatpush2.bf16.msra.mxu0 %v3905_v12  ;;  %v596_v12 = vlaneseq }
 0x102   : > { %2238 = vmatpush2.bf16.msra.mxu1 %v3908_v13  ;;  %2198 = vmatprep.subr.bf16.mxu0 %v3913_v14  ;;  %v3959_v13 = vld [vmem:[%s5298_s3 + $0xb0] ss:$8 sps:$4 sm:$0xff]  }
 0x103   : > { %2239 = vmatprep.subr.bf16.mxu1 %v3916_v15  ;;  %v4001_v14 = vld [vmem:[%s5298_s3 + $0x1d0] ss:$8 sps:$4 sm:$0xff]   ;;  %v3964_v15 = vld [vmem:[%s5298_s3 + $0xa4] ss:$8 sps:$4 sm:$0xff]  }
 0x105   : > { %2199 = vmatpush2.bf16.msra.mxu0 %v3911_v18  ;;  %v4006_v18 = vld [vmem:[%s5298_s3 + $0x1c4] ss:$8 sps:$4 sm:$0xff]  }
 0x106   : > { %2240 = vmatpush2.bf16.msra.mxu1 %v3914_v19  ;;  %2200 = vmatprep.subr.bf16.mxu0 %v3919_v20  ;;  %v5112_v19 = vshrl.u32 %v596_v12, 7  ;;  %v3962_v20 = vld [vmem:[%s5298_s3 + $0xa0] ss:$8 sps:$4 sm:$0xff]   ;;  %v4030_v12 = vld [vmem:[%s5300_s5 + $0x10] sm:$0xff]  }
 0x107   : > { %2241 = vmatprep.subr.bf16.mxu1 %v3922_v21  ;;  %v4004_v21 = vld [vmem:[%s5298_s3 + $0x1c0] ss:$8 sps:$4 sm:$0xff]  }
 0x109   : > { %2201 = vmatpush2.bf16.msra.mxu0 %v3917_v22  ;;  %v3967_v22 = vld [vmem:[%s5298_s3 + $0x94] ss:$8 sps:$4 sm:$0xff]  }
 0x10a   : > { %2242 = vmatpush2.bf16.msra.mxu1 %v3920_v23  ;;  %2656 = vmatprep.subr.bf16.mxu0 %v3925_v24  ;;  %v4009_v23 = vld [vmem:[%s5298_s3 + $0x1b4] ss:$8 sps:$4 sm:$0xff]   ;;  %v5127_v24 = vsub.s32 0, %v5112_v19 }
 0x10b   : > { %2697 = vmatprep.subr.bf16.mxu1 %v3973_v37 }
 0x10c   : > { %v4961_v27 = vpop.f32.mrf.mxu0  ;;  %2203 = vmatmul.mubr.bf16.vlgmr.msra.gmra.mxu0 %v4560_v16  ;;  %v3929_v16 = vld [vmem:[%s5298_s3 + $0x50] ss:$8 sps:$4 sm:$0xff]  }
 0x10d   : > { %v4963_v28 = vpop.f32.mrf.mxu1  ;;  %2244 = vmatmul.mubr.bf16.vlgmr.msra.gmra.mxu1 %v4564_v17  ;;  %2657 = vmatpush1.bf16.msra.mxu0 %v3923_v25  ;;  %v5132_v25 = vld [vmem:[%s5297_s2] sm:$0xf] }
 0x10e   : > { %v4970_v51 = vpop.f32.mrf.mxu0  ;;  %2658 = vmatprep.subr.bf16.mxu0 %v3928_v26  ;;  %2698 = vmatpush1.bf16.msra.mxu1 %v3971_v36  ;;  %v5135_v26 = vsub.s32 1, %v5112_v19  ;;  %v4012_v36 = vld [vmem:[%s5298_s3 + $0x1a4] ss:$8 sps:$4 sm:$0xff]  }
 0x10f   : > { %v4972_v29 = vpop.f32.mrf.mxu1  ;;  %2699 = vmatprep.subr.bf16.mxu1 %v3976_v33  ;;  %v4010_v33 = vld [vmem:[%s5298_s3 + $0x1a0] ss:$8 sps:$4 sm:$0xff]  }
 0x110   : > { %v1962_v6 = vpop.f32.mrf.mxu0 }
 0x111   : > { %v2003_v7 = vpop.f32.mrf.mxu1  ;;  %2659 = vmatpush1.bf16.msra.mxu0 %v3926_v47  ;;  %v3965_v47 = vld [vmem:[%s5298_s3 + $0x90] ss:$8 sps:$4 sm:$0xff]   ;;  %v3970_v6 = vld [vmem:[%s5298_s3 + $0x84] ss:$8 sps:$4 sm:$0xff]  }
 0x112   : > { %v1963_v17 = vpop.f32.mrf.mxu0  ;;  %2660 = vmatprep.subr.bf16.mxu0 %v3931_v30  ;;  %2700 = vmatpush1.bf16.msra.mxu1 %v3974_v35  ;;  %v4007_v30 = vld [vmem:[%s5298_s3 + $0x1b0] ss:$8 sps:$4 sm:$0xff]   ;;  %v599_v7 = vrot.slane %v5132_v25, %v5127_v24 }
 0x113   : > { %v2004_v31 = vpop.f32.mrf.mxu1  ;;  %2701 = vmatprep.subr.bf16.mxu1 %v3979_v39  ;;  %v3968_v17 = vld [vmem:[%s5298_s3 + $0x80] ss:$8 sps:$4 sm:$0xff]  }
 0x114   : > { %v1959_v31 = vadd.f32 %v4961_v27, %v599_v7 }
 0x115   : > { %2661 = vmatpush1.bf16.msra.mxu0 %v3929_v16  ;;  %v603_v16 = vrot.slane %v5132_v25, %v5135_v26 }
 0x116   : > { %2662 = vmatprep.subr.bf16.mxu0 %v3934_v32  ;;  %2702 = vmatpush1.bf16.msra.mxu1 %v3977_v41  ;;  %v2000_v37 = vadd.f32 %v4963_v28, %v1959_v31  ;;  %v4013_v28 = vld [vmem:[%s5298_s3 + $0x190] ss:$8 sps:$4 sm:$0xff]  }
 0x117   : > { %2703 = vmatprep.subr.bf16.mxu1 %v3982_v43  ;;  %v1961_v32 = vadd.f32 %v4970_v51, %v603_v16 }
 0x119   : > { %2663 = vmatpush1.bf16.msra.mxu0 %v3932_v34 }
 0x11a   : > { %2664 = vmatprep.subr.bf16.mxu0 %v3937_v38  ;;  %2704 = vmatpush1.bf16.msra.mxu1 %v3980_v45  ;;  %v2002_v38 = vadd.f32 %v4972_v29, %v1961_v32 }
 0x11b   : > { %2705 = vmatprep.subr.bf16.mxu1 %v3985_v48 }
 0x11d   : > { %2665 = vmatpush1.bf16.msra.mxu0 %v3935_v40  ;;  %v4015_v40 = vld [vmem:[%s5298_s3 + $0x194] ss:$8 sps:$4 sm:$0xff]  }
 0x11e   : > { %2666 = vmatprep.subr.bf16.mxu0 %v3940_v42  ;;  %2706 = vmatpush1.bf16.msra.mxu1 %v3983_v50 }
 0x11f   : > { %2707 = vmatprep.subr.bf16.mxu1 %v3988_v53 }
 0x121   : > { %2667 = vmatpush1.bf16.msra.mxu0 %v3938_v44 }
 0x122   : > { %2668 = vmatprep.subr.bf16.mxu0 %v3943_v46  ;;  %2708 = vmatpush1.bf16.msra.mxu1 %v3986_v55 }
 0x123   : > { %2709 = vmatprep.subr.bf16.mxu1 %v3991_v57 }
 0x125   : > { %2669 = vmatpush1.bf16.msra.mxu0 %v3941_v49  ;;  %v4018_v49 = vld [vmem:[%s5298_s3 + $0x184] ss:$8 sps:$4 sm:$0xff]  }
 0x126   : > { %2670 = vmatprep.subr.bf16.mxu0 %v3946_v52  ;;  %2710 = vmatpush1.bf16.msra.mxu1 %v3989_v59  ;;  %v4016_v52 = vld [vmem:[%s5298_s3 + $0x180] ss:$8 sps:$4 sm:$0xff]  }
 0x127   : > { %2711 = vmatprep.subr.bf16.mxu1 %v3994_v61 }
 0x129   : > { %2671 = vmatpush1.bf16.msra.mxu0 %v3944_v54 }
 0x12a   : > { %2672 = vmatprep.subr.bf16.mxu0 %v3949_v56  ;;  %2712 = vmatpush1.bf16.msra.mxu1 %v3992_v63  ;;  %v4019_v63 = vld [vmem:[%s5300_s5 + $0x78] sm:$0xff]  }
 0x12b   : > { %2713 = vmatprep.subr.bf16.mxu1 %v3997_v1  ;;  %v4021_v1 = vld [vmem:[%s5300_s5 + $0x70] sm:$0xff]  }
 0x12d   : > { %2673 = vmatpush2.bf16.msra.mxu0 %v3947_v58 }
 0x12e   : > { %2674 = vmatprep.subr.bf16.mxu0 %v3952_v60  ;;  %2714 = vmatpush2.bf16.msra.mxu1 %v3995_v3  ;;  %v4023_v3 = vld [vmem:[%s5300_s5 + $0x68] sm:$0xff]  }
 0x12f   : > { %2715 = vmatprep.subr.bf16.mxu1 %v4000_v5  ;;  %v4025_v5 = vld [vmem:[%s5300_s5 + $0x60] sm:$0xff]  }
 0x131   : > { %2675 = vmatpush2.bf16.msra.mxu0 %v3950_v62 }
 0x132   : > { %2676 = vmatprep.subr.bf16.mxu0 %v3955_v0  ;;  %2716 = vmatpush2.bf16.msra.mxu1 %v3998_v9  ;;  %v4020_v0 = vld [vmem:[%s5300_s5 + $0x38] sm:$0xff]  }
 0x133   : > { %2717 = vmatprep.subr.bf16.mxu1 %v4003_v11  ;;  %v4027_v9 = vld [vmem:[%s5300_s5 + $0x58] sm:$0xff]   ;;  %v4029_v11 = vld [vmem:[%s5300_s5 + $0x50] sm:$0xff]  }
 0x135   : > { %2677 = vmatpush2.bf16.msra.mxu0 %v3953_v2  ;;  %v4022_v2 = vld [vmem:[%s5300_s5 + $0x30] sm:$0xff]  }
 0x136   : > { %2678 = vmatprep.subr.bf16.mxu0 %v3958_v4  ;;  %2718 = vmatpush2.bf16.msra.mxu1 %v4001_v14  ;;  %v4024_v4 = vld [vmem:[%s5300_s5 + $0x28] sm:$0xff]   ;;  %v610_v14 = vsub.s32 3, %v5112_v19 }
 0x137   : > { %2719 = vmatprep.subr.bf16.mxu1 %v4006_v18 }
 0x138   : > { %v611_v18 = vrot.slane %v5132_v25, %v610_v14  ;;  %v4067_v14 = vmov 0  }
 0x139   : > { %2679 = vmatpush2.bf16.msra.mxu0 %v3956_v8  ;;  %v4026_v8 = vld [vmem:[%s5300_s5 + $0x20] sm:$0xff]  }
 0x13a   : > { %2680 = vmatprep.subr.bf16.mxu0 %v3961_v10  ;;  %2720 = vmatpush2.bf16.msra.mxu1 %v4004_v21  ;;  %v4028_v10 = vld [vmem:[%s5300_s5 + $0x18] sm:$0xff]  }
 0x13b   : > { %2721 = vmatprep.subr.bf16.mxu1 %v4009_v23 }
 0x13d   : > { %2681 = vmatpush2.bf16.msra.mxu0 %v3959_v13  ;;  %v606_v13 = vsub.s32 2, %v5112_v19 }
 0x13e   : > { %2682 = vmatprep.subr.bf16.mxu0 %v3964_v15  ;;  %2722 = vmatpush2.bf16.msra.mxu1 %v4007_v30 }
 0x13f   : > { %2723 = vmatprep.subr.bf16.mxu1 %v4012_v36  ;;  %v607_v15 = vrot.slane %v5132_v25, %v606_v13  ;;  %v4056_v13 = vld [vmem:[%s5302_s7] ss:$8 sps:$4 sm:$0xff]  }
 0x141   : > { %2683 = vmatpush2.bf16.msra.mxu0 %v3962_v20 }
 0x142   : > { %2684 = vmatprep.subr.bf16.mxu0 %v3967_v22  ;;  %2724 = vmatpush2.bf16.msra.mxu1 %v4010_v33 }
 0x143   : > { %2725 = vmatprep.subr.bf16.mxu1 %v4015_v40 }
 0x145   : > { %2685 = vmatpush2.bf16.msra.mxu0 %v3965_v47 }
 0x146   : > { %2686 = vmatprep.subr.bf16.mxu0 %v3970_v6  ;;  %2726 = vmatpush2.bf16.msra.mxu1 %v4013_v28  ;;  %v4034_v28 = vld [vmem:[%s5300_s5] sm:$0xff]  }
 0x147   : > { %2727 = vmatprep.subr.bf16.mxu1 %v4018_v49  ;;  %v4041_v49 = vld [vmem:[%s5302_s7 + $0x50] ss:$8 sps:$4 sm:$0xff]  }
 0x149   : > { %2687 = vmatpush2.bf16.msra.mxu0 %v3968_v17 }
 0x14a   : > { %2728 = vmatpush2.bf16.msra.mxu1 %v4016_v52  ;;  %3500 = vmatprep.subr.bf16.mxu0 %v4019_v63  ;;  %v4044_v52 = vld [vmem:[%s5302_s7 + $0x40] ss:$8 sps:$4 sm:$0xff]  }
 0x14c   : > { %v2040_v34 = vpop.f32.mrf.mxu0 }
 0x14d   : > { %v2081_v35 = vpop.f32.mrf.mxu1  ;;  %v2041_v39 = vadd.f32 %v2040_v34, %v2000_v37 }
 0x14e   : > { %v2042_v27 = vpop.f32.mrf.mxu0 }
 0x14f   : > { %v2083_v51 = vpop.f32.mrf.mxu1  ;;  %v2082_v41 = vadd.f32 %v2081_v35, %v2041_v39  ;;  %v2043_v42 = vadd.f32 %v2042_v27, %v2002_v38  ;;  %v4031_v27 = vld [vmem:[%s5300_s5 + $0x48] sm:$0xff]  }
 0x150   : > { %v2044_v43 = vpop.f32.mrf.mxu0 }
 0x151   : > { %v2085_v44 = vpop.f32.mrf.mxu1  ;;  %v2084_v45 = vadd.f32 %v2083_v51, %v2043_v42  ;;  %v2252_v29 = vmax.f32 %v2082_v41, 0.0  ;;  %v4032_v51 = vld [vmem:[%s5300_s5 + $0x8] sm:$0xff]   ;;  %v4033_v42 = vld [vmem:[%s5300_s5 + $0x40] sm:$0xff]  }
 0x152   : > { %v2045_v46 = vpop.f32.mrf.mxu0  ;;  %v4035_v44 = vld [vmem:[%s5302_s7 + $0x70] ss:$8 sps:$4 sm:$0xff]  }
 0x153   : > { %v2086_v48 = vpop.f32.mrf.mxu1  ;;  %v2253_v50 = vmax.f32 %v2084_v45, 0.0  ;;  %v2256_v54 = vpack.c.bf16 %v2252_v29, %v2252_v29  ;;  %v4037_v45 = vld [vmem:[%s5302_s7 + $0x74] ss:$8 sps:$4 sm:$0xff]   ;;  %v4040_v29 = vld [vmem:[%s5302_s7 + $0x64] ss:$8 sps:$4 sm:$0xff]  }
 0x154   : > { %3027 = vmatprep.subr.bf16.mxu1 %v4037_v45  ;;  %v4038_v46 = vld [vmem:[%s5302_s7 + $0x60] ss:$8 sps:$4 sm:$0xff]   ;;  %v4043_v48 = vld [vmem:[%s5302_s7 + $0x54] ss:$8 sps:$4 sm:$0xff]  }
 0x155   : > { %v2257_v53 = vpack.c.bf16 %v2253_v50, %v2253_v50  ;;  %v4046_v50 = vld [vmem:[%s5302_s7 + $0x44] ss:$8 sps:$4 sm:$0xff]  }
 0x157   : > { %2688 = vmatprep.mubr.bf16.mxu0 %v2257_v53  ;;  %v4049_v53 = vld [vmem:[%s5302_s7 + $0x34] ss:$8 sps:$4 sm:$0xff]  }
 0x158   : > { %2689 = vmatmul.mubr.bf16.vlgmr.msra.gmra.mxu0 %v2256_v54  ;;  %v4047_v54 = vld [vmem:[%s5302_s7 + $0x30] ss:$8 sps:$4 sm:$0xff]  }
 0x159   : > { %3501 = vmatpush3.bf16.msra.mxu0 %v4020_v0 }
 0x15a   : > { %3502 = vmatprep.subr.bf16.mxu0 %v4021_v1 }
 0x15d   : > { %3503 = vmatpush3.bf16.msra.mxu0 %v4022_v2 }
 0x15e   : > { %3504 = vmatprep.subr.bf16.mxu0 %v4023_v3 }
 0x161   : > { %3505 = vmatpush3.bf16.msra.mxu0 %v4024_v4 }
 0x162   : > { %3506 = vmatprep.subr.bf16.mxu0 %v4025_v5 }
 0x165   : > { %3507 = vmatpush3.bf16.msra.mxu0 %v4026_v8 }
 0x166   : > { %3508 = vmatprep.subr.bf16.mxu0 %v4027_v9 }
 0x169   : > { %3509 = vmatpush3.bf16.msra.mxu0 %v4028_v10  ;;  %v4055_v10 = vld [vmem:[%s5302_s7 + $0x14] ss:$8 sps:$4 sm:$0xff]  }
 0x16a   : > { %3510 = vmatprep.subr.bf16.mxu0 %v4029_v11  ;;  %v4053_v11 = vld [vmem:[%s5302_s7 + $0x10] ss:$8 sps:$4 sm:$0xff]  }
 0x16d   : > { %3511 = vmatpush3.bf16.msra.mxu0 %v4030_v12  ;;  %v4058_v12 = vld [vmem:[%s5302_s7 + $0x4] ss:$8 sps:$4 sm:$0xff]  }
 0x16e   : > { %3512 = vmatprep.subr.bf16.mxu0 %v4031_v27 }
 0x171   : > { %3513 = vmatpush3.bf16.msra.mxu0 %v4032_v51 }
 0x172   : > { %3514 = vmatprep.subr.bf16.mxu0 %v4033_v42 }
 0x175   : > { %3515 = vmatpush3.bf16.msra.mxu0 %v4034_v28 }
 0x18c   : > { %v2122_v55 = vpop.f32.mrf.mxu0 }
 0x18d   : > { %v2163_v56 = vpop.f32.mrf.mxu1  ;;  %v2123_v20 = vadd.f32 %v2122_v55, %v607_v15  ;;  %v4052_v55 = vld [vmem:[%s5302_s7 + $0x24] ss:$8 sps:$4 sm:$0xff]  }
 0x18e   : > { %v2124_v57 = vpop.f32.mrf.mxu0 }
 0x18f   : > { %v2165_v58 = vpop.f32.mrf.mxu1  ;;  %v2125_v21 = vadd.f32 %v2124_v57, %v611_v18  ;;  %v2164_v22 = vadd.f32 %v2163_v56, %v2123_v20  ;;  %v4050_v56 = vld [vmem:[%s5302_s7 + $0x20] ss:$8 sps:$4 sm:$0xff]  }
 0x190   : > { %v2126_v59 = vpop.f32.mrf.mxu0  ;;  %v2324_v57 = vld [vmem:[%s5299_s4] sm:$0x3] }
 0x191   : > { %v2167_v60 = vpop.f32.mrf.mxu1  ;;  %v2166_v30 = vadd.f32 %v2165_v58, %v2125_v21  ;;  %v2329_v58 = vrot.slane %v2324_v57, %v5127_v24  ;;  %v2333_v59 = vrot.slane %v2324_v57, %v5135_v26  ;;  %v3463_v18 = vld [vmem:[%s5301_s6] ss:$0 sm:$0xff] }
 0x192   : > { %v2127_v61 = vpop.f32.mrf.mxu0 }
 0x193   : > { %v2168_v62 = vpop.f32.mrf.mxu1 }
 0x1cc   : > { %v2204_v23 = vpop.f32.mrf.mxu0 }
 0x1cd   : > { %v2245_v47 = vpop.f32.mrf.mxu1  ;;  %v2205_v6 = vadd.f32 %v2204_v23, %v2164_v22 }
 0x1ce   : > { %v2206_v7 = vpop.f32.mrf.mxu0 }
 0x1cf   : > { %v2247_v16 = vpop.f32.mrf.mxu1  ;;  %v2246_v17 = vadd.f32 %v2245_v47, %v2205_v6  ;;  %v2207_v31 = vadd.f32 %v2206_v7, %v2166_v30  ;;  %v2935_v7 = vld [vmem:[%s5303_s8] sm:$0x3] }
 0x1d0   : > { %v2208_v32 = vpop.f32.mrf.mxu0 }
 0x1d1   : > { %v2249_v36 = vpop.f32.mrf.mxu1  ;;  %v2248_v37 = vadd.f32 %v2247_v16, %v2207_v31  ;;  %v2254_v33 = vmax.f32 %v2246_v17, 0.0  ;;  %v2940_v16 = vrot.slane %v2935_v7, %v5127_v24  ;;  %v2944_v17 = vrot.slane %v2935_v7, %v5135_v26 }
 0x1d2   : > { %v2209_v19 = vpop.f32.mrf.mxu0 }
 0x1d3   : > { %v2250_v34 = vpop.f32.mrf.mxu1  ;;  %v2255_v35 = vmax.f32 %v2248_v37, 0.0  ;;  %v2258_v25 = vpack.c.bf16 %v2254_v33, %v2254_v33 }
 0x1d5   : > { %v2259_v38 = vpack.c.bf16 %v2255_v35, %v2255_v35 }
 0x1d7   : > { %2729 = vmatprep.mubr.bf16.mxu1 %v2259_v38 }
 0x1d8   : > { %2730 = vmatmul.mubr.bf16.vlgmr.msra.gmra.mxu1 %v2258_v25 }
 0x1d9   : > { %3028 = vmatpush1.bf16.msra.mxu1 %v4035_v44  ;;  %3059 = vmatprep.mubr.bf16.mxu1 %v4067_v14 }
 0x1da   : > { %3029 = vmatprep.subr.bf16.mxu1 %v4040_v29 }
 0x1dd   : > { %3030 = vmatpush1.bf16.msra.mxu1 %v4038_v46 }
 0x1de   : > { %3031 = vmatprep.subr.bf16.mxu1 %v4043_v48 }
 0x1e1   : > { %3032 = vmatpush1.bf16.msra.mxu1 %v4041_v49 }
 0x1e2   : > { %3033 = vmatprep.subr.bf16.mxu1 %v4046_v50 }
 0x1e5   : > { %3034 = vmatpush1.bf16.msra.mxu1 %v4044_v52 }
 0x1e6   : > { %3035 = vmatprep.subr.bf16.mxu1 %v4049_v53 }
 0x1e9   : > { %3036 = vmatpush1.bf16.msra.mxu1 %v4047_v54 }
 0x1ea   : > { %3037 = vmatprep.subr.bf16.mxu1 %v4052_v55 }
 0x1ed   : > { %3038 = vmatpush1.bf16.msra.mxu1 %v4050_v56 }
 0x1ee   : > { %3039 = vmatprep.subr.bf16.mxu1 %v4055_v10 }
 0x1f1   : > { %3040 = vmatpush1.bf16.msra.mxu1 %v4053_v11 }
 0x1f2   : > { %3041 = vmatprep.subr.bf16.mxu1 %v4058_v12 }
 0x1f5   : > { %3042 = vmatpush1.bf16.msra.mxu1 %v4056_v13 }
 0x218   : > { %v2690_v39 = vpop.f32.mrf.mxu0 }
 0x219   : > { %v2691_v60 = vadd.f32 %v2690_v39, %v2329_v58 }
 0x21a   : > { %v2692_v40 = vpop.f32.mrf.mxu0 }
 0x21b   : > { %v2693_v62 = vadd.f32 %v2692_v40, %v2333_v59 }
 0x21c   : > { %v2694_v41 = vpop.f32.mrf.mxu0 }
 0x21e   : > { %v2695_v43 = vpop.f32.mrf.mxu0 }
 0x298   : > { %v2731_v61 = vpop.f32.mrf.mxu1 }
 0x299   : > { %v2732_v63 = vadd.f32 %v2731_v61, %v2691_v60 }
 0x29a   : > { %v2733_v0 = vpop.f32.mrf.mxu1 }
 0x29b   : > { %v2734_v1 = vadd.f32 %v2733_v0, %v2693_v62  ;;  %v2738_v2 = vmax.f32 %v2732_v63, 0.0 }
 0x29c   : > { %v2735_v3 = vpop.f32.mrf.mxu1 }
 0x29d   : > { %v2739_v4 = vmax.f32 %v2734_v1, 0.0  ;;  %v2740_v9 = vpack.c.bf16 %v2738_v2, %v2738_v2 }
 0x29e   : > { %v2736_v5 = vpop.f32.mrf.mxu1 }
 0x29f   : > { %v2741_v8 = vpack.c.bf16 %v2739_v4, %v2739_v4 }
 0x2a1   : > { %2909 = vmatprep.mubr.bf16.mxu0 %v2741_v8 }
 0x2a2   : > { %2910 = vmatmul.mubr.bf16.vlgmr.msra.gmra.mxu0 %v2740_v9 }
 0x362   : > { %v3516_v15 = vpop.f32.mrf.mxu0 }
 0x364   : > { %v3517_v20 = vpop.f32.mrf.mxu0 }
 0x365   : > { %v3518_v21 = vadd.f32 %v3517_v20, %v3516_v15 }
 0x366   : > { %v3519_v22 = vpop.f32.mrf.mxu0 }
 0x367   : > { %v2912_v23 = vadd.f32 %v3518_v21, %v3463_v18 }
 0x368   : > { %v3520_v47 = vpop.f32.mrf.mxu0 }
 0x369   : > { %v2917_v30 = vmax.f32 %v2912_v23, 0.0 }
 0x36b   : > { %v2918_v6 = vpack.c.bf16 %v2917_v30, %v2917_v30 }
 0x36d   : > { %3060 = vmatmul.mubr.bf16.vlgmr.msra.gmra.mxu1 %v2918_v6 }
 0x42d   : > { %v3061_v31 = vpop.f32.mrf.mxu1 }
 0x42e   : > { %v3062_v32 = vadd.f32 %v3061_v31, %v2940_v16 }
 0x42f   : > { %v3063_v36 = vpop.f32.mrf.mxu1 }
 0x430   : > { %v3068_v37 = vmax.f32 %v3062_v32, 0.0  ;;  %v3064_v33 = vadd.f32 %v3063_v36, %v2944_v17 }
 0x431   : > { %v3065_v19 = vpop.f32.mrf.mxu1 }
 0x432   : > { %3069 = vst [vmem:[%s332_s13] sm:$0xff] %v3068_v37  ;;  %3070 = vst [vmem:[%s332_s13 + $0x8] sm:$0xff] %v3064_v33 }
 0x433   : > { %v3066_v34 = vpop.f32.mrf.mxu1 }
 0x434 PF: > { %s19_s30 = sadd.s32 1, %s4065_s30  }
 0x435   : > { %p16_p4 = scmp.ge.s32.totalorder %s19_s30, 4  }
 0x437   :  { %18 = sbr.rel (!%p16_p4) target bundleno = 1 (0x1), region = 86 }

</bundles_post_ra>
